<compile_context>
chip_gen: v5e
topology: v5e:2x2
jax: 0.10.0
libtpu: 0.0.40
codegen_flags: <defaults>
</compile_context>

<pallas_src>
import functools

import jax
import jax.numpy as jnp
from jax.experimental import pallas as pl
from jax.experimental.pallas import tpu as pltpu


def _round_up(x, m):
    return (x + m - 1) // m * m


# --------------------------- Fused model kernel ------------------------------
def make_fused_gru_kernel(n_layers, T, B_pad, Hp):
    """n_layers GRU (batch_first semantics, h0 = 0) + Linear head, fully fused."""
    Gp = 3 * Hp  # per-gate 128-lane slabs: [r-slab | z-slab | n-slab]

    def kernel(*refs):
        # refs = x, (Wi, Wh, bi, bh) * n_layers, Wfc, bfc | out | proj_scr, seq_scr
        x_ref = refs[0]
        wfc_ref = refs[1 + 4 * n_layers]
        bfc_ref = refs[2 + 4 * n_layers]
        out_ref = refs[3 + 4 * n_layers]
        proj_ref = refs[4 + 4 * n_layers]   # (T*B_pad, Gp) f32 gate pre-activations
        seq_ref = refs[5 + 4 * n_layers]    # (T*B_pad, Hp) f32 inter-layer sequence

        h_last = None
        for l in range(n_layers):
            wi_ref, wh_ref, bi_ref, bh_ref = refs[1 + 4 * l: 5 + 4 * l]

            # Layer input (bf16 for the MXU): x for layer 0, previous layer's
            # f32 sequence (cast once, off the critical path) otherwise.
            if l == 0:
                cur_in = x_ref[...]
            else:
                cur_in = seq_ref[...].astype(jnp.bfloat16)

            # Hoisted input projection for the WHOLE sequence: one big
            # (T*B_pad, F) @ (F, Gp) bf16 matmul with f32 accumulation.
            proj_ref[...] = (
                jnp.dot(cur_in, wi_ref[...], preferred_element_type=jnp.float32)
                + bi_ref[...])                      # [r | z | n] slabs, bias folded

            # Recurrent bias broadcast hoisted out of the unrolled T loop.
            bh_b = jnp.broadcast_to(bh_ref[...], (B_pad, Gp))

            h = jnp.zeros((B_pad, Hp), jnp.float32)
            for t in range(T):                      # T small & static -> full unroll
                r0 = t * B_pad                      # static, 8-sublane aligned
                gi = proj_ref[pl.ds(r0, B_pad), :]  # (B_pad, Gp) full-tile load
                # Dot straight from the VMEM ref (don't pin Wh in vregs across
                # the unrolled loop); bf16 inputs, f32 accumulate.
                gh = jnp.dot(h.astype(jnp.bfloat16), wh_ref[...],
                             preferred_element_type=jnp.float32) + bh_b
                # Per-gate 128-lane slabs -> every slice is vreg-aligned.
                r = jax.nn.sigmoid(gi[:, 0:Hp] + gh[:, 0:Hp])
                z = jax.nn.sigmoid(gi[:, Hp:2 * Hp] + gh[:, Hp:2 * Hp])
                n = jnp.tanh(gi[:, 2 * Hp:] + r * gh[:, 2 * Hp:])
                h = (1.0 - z) * n + z * h
                if l < n_layers - 1:
                    # Lane-dense, full (8,128)-tile f32 store of this step's output.
                    seq_ref[pl.ds(r0, B_pad), :] = h
            h_last = h

        # FC head on the last-layer, last-timestep hidden state only (f32 matmul;
        # tiny, kept at full precision). Only HBM writeback of the whole model.
        out_ref[...] = (
            jnp.dot(h_last, wfc_ref[...], preferred_element_type=jnp.float32)
            + bfc_ref[...]).astype(out_ref.dtype)

    return kernel


# --------------------------- Weight preparation -------------------------------
def pack_gru_layer(w_ih, w_hh, b_ih, b_hh, H, in_pad):
    """PyTorch [r|z|n]-packed GRU weights -> per-gate 128-lane slabs.

    Returns:
      Wi: (in_pad, 3*Hp) bf16  [W_ir^T|0  W_iz^T|0  W_in^T|0], rows zero-padded
      Wh: (Hp,    3*Hp) bf16  [W_hr^T|0  W_hz^T|0  W_hn^T|0], rows zero-padded
      bi: (1, 3*Hp) f32  [b_ir+b_hr|0  b_iz+b_hz|0  b_in|0]
      bh: (1, 3*Hp) f32  [0  0  b_hn|0]   (b_hn must stay inside r*(...))
    """
    Hp = _round_up(H, 128)
    in_f = w_ih.shape[1]

    def slab_wi(w):  # (H, in_f) -> (in_pad, Hp)
        return jnp.pad(w.T, ((0, in_pad - in_f), (0, Hp - H)))

    def slab_wh(w):  # (H, H) -> (Hp, Hp)
        return jnp.pad(w.T, ((0, Hp - H), (0, Hp - H)))

    def slab_b(b):   # (H,) -> (Hp,)
        return jnp.pad(b, (0, Hp - H))

    wi = jnp.concatenate([slab_wi(w_ih[0:H]), slab_wi(w_ih[H:2 * H]),
                          slab_wi(w_ih[2 * H:3 * H])], axis=1).astype(jnp.bfloat16)
    wh = jnp.concatenate([slab_wh(w_hh[0:H]), slab_wh(w_hh[H:2 * H]),
                          slab_wh(w_hh[2 * H:3 * H])], axis=1).astype(jnp.bfloat16)
    bi = jnp.concatenate([slab_b(b_ih[0:H] + b_hh[0:H]),
                          slab_b(b_ih[H:2 * H] + b_hh[H:2 * H]),
                          slab_b(b_ih[2 * H:3 * H])]).reshape(1, 3 * Hp)
    bh = jnp.concatenate([jnp.zeros((2 * Hp,), jnp.float32),
                          slab_b(b_hh[2 * H:3 * H])]).reshape(1, 3 * Hp)
    return wi, wh, bi.astype(jnp.float32), bh.astype(jnp.float32)


# ----------------------------- Model forward ----------------------------------
@functools.partial(jax.jit, static_argnames=("hidden_n",))
def model_gru_forward(x, params, hidden_n):
    """x: (B, T, input_size) batch_first, like the PyTorch module."""
    B, T, F = x.shape
    H = hidden_n
    Hp = _round_up(H, 128)
    Gp = 3 * Hp
    B_pad = _round_up(max(B, 8), 8)          # full f32 sublane groups
    n_layers = len(params["gru"])

    # Time-major, batch zero-padded to B_pad, flattened, bf16 for the MXU.
    xt = jnp.transpose(x, (1, 0, 2)).astype(jnp.float32)          # (T, B, F)
    xt = jnp.pad(xt, ((0, 0), (0, B_pad - B), (0, 0)))            # (T, B_pad, F)
    x_flat = xt.reshape(T * B_pad, F).astype(jnp.bfloat16)

    layer_args = []
    for li, (w_ih, w_hh, b_ih, b_hh) in enumerate(params["gru"]):
        in_pad = F if li == 0 else Hp
        layer_args.extend(pack_gru_layer(w_ih, w_hh, b_ih, b_hh, H, in_pad))

    w_fc, b_fc = params["fc"]
    C = w_fc.shape[0]
    Cp = _round_up(C, 128)                   # lane-dense output slab
    wfc_t = jnp.pad(w_fc.T.astype(jnp.float32), ((0, Hp - H), (0, Cp - C)))
    bfc = jnp.pad(b_fc.astype(jnp.float32), (0, Cp - C)).reshape(1, Cp)

    n_in = 1 + 4 * n_layers + 2
    vmem = pl.BlockSpec(memory_space=pltpu.MemorySpace.VMEM)
    out = pl.pallas_call(
        make_fused_gru_kernel(n_layers, T, B_pad, Hp),
        out_shape=jax.ShapeDtypeStruct((B_pad, Cp), jnp.float32),
        in_specs=[vmem] * n_in,
        out_specs=vmem,
        scratch_shapes=[pltpu.VMEM((T * B_pad, Gp), jnp.float32),   # gate pre-acts
                        pltpu.VMEM((T * B_pad, Hp), jnp.float32)],  # inter-layer seq
        compiler_params=pltpu.CompilerParams(
            vmem_limit_bytes=32 * 1024 * 1024),
    )(x_flat, *layer_args, wfc_t, bfc)
    return out[:B, :C]


# ------------------------------ Param init -------------------------------------
def init_params(key, input_size, n_class, hidden_n, n_layers):
    """Deterministic parameter init mimicking PyTorch GRU/Linear shapes."""
    params = {"gru": [], "fc": None}
    k = 1.0 / jnp.sqrt(hidden_n)
    for layer in range(n_layers):
        in_f = input_size if layer == 0 else hidden_n
        key, k1, k2, k3, k4 = jax.random.split(key, 5)
        w_ih = jax.random.uniform(k1, (3 * hidden_n, in_f), jnp.float32, -k, k)
        w_hh = jax.random.uniform(k2, (3 * hidden_n, hidden_n), jnp.float32, -k, k)
        b_ih = jax.random.uniform(k3, (3 * hidden_n,), jnp.float32, -k, k)
        b_hh = jax.random.uniform(k4, (3 * hidden_n,), jnp.float32, -k, k)
        params["gru"].append((w_ih, w_hh, b_ih, b_hh))
    key, k1, k2 = jax.random.split(key, 3)
    w_fc = jax.random.uniform(k1, (n_class, hidden_n), jnp.float32, -k, k)
    b_fc = jax.random.uniform(k2, (n_class,), jnp.float32, -k, k)
    params["fc"] = (w_fc, b_fc)
    return params


# --------------------------- Pure-JAX references --------------------------------
def reference_forward(x, params, hidden_n, matmul_bf16=False):
    """PyTorch-GRU-semantics reference; optionally rounds matmul inputs to bf16
    (f32 accumulate) to mirror the kernel's MXU precision exactly."""
    H = hidden_n
    B, T, _ = x.shape
    cast = ((lambda v: v.astype(jnp.bfloat16).astype(jnp.float32))
            if matmul_bf16 else (lambda v: v))
    seq = x.astype(jnp.float32)
    for (w_ih, w_hh, b_ih, b_hh) in params["gru"]:
        h = jnp.zeros((B, H), jnp.float32)
        outs = []
        for t in range(T):
            xt = seq[:, t, :]
            gi = jnp.dot(cast(xt), cast(w_ih).T, precision="highest") + b_ih
            gh = jnp.dot(cast(h), cast(w_hh).T, precision="highest") + b_hh
            r = jax.nn.sigmoid(gi[:, :H] + gh[:, :H])
            z = jax.nn.sigmoid(gi[:, H:2 * H] + gh[:, H:2 * H])
            n = jnp.tanh(gi[:, 2 * H:] + r * gh[:, 2 * H:])
            h = (1.0 - z) * n + z * h
            outs.append(h)
        seq = jnp.stack(outs, axis=1)
    w_fc, b_fc = params["fc"]
    return jnp.dot(seq[:, -1, :], w_fc.T, precision="highest") + b_fc


if __name__ == "__main__":
    # Small, module-consistent shapes.
    batch, seq_len, input_size = 2, 8, 16
    hidden_n, n_layers, n_class = 32, 2, 4

    key = jax.random.PRNGKey(0)
    key, xkey = jax.random.split(key)
    x = jax.random.normal(xkey, (batch, seq_len, input_size), dtype=jnp.float32)
    params = init_params(key, input_size, n_class, hidden_n, n_layers)

    out = jax.block_until_ready(model_gru_forward(x, params, hidden_n=hidden_n))
    assert out.shape == (batch, n_class), out.shape

    # Tight check vs a bf16-matmul-matched reference (isolates kernel logic).
    ref_bf16 = jax.block_until_ready(
        reference_forward(x, params, hidden_n, matmul_bf16=True))
    assert jnp.allclose(out, ref_bf16, atol=2e-3, rtol=2e-3), (out, ref_bf16)

    # Loose check vs the full-f32 PyTorch-semantics reference (bf16 MXU inputs).
    ref_f32 = jax.block_until_ready(
        reference_forward(x, params, hidden_n, matmul_bf16=False))
    assert jnp.allclose(out, ref_f32, atol=5e-2, rtol=5e-2), (out, ref_f32)

    print("KERNEL_OK")
</pallas_src>

<mosaic_0001>
module attributes {stable_mosaic.version = 11 : i64} {
  func.func @kernel(%arg0: memref<64x16xbf16, #tpu.memory_space<vmem>>, %arg1: memref<16x384xbf16, #tpu.memory_space<vmem>>, %arg2: memref<128x384xbf16, #tpu.memory_space<vmem>>, %arg3: memref<1x384xf32, #tpu.memory_space<vmem>>, %arg4: memref<1x384xf32, #tpu.memory_space<vmem>>, %arg5: memref<128x384xbf16, #tpu.memory_space<vmem>>, %arg6: memref<128x384xbf16, #tpu.memory_space<vmem>>, %arg7: memref<1x384xf32, #tpu.memory_space<vmem>>, %arg8: memref<1x384xf32, #tpu.memory_space<vmem>>, %arg9: memref<128x128xf32, #tpu.memory_space<vmem>>, %arg10: memref<1x128xf32, #tpu.memory_space<vmem>>, %arg11: memref<8x128xf32, #tpu.memory_space<vmem>>, %arg12: memref<64x384xf32, #tpu.memory_space<vmem>>, %arg13: memref<64x128xf32, #tpu.memory_space<vmem>>) attributes {dimension_semantics = [], scalar_prefetch = 0 : i64, scratch_operands = 2 : i64, tpu.core_type = #tpu.core_type<tc>} {
    %c0 = arith.constant 0 : index
    %c0_0 = arith.constant 0 : index
    %0 = vector.load %arg0[%c0, %c0_0] : memref<64x16xbf16, #tpu.memory_space<vmem>>, vector<64x16xbf16>
    %c0_1 = arith.constant 0 : index
    %c0_2 = arith.constant 0 : index
    %1 = vector.load %arg1[%c0_1, %c0_2] : memref<16x384xbf16, #tpu.memory_space<vmem>>, vector<16x384xbf16>
    %cst = arith.constant dense<0.000000e+00> : vector<64x384xf32>
    %2 = tpu.matmul %0, %1, %cst {dimension_numbers = #tpu.dot_dimension_numbers<[1], [0], [0], [1], [0, 0, 1, 1], [], []>} : vector<64x16xbf16>, vector<16x384xbf16>, vector<64x384xf32> -> vector<64x384xf32>
    %c0_3 = arith.constant 0 : index
    %c0_4 = arith.constant 0 : index
    %3 = vector.load %arg3[%c0_3, %c0_4] : memref<1x384xf32, #tpu.memory_space<vmem>>, vector<1x384xf32>
    %4 = vector.broadcast %3 : vector<1x384xf32> to vector<64x384xf32>
    %5 = arith.addf %2, %4 : vector<64x384xf32>
    %c0_5 = arith.constant 0 : index
    %c0_6 = arith.constant 0 : index
    %6 = vector.load %arg12[%c0_5, %c0_6] : memref<64x384xf32, #tpu.memory_space<vmem>>, vector<64x384xf32>
    tpu.vector_store %arg12[%c0_5, %c0_6], %5 {strides = array<i32>} : memref<64x384xf32, #tpu.memory_space<vmem>>, vector<64x384xf32>,
    %c0_7 = arith.constant 0 : index
    %c0_8 = arith.constant 0 : index
    %7 = vector.load %arg4[%c0_7, %c0_8] : memref<1x384xf32, #tpu.memory_space<vmem>>, vector<1x384xf32>
    %8 = vector.shape_cast %7 : vector<1x384xf32> to vector<1x384xf32>
    %9 = vector.broadcast %8 : vector<1x384xf32> to vector<8x384xf32>
    %cst_9 = arith.constant 0.000000e+00 : f32
    %10 = vector.broadcast %cst_9 : f32 to vector<8x128xf32>
    %c0_10 = arith.constant 0 : index
    %c0_11 = arith.constant 0 : index
    %11 = vector.load %arg12[%c0_10, %c0_11] : memref<64x384xf32, #tpu.memory_space<vmem>>, vector<8x384xf32>
    %12 = arith.truncf %10 : vector<8x128xf32> to vector<8x128xbf16>
    %c0_12 = arith.constant 0 : index
    %c0_13 = arith.constant 0 : index
    %13 = vector.load %arg2[%c0_12, %c0_13] : memref<128x384xbf16, #tpu.memory_space<vmem>>, vector<128x384xbf16>
    %cst_14 = arith.constant dense<0.000000e+00> : vector<8x384xf32>
    %14 = tpu.matmul %12, %13, %cst_14 {dimension_numbers = #tpu.dot_dimension_numbers<[1], [0], [0], [1], [0, 0, 1, 1], [], []>} : vector<8x128xbf16>, vector<128x384xbf16>, vector<8x384xf32> -> vector<8x384xf32>
    %15 = arith.addf %14, %9 : vector<8x384xf32>
    %16 = vector.extract_strided_slice %11 {offsets = [0, 0], sizes = [8, 128], strides = [1, 1]} : vector<8x384xf32> to vector<8x128xf32>
    %17 = vector.extract_strided_slice %15 {offsets = [0, 0], sizes = [8, 128], strides = [1, 1]} : vector<8x384xf32> to vector<8x128xf32>
    %18 = arith.addf %16, %17 : vector<8x128xf32>
    %19 = arith.negf %18 : vector<8x128xf32>
    %20 = math.exp %19 : vector<8x128xf32>
    %cst_15 = arith.constant 1.000000e+00 : f32
    %21 = vector.broadcast %cst_15 : f32 to vector<8x128xf32>
    %22 = arith.addf %21, %20 : vector<8x128xf32>
    %23 = arith.divf %21, %22 : vector<8x128xf32>
    %24 = vector.extract_strided_slice %11 {offsets = [0, 128], sizes = [8, 128], strides = [1, 1]} : vector<8x384xf32> to vector<8x128xf32>
    %25 = vector.extract_strided_slice %15 {offsets = [0, 128], sizes = [8, 128], strides = [1, 1]} : vector<8x384xf32> to vector<8x128xf32>
    %26 = arith.addf %24, %25 : vector<8x128xf32>
    %27 = arith.negf %26 : vector<8x128xf32>
    %28 = math.exp %27 : vector<8x128xf32>
    %cst_16 = arith.constant 1.000000e+00 : f32
    %29 = vector.broadcast %cst_16 : f32 to vector<8x128xf32>
    %30 = arith.addf %29, %28 : vector<8x128xf32>
    %31 = arith.divf %29, %30 : vector<8x128xf32>
    %32 = vector.extract_strided_slice %11 {offsets = [0, 256], sizes = [8, 128], strides = [1, 1]} : vector<8x384xf32> to vector<8x128xf32>
    %33 = vector.extract_strided_slice %15 {offsets = [0, 256], sizes = [8, 128], strides = [1, 1]} : vector<8x384xf32> to vector<8x128xf32>
    %34 = arith.mulf %23, %33 : vector<8x128xf32>
    %35 = arith.addf %32, %34 : vector<8x128xf32>
    %36 = math.tanh %35 : vector<8x128xf32>
    %cst_17 = arith.constant 1.000000e+00 : f32
    %37 = vector.broadcast %cst_17 : f32 to vector<8x128xf32>
    %38 = arith.subf %37, %31 : vector<8x128xf32>
    %39 = arith.mulf %38, %36 : vector<8x128xf32>
    %40 = arith.mulf %31, %10 : vector<8x128xf32>
    %41 = arith.addf %39, %40 : vector<8x128xf32>
    %c0_18 = arith.constant 0 : index
    %c0_19 = arith.constant 0 : index
    %42 = vector.load %arg13[%c0_18, %c0_19] : memref<64x128xf32, #tpu.memory_space<vmem>>, vector<8x128xf32>
    tpu.vector_store %arg13[%c0_18, %c0_19], %41 {strides = array<i32>} : memref<64x128xf32, #tpu.memory_space<vmem>>, vector<8x128xf32>,
    %c8 = arith.constant 8 : index
    %c0_20 = arith.constant 0 : index
    %43 = vector.load %arg12[%c8, %c0_20] : memref<64x384xf32, #tpu.memory_space<vmem>>, vector<8x384xf32>
    %44 = arith.truncf %41 : vector<8x128xf32> to vector<8x128xbf16>
    %c0_21 = arith.constant 0 : index
    %c0_22 = arith.constant 0 : index
    %45 = vector.load %arg2[%c0_21, %c0_22] : memref<128x384xbf16, #tpu.memory_space<vmem>>, vector<128x384xbf16>
    %cst_23 = arith.constant dense<0.000000e+00> : vector<8x384xf32>
    %46 = tpu.matmul %44, %45, %cst_23 {dimension_numbers = #tpu.dot_dimension_numbers<[1], [0], [0], [1], [0, 0, 1, 1], [], []>} : vector<8x128xbf16>, vector<128x384xbf16>, vector<8x384xf32> -> vector<8x384xf32>
    %47 = arith.addf %46, %9 : vector<8x384xf32>
    %48 = vector.extract_strided_slice %43 {offsets = [0, 0], sizes = [8, 128], strides = [1, 1]} : vector<8x384xf32> to vector<8x128xf32>
    %49 = vector.extract_strided_slice %47 {offsets = [0, 0], sizes = [8, 128], strides = [1, 1]} : vector<8x384xf32> to vector<8x128xf32>
    %50 = arith.addf %48, %49 : vector<8x128xf32>
    %51 = arith.negf %50 : vector<8x128xf32>
    %52 = math.exp %51 : vector<8x128xf32>
    %cst_24 = arith.constant 1.000000e+00 : f32
    %53 = vector.broadcast %cst_24 : f32 to vector<8x128xf32>
    %54 = arith.addf %53, %52 : vector<8x128xf32>
    %55 = arith.divf %53, %54 : vector<8x128xf32>
    %56 = vector.extract_strided_slice %43 {offsets = [0, 128], sizes = [8, 128], strides = [1, 1]} : vector<8x384xf32> to vector<8x128xf32>
    %57 = vector.extract_strided_slice %47 {offsets = [0, 128], sizes = [8, 128], strides = [1, 1]} : vector<8x384xf32> to vector<8x128xf32>
    %58 = arith.addf %56, %57 : vector<8x128xf32>
    %59 = arith.negf %58 : vector<8x128xf32>
    %60 = math.exp %59 : vector<8x128xf32>
    %cst_25 = arith.constant 1.000000e+00 : f32
    %61 = vector.broadcast %cst_25 : f32 to vector<8x128xf32>
    %62 = arith.addf %61, %60 : vector<8x128xf32>
    %63 = arith.divf %61, %62 : vector<8x128xf32>
    %64 = vector.extract_strided_slice %43 {offsets = [0, 256], sizes = [8, 128], strides = [1, 1]} : vector<8x384xf32> to vector<8x128xf32>
    %65 = vector.extract_strided_slice %47 {offsets = [0, 256], sizes = [8, 128], strides = [1, 1]} : vector<8x384xf32> to vector<8x128xf32>
    %66 = arith.mulf %55, %65 : vector<8x128xf32>
    %67 = arith.addf %64, %66 : vector<8x128xf32>
    %68 = math.tanh %67 : vector<8x128xf32>
    %cst_26 = arith.constant 1.000000e+00 : f32
    %69 = vector.broadcast %cst_26 : f32 to vector<8x128xf32>
    %70 = arith.subf %69, %63 : vector<8x128xf32>
    %71 = arith.mulf %70, %68 : vector<8x128xf32>
    %72 = arith.mulf %63, %41 : vector<8x128xf32>
    %73 = arith.addf %71, %72 : vector<8x128xf32>
    %c8_27 = arith.constant 8 : index
    %c0_28 = arith.constant 0 : index
    %74 = vector.load %arg13[%c8_27, %c0_28] : memref<64x128xf32, #tpu.memory_space<vmem>>, vector<8x128xf32>
    tpu.vector_store %arg13[%c8_27, %c0_28], %73 {strides = array<i32>} : memref<64x128xf32, #tpu.memory_space<vmem>>, vector<8x128xf32>,
    %c16 = arith.constant 16 : index
    %c0_29 = arith.constant 0 : index
    %75 = vector.load %arg12[%c16, %c0_29] : memref<64x384xf32, #tpu.memory_space<vmem>>, vector<8x384xf32>
    %76 = arith.truncf %73 : vector<8x128xf32> to vector<8x128xbf16>
    %c0_30 = arith.constant 0 : index
    %c0_31 = arith.constant 0 : index
    %77 = vector.load %arg2[%c0_30, %c0_31] : memref<128x384xbf16, #tpu.memory_space<vmem>>, vector<128x384xbf16>
    %cst_32 = arith.constant dense<0.000000e+00> : vector<8x384xf32>
    %78 = tpu.matmul %76, %77, %cst_32 {dimension_numbers = #tpu.dot_dimension_numbers<[1], [0], [0], [1], [0, 0, 1, 1], [], []>} : vector<8x128xbf16>, vector<128x384xbf16>, vector<8x384xf32> -> vector<8x384xf32>
    %79 = arith.addf %78, %9 : vector<8x384xf32>
    %80 = vector.extract_strided_slice %75 {offsets = [0, 0], sizes = [8, 128], strides = [1, 1]} : vector<8x384xf32> to vector<8x128xf32>
    %81 = vector.extract_strided_slice %79 {offsets = [0, 0], sizes = [8, 128], strides = [1, 1]} : vector<8x384xf32> to vector<8x128xf32>
    %82 = arith.addf %80, %81 : vector<8x128xf32>
    %83 = arith.negf %82 : vector<8x128xf32>
    %84 = math.exp %83 : vector<8x128xf32>
    %cst_33 = arith.constant 1.000000e+00 : f32
    %85 = vector.broadcast %cst_33 : f32 to vector<8x128xf32>
    %86 = arith.addf %85, %84 : vector<8x128xf32>
    %87 = arith.divf %85, %86 : vector<8x128xf32>
    %88 = vector.extract_strided_slice %75 {offsets = [0, 128], sizes = [8, 128], strides = [1, 1]} : vector<8x384xf32> to vector<8x128xf32>
    %89 = vector.extract_strided_slice %79 {offsets = [0, 128], sizes = [8, 128], strides = [1, 1]} : vector<8x384xf32> to vector<8x128xf32>
    %90 = arith.addf %88, %89 : vector<8x128xf32>
    %91 = arith.negf %90 : vector<8x128xf32>
    %92 = math.exp %91 : vector<8x128xf32>
    %cst_34 = arith.constant 1.000000e+00 : f32
    %93 = vector.broadcast %cst_34 : f32 to vector<8x128xf32>
    %94 = arith.addf %93, %92 : vector<8x128xf32>
    %95 = arith.divf %93, %94 : vector<8x128xf32>
    %96 = vector.extract_strided_slice %75 {offsets = [0, 256], sizes = [8, 128], strides = [1, 1]} : vector<8x384xf32> to vector<8x128xf32>
    %97 = vector.extract_strided_slice %79 {offsets = [0, 256], sizes = [8, 128], strides = [1, 1]} : vector<8x384xf32> to vector<8x128xf32>
    %98 = arith.mulf %87, %97 : vector<8x128xf32>
    %99 = arith.addf %96, %98 : vector<8x128xf32>
    %100 = math.tanh %99 : vector<8x128xf32>
    %cst_35 = arith.constant 1.000000e+00 : f32
    %101 = vector.broadcast %cst_35 : f32 to vector<8x128xf32>
    %102 = arith.subf %101, %95 : vector<8x128xf32>
    %103 = arith.mulf %102, %100 : vector<8x128xf32>
    %104 = arith.mulf %95, %73 : vector<8x128xf32>
    %105 = arith.addf %103, %104 : vector<8x128xf32>
    %c16_36 = arith.constant 16 : index
    %c0_37 = arith.constant 0 : index
    %106 = vector.load %arg13[%c16_36, %c0_37] : memref<64x128xf32, #tpu.memory_space<vmem>>, vector<8x128xf32>
    tpu.vector_store %arg13[%c16_36, %c0_37], %105 {strides = array<i32>} : memref<64x128xf32, #tpu.memory_space<vmem>>, vector<8x128xf32>,
    %c24 = arith.constant 24 : index
    %c0_38 = arith.constant 0 : index
    %107 = vector.load %arg12[%c24, %c0_38] : memref<64x384xf32, #tpu.memory_space<vmem>>, vector<8x384xf32>
    %108 = arith.truncf %105 : vector<8x128xf32> to vector<8x128xbf16>
    %c0_39 = arith.constant 0 : index
    %c0_40 = arith.constant 0 : index
    %109 = vector.load %arg2[%c0_39, %c0_40] : memref<128x384xbf16, #tpu.memory_space<vmem>>, vector<128x384xbf16>
    %cst_41 = arith.constant dense<0.000000e+00> : vector<8x384xf32>
    %110 = tpu.matmul %108, %109, %cst_41 {dimension_numbers = #tpu.dot_dimension_numbers<[1], [0], [0], [1], [0, 0, 1, 1], [], []>} : vector<8x128xbf16>, vector<128x384xbf16>, vector<8x384xf32> -> vector<8x384xf32>
    %111 = arith.addf %110, %9 : vector<8x384xf32>
    %112 = vector.extract_strided_slice %107 {offsets = [0, 0], sizes = [8, 128], strides = [1, 1]} : vector<8x384xf32> to vector<8x128xf32>
    %113 = vector.extract_strided_slice %111 {offsets = [0, 0], sizes = [8, 128], strides = [1, 1]} : vector<8x384xf32> to vector<8x128xf32>
    %114 = arith.addf %112, %113 : vector<8x128xf32>
    %115 = arith.negf %114 : vector<8x128xf32>
    %116 = math.exp %115 : vector<8x128xf32>
    %cst_42 = arith.constant 1.000000e+00 : f32
    %117 = vector.broadcast %cst_42 : f32 to vector<8x128xf32>
    %118 = arith.addf %117, %116 : vector<8x128xf32>
    %119 = arith.divf %117, %118 : vector<8x128xf32>
    %120 = vector.extract_strided_slice %107 {offsets = [0, 128], sizes = [8, 128], strides = [1, 1]} : vector<8x384xf32> to vector<8x128xf32>
    %121 = vector.extract_strided_slice %111 {offsets = [0, 128], sizes = [8, 128], strides = [1, 1]} : vector<8x384xf32> to vector<8x128xf32>
    %122 = arith.addf %120, %121 : vector<8x128xf32>
    %123 = arith.negf %122 : vector<8x128xf32>
    %124 = math.exp %123 : vector<8x128xf32>
    %cst_43 = arith.constant 1.000000e+00 : f32
    %125 = vector.broadcast %cst_43 : f32 to vector<8x128xf32>
    %126 = arith.addf %125, %124 : vector<8x128xf32>
    %127 = arith.divf %125, %126 : vector<8x128xf32>
    %128 = vector.extract_strided_slice %107 {offsets = [0, 256], sizes = [8, 128], strides = [1, 1]} : vector<8x384xf32> to vector<8x128xf32>
    %129 = vector.extract_strided_slice %111 {offsets = [0, 256], sizes = [8, 128], strides = [1, 1]} : vector<8x384xf32> to vector<8x128xf32>
    %130 = arith.mulf %119, %129 : vector<8x128xf32>
    %131 = arith.addf %128, %130 : vector<8x128xf32>
    %132 = math.tanh %131 : vector<8x128xf32>
    %cst_44 = arith.constant 1.000000e+00 : f32
    %133 = vector.broadcast %cst_44 : f32 to vector<8x128xf32>
    %134 = arith.subf %133, %127 : vector<8x128xf32>
    %135 = arith.mulf %134, %132 : vector<8x128xf32>
    %136 = arith.mulf %127, %105 : vector<8x128xf32>
    %137 = arith.addf %135, %136 : vector<8x128xf32>
    %c24_45 = arith.constant 24 : index
    %c0_46 = arith.constant 0 : index
    %138 = vector.load %arg13[%c24_45, %c0_46] : memref<64x128xf32, #tpu.memory_space<vmem>>, vector<8x128xf32>
    tpu.vector_store %arg13[%c24_45, %c0_46], %137 {strides = array<i32>} : memref<64x128xf32, #tpu.memory_space<vmem>>, vector<8x128xf32>,
    %c32 = arith.constant 32 : index
    %c0_47 = arith.constant 0 : index
    %139 = vector.load %arg12[%c32, %c0_47] : memref<64x384xf32, #tpu.memory_space<vmem>>, vector<8x384xf32>
    %140 = arith.truncf %137 : vector<8x128xf32> to vector<8x128xbf16>
    %c0_48 = arith.constant 0 : index
    %c0_49 = arith.constant 0 : index
    %141 = vector.load %arg2[%c0_48, %c0_49] : memref<128x384xbf16, #tpu.memory_space<vmem>>, vector<128x384xbf16>
    %cst_50 = arith.constant dense<0.000000e+00> : vector<8x384xf32>
    %142 = tpu.matmul %140, %141, %cst_50 {dimension_numbers = #tpu.dot_dimension_numbers<[1], [0], [0], [1], [0, 0, 1, 1], [], []>} : vector<8x128xbf16>, vector<128x384xbf16>, vector<8x384xf32> -> vector<8x384xf32>
    %143 = arith.addf %142, %9 : vector<8x384xf32>
    %144 = vector.extract_strided_slice %139 {offsets = [0, 0], sizes = [8, 128], strides = [1, 1]} : vector<8x384xf32> to vector<8x128xf32>
    %145 = vector.extract_strided_slice %143 {offsets = [0, 0], sizes = [8, 128], strides = [1, 1]} : vector<8x384xf32> to vector<8x128xf32>
    %146 = arith.addf %144, %145 : vector<8x128xf32>
    %147 = arith.negf %146 : vector<8x128xf32>
    %148 = math.exp %147 : vector<8x128xf32>
    %cst_51 = arith.constant 1.000000e+00 : f32
    %149 = vector.broadcast %cst_51 : f32 to vector<8x128xf32>
    %150 = arith.addf %149, %148 : vector<8x128xf32>
    %151 = arith.divf %149, %150 : vector<8x128xf32>
    %152 = vector.extract_strided_slice %139 {offsets = [0, 128], sizes = [8, 128], strides = [1, 1]} : vector<8x384xf32> to vector<8x128xf32>
    %153 = vector.extract_strided_slice %143 {offsets = [0, 128], sizes = [8, 128], strides = [1, 1]} : vector<8x384xf32> to vector<8x128xf32>
    %154 = arith.addf %152, %153 : vector<8x128xf32>
    %155 = arith.negf %154 : vector<8x128xf32>
    %156 = math.exp %155 : vector<8x128xf32>
    %cst_52 = arith.constant 1.000000e+00 : f32
    %157 = vector.broadcast %cst_52 : f32 to vector<8x128xf32>
    %158 = arith.addf %157, %156 : vector<8x128xf32>
    %159 = arith.divf %157, %158 : vector<8x128xf32>
    %160 = vector.extract_strided_slice %139 {offsets = [0, 256], sizes = [8, 128], strides = [1, 1]} : vector<8x384xf32> to vector<8x128xf32>
    %161 = vector.extract_strided_slice %143 {offsets = [0, 256], sizes = [8, 128], strides = [1, 1]} : vector<8x384xf32> to vector<8x128xf32>
    %162 = arith.mulf %151, %161 : vector<8x128xf32>
    %163 = arith.addf %160, %162 : vector<8x128xf32>
    %164 = math.tanh %163 : vector<8x128xf32>
    %cst_53 = arith.constant 1.000000e+00 : f32
    %165 = vector.broadcast %cst_53 : f32 to vector<8x128xf32>
    %166 = arith.subf %165, %159 : vector<8x128xf32>
    %167 = arith.mulf %166, %164 : vector<8x128xf32>
    %168 = arith.mulf %159, %137 : vector<8x128xf32>
    %169 = arith.addf %167, %168 : vector<8x128xf32>
    %c32_54 = arith.constant 32 : index
    %c0_55 = arith.constant 0 : index
    %170 = vector.load %arg13[%c32_54, %c0_55] : memref<64x128xf32, #tpu.memory_space<vmem>>, vector<8x128xf32>
    tpu.vector_store %arg13[%c32_54, %c0_55], %169 {strides = array<i32>} : memref<64x128xf32, #tpu.memory_space<vmem>>, vector<8x128xf32>,
    %c40 = arith.constant 40 : index
    %c0_56 = arith.constant 0 : index
    %171 = vector.load %arg12[%c40, %c0_56] : memref<64x384xf32, #tpu.memory_space<vmem>>, vector<8x384xf32>
    %172 = arith.truncf %169 : vector<8x128xf32> to vector<8x128xbf16>
    %c0_57 = arith.constant 0 : index
    %c0_58 = arith.constant 0 : index
    %173 = vector.load %arg2[%c0_57, %c0_58] : memref<128x384xbf16, #tpu.memory_space<vmem>>, vector<128x384xbf16>
    %cst_59 = arith.constant dense<0.000000e+00> : vector<8x384xf32>
    %174 = tpu.matmul %172, %173, %cst_59 {dimension_numbers = #tpu.dot_dimension_numbers<[1], [0], [0], [1], [0, 0, 1, 1], [], []>} : vector<8x128xbf16>, vector<128x384xbf16>, vector<8x384xf32> -> vector<8x384xf32>
    %175 = arith.addf %174, %9 : vector<8x384xf32>
    %176 = vector.extract_strided_slice %171 {offsets = [0, 0], sizes = [8, 128], strides = [1, 1]} : vector<8x384xf32> to vector<8x128xf32>
    %177 = vector.extract_strided_slice %175 {offsets = [0, 0], sizes = [8, 128], strides = [1, 1]} : vector<8x384xf32> to vector<8x128xf32>
    %178 = arith.addf %176, %177 : vector<8x128xf32>
    %179 = arith.negf %178 : vector<8x128xf32>
    %180 = math.exp %179 : vector<8x128xf32>
    %cst_60 = arith.constant 1.000000e+00 : f32
    %181 = vector.broadcast %cst_60 : f32 to vector<8x128xf32>
    %182 = arith.addf %181, %180 : vector<8x128xf32>
    %183 = arith.divf %181, %182 : vector<8x128xf32>
    %184 = vector.extract_strided_slice %171 {offsets = [0, 128], sizes = [8, 128], strides = [1, 1]} : vector<8x384xf32> to vector<8x128xf32>
    %185 = vector.extract_strided_slice %175 {offsets = [0, 128], sizes = [8, 128], strides = [1, 1]} : vector<8x384xf32> to vector<8x128xf32>
    %186 = arith.addf %184, %185 : vector<8x128xf32>
    %187 = arith.negf %186 : vector<8x128xf32>
    %188 = math.exp %187 : vector<8x128xf32>
    %cst_61 = arith.constant 1.000000e+00 : f32
    %189 = vector.broadcast %cst_61 : f32 to vector<8x128xf32>
    %190 = arith.addf %189, %188 : vector<8x128xf32>
    %191 = arith.divf %189, %190 : vector<8x128xf32>
    %192 = vector.extract_strided_slice %171 {offsets = [0, 256], sizes = [8, 128], strides = [1, 1]} : vector<8x384xf32> to vector<8x128xf32>
    %193 = vector.extract_strided_slice %175 {offsets = [0, 256], sizes = [8, 128], strides = [1, 1]} : vector<8x384xf32> to vector<8x128xf32>
    %194 = arith.mulf %183, %193 : vector<8x128xf32>
    %195 = arith.addf %192, %194 : vector<8x128xf32>
    %196 = math.tanh %195 : vector<8x128xf32>
    %cst_62 = arith.constant 1.000000e+00 : f32
    %197 = vector.broadcast %cst_62 : f32 to vector<8x128xf32>
    %198 = arith.subf %197, %191 : vector<8x128xf32>
    %199 = arith.mulf %198, %196 : vector<8x128xf32>
    %200 = arith.mulf %191, %169 : vector<8x128xf32>
    %201 = arith.addf %199, %200 : vector<8x128xf32>
    %c40_63 = arith.constant 40 : index
    %c0_64 = arith.constant 0 : index
    %202 = vector.load %arg13[%c40_63, %c0_64] : memref<64x128xf32, #tpu.memory_space<vmem>>, vector<8x128xf32>
    tpu.vector_store %arg13[%c40_63, %c0_64], %201 {strides = array<i32>} : memref<64x128xf32, #tpu.memory_space<vmem>>, vector<8x128xf32>,
    %c48 = arith.constant 48 : index
    %c0_65 = arith.constant 0 : index
    %203 = vector.load %arg12[%c48, %c0_65] : memref<64x384xf32, #tpu.memory_space<vmem>>, vector<8x384xf32>
    %204 = arith.truncf %201 : vector<8x128xf32> to vector<8x128xbf16>
    %c0_66 = arith.constant 0 : index
    %c0_67 = arith.constant 0 : index
    %205 = vector.load %arg2[%c0_66, %c0_67] : memref<128x384xbf16, #tpu.memory_space<vmem>>, vector<128x384xbf16>
    %cst_68 = arith.constant dense<0.000000e+00> : vector<8x384xf32>
    %206 = tpu.matmul %204, %205, %cst_68 {dimension_numbers = #tpu.dot_dimension_numbers<[1], [0], [0], [1], [0, 0, 1, 1], [], []>} : vector<8x128xbf16>, vector<128x384xbf16>, vector<8x384xf32> -> vector<8x384xf32>
    %207 = arith.addf %206, %9 : vector<8x384xf32>
    %208 = vector.extract_strided_slice %203 {offsets = [0, 0], sizes = [8, 128], strides = [1, 1]} : vector<8x384xf32> to vector<8x128xf32>
    %209 = vector.extract_strided_slice %207 {offsets = [0, 0], sizes = [8, 128], strides = [1, 1]} : vector<8x384xf32> to vector<8x128xf32>
    %210 = arith.addf %208, %209 : vector<8x128xf32>
    %211 = arith.negf %210 : vector<8x128xf32>
    %212 = math.exp %211 : vector<8x128xf32>
    %cst_69 = arith.constant 1.000000e+00 : f32
    %213 = vector.broadcast %cst_69 : f32 to vector<8x128xf32>
    %214 = arith.addf %213, %212 : vector<8x128xf32>
    %215 = arith.divf %213, %214 : vector<8x128xf32>
    %216 = vector.extract_strided_slice %203 {offsets = [0, 128], sizes = [8, 128], strides = [1, 1]} : vector<8x384xf32> to vector<8x128xf32>
    %217 = vector.extract_strided_slice %207 {offsets = [0, 128], sizes = [8, 128], strides = [1, 1]} : vector<8x384xf32> to vector<8x128xf32>
    %218 = arith.addf %216, %217 : vector<8x128xf32>
    %219 = arith.negf %218 : vector<8x128xf32>
    %220 = math.exp %219 : vector<8x128xf32>
    %cst_70 = arith.constant 1.000000e+00 : f32
    %221 = vector.broadcast %cst_70 : f32 to vector<8x128xf32>
    %222 = arith.addf %221, %220 : vector<8x128xf32>
    %223 = arith.divf %221, %222 : vector<8x128xf32>
    %224 = vector.extract_strided_slice %203 {offsets = [0, 256], sizes = [8, 128], strides = [1, 1]} : vector<8x384xf32> to vector<8x128xf32>
    %225 = vector.extract_strided_slice %207 {offsets = [0, 256], sizes = [8, 128], strides = [1, 1]} : vector<8x384xf32> to vector<8x128xf32>
    %226 = arith.mulf %215, %225 : vector<8x128xf32>
    %227 = arith.addf %224, %226 : vector<8x128xf32>
    %228 = math.tanh %227 : vector<8x128xf32>
    %cst_71 = arith.constant 1.000000e+00 : f32
    %229 = vector.broadcast %cst_71 : f32 to vector<8x128xf32>
    %230 = arith.subf %229, %223 : vector<8x128xf32>
    %231 = arith.mulf %230, %228 : vector<8x128xf32>
    %232 = arith.mulf %223, %201 : vector<8x128xf32>
    %233 = arith.addf %231, %232 : vector<8x128xf32>
    %c48_72 = arith.constant 48 : index
    %c0_73 = arith.constant 0 : index
    %234 = vector.load %arg13[%c48_72, %c0_73] : memref<64x128xf32, #tpu.memory_space<vmem>>, vector<8x128xf32>
    tpu.vector_store %arg13[%c48_72, %c0_73], %233 {strides = array<i32>} : memref<64x128xf32, #tpu.memory_space<vmem>>, vector<8x128xf32>,
    %c56 = arith.constant 56 : index
    %c0_74 = arith.constant 0 : index
    %235 = vector.load %arg12[%c56, %c0_74] : memref<64x384xf32, #tpu.memory_space<vmem>>, vector<8x384xf32>
    %236 = arith.truncf %233 : vector<8x128xf32> to vector<8x128xbf16>
    %c0_75 = arith.constant 0 : index
    %c0_76 = arith.constant 0 : index
    %237 = vector.load %arg2[%c0_75, %c0_76] : memref<128x384xbf16, #tpu.memory_space<vmem>>, vector<128x384xbf16>
    %cst_77 = arith.constant dense<0.000000e+00> : vector<8x384xf32>
    %238 = tpu.matmul %236, %237, %cst_77 {dimension_numbers = #tpu.dot_dimension_numbers<[1], [0], [0], [1], [0, 0, 1, 1], [], []>} : vector<8x128xbf16>, vector<128x384xbf16>, vector<8x384xf32> -> vector<8x384xf32>
    %239 = arith.addf %238, %9 : vector<8x384xf32>
    %240 = vector.extract_strided_slice %235 {offsets = [0, 0], sizes = [8, 128], strides = [1, 1]} : vector<8x384xf32> to vector<8x128xf32>
    %241 = vector.extract_strided_slice %239 {offsets = [0, 0], sizes = [8, 128], strides = [1, 1]} : vector<8x384xf32> to vector<8x128xf32>
    %242 = arith.addf %240, %241 : vector<8x128xf32>
    %243 = arith.negf %242 : vector<8x128xf32>
    %244 = math.exp %243 : vector<8x128xf32>
    %cst_78 = arith.constant 1.000000e+00 : f32
    %245 = vector.broadcast %cst_78 : f32 to vector<8x128xf32>
    %246 = arith.addf %245, %244 : vector<8x128xf32>
    %247 = arith.divf %245, %246 : vector<8x128xf32>
    %248 = vector.extract_strided_slice %235 {offsets = [0, 128], sizes = [8, 128], strides = [1, 1]} : vector<8x384xf32> to vector<8x128xf32>
    %249 = vector.extract_strided_slice %239 {offsets = [0, 128], sizes = [8, 128], strides = [1, 1]} : vector<8x384xf32> to vector<8x128xf32>
    %250 = arith.addf %248, %249 : vector<8x128xf32>
    %251 = arith.negf %250 : vector<8x128xf32>
    %252 = math.exp %251 : vector<8x128xf32>
    %cst_79 = arith.constant 1.000000e+00 : f32
    %253 = vector.broadcast %cst_79 : f32 to vector<8x128xf32>
    %254 = arith.addf %253, %252 : vector<8x128xf32>
    %255 = arith.divf %253, %254 : vector<8x128xf32>
    %256 = vector.extract_strided_slice %235 {offsets = [0, 256], sizes = [8, 128], strides = [1, 1]} : vector<8x384xf32> to vector<8x128xf32>
    %257 = vector.extract_strided_slice %239 {offsets = [0, 256], sizes = [8, 128], strides = [1, 1]} : vector<8x384xf32> to vector<8x128xf32>
    %258 = arith.mulf %247, %257 : vector<8x128xf32>
    %259 = arith.addf %256, %258 : vector<8x128xf32>
    %260 = math.tanh %259 : vector<8x128xf32>
    %cst_80 = arith.constant 1.000000e+00 : f32
    %261 = vector.broadcast %cst_80 : f32 to vector<8x128xf32>
    %262 = arith.subf %261, %255 : vector<8x128xf32>
    %263 = arith.mulf %262, %260 : vector<8x128xf32>
    %264 = arith.mulf %255, %233 : vector<8x128xf32>
    %265 = arith.addf %263, %264 : vector<8x128xf32>
    %c56_81 = arith.constant 56 : index
    %c0_82 = arith.constant 0 : index
    %266 = vector.load %arg13[%c56_81, %c0_82] : memref<64x128xf32, #tpu.memory_space<vmem>>, vector<8x128xf32>
    tpu.vector_store %arg13[%c56_81, %c0_82], %265 {strides = array<i32>} : memref<64x128xf32, #tpu.memory_space<vmem>>, vector<8x128xf32>,
    %c0_83 = arith.constant 0 : index
    %c0_84 = arith.constant 0 : index
    %267 = vector.load %arg13[%c0_83, %c0_84] : memref<64x128xf32, #tpu.memory_space<vmem>>, vector<64x128xf32>
    %268 = arith.truncf %267 : vector<64x128xf32> to vector<64x128xbf16>
    %c0_85 = arith.constant 0 : index
    %c0_86 = arith.constant 0 : index
    %269 = vector.load %arg5[%c0_85, %c0_86] : memref<128x384xbf16, #tpu.memory_space<vmem>>, vector<128x384xbf16>
    %cst_87 = arith.constant dense<0.000000e+00> : vector<64x384xf32>
    %270 = tpu.matmul %268, %269, %cst_87 {dimension_numbers = #tpu.dot_dimension_numbers<[1], [0], [0], [1], [0, 0, 1, 1], [], []>} : vector<64x128xbf16>, vector<128x384xbf16>, vector<64x384xf32> -> vector<64x384xf32>
    %c0_88 = arith.constant 0 : index
    %c0_89 = arith.constant 0 : index
    %271 = vector.load %arg7[%c0_88, %c0_89] : memref<1x384xf32, #tpu.memory_space<vmem>>, vector<1x384xf32>
    %272 = vector.broadcast %271 : vector<1x384xf32> to vector<64x384xf32>
    %273 = arith.addf %270, %272 : vector<64x384xf32>
    %c0_90 = arith.constant 0 : index
    %c0_91 = arith.constant 0 : index
    %274 = vector.load %arg12[%c0_90, %c0_91] : memref<64x384xf32, #tpu.memory_space<vmem>>, vector<64x384xf32>
    tpu.vector_store %arg12[%c0_90, %c0_91], %273 {strides = array<i32>} : memref<64x384xf32, #tpu.memory_space<vmem>>, vector<64x384xf32>,
    %c0_92 = arith.constant 0 : index
    %c0_93 = arith.constant 0 : index
    %275 = vector.load %arg8[%c0_92, %c0_93] : memref<1x384xf32, #tpu.memory_space<vmem>>, vector<1x384xf32>
    %276 = vector.shape_cast %275 : vector<1x384xf32> to vector<1x384xf32>
    %277 = vector.broadcast %276 : vector<1x384xf32> to vector<8x384xf32>
    %cst_94 = arith.constant 0.000000e+00 : f32
    %278 = vector.broadcast %cst_94 : f32 to vector<8x128xf32>
    %c0_95 = arith.constant 0 : index
    %c0_96 = arith.constant 0 : index
    %279 = vector.load %arg12[%c0_95, %c0_96] : memref<64x384xf32, #tpu.memory_space<vmem>>, vector<8x384xf32>
    %280 = arith.truncf %278 : vector<8x128xf32> to vector<8x128xbf16>
    %c0_97 = arith.constant 0 : index
    %c0_98 = arith.constant 0 : index
    %281 = vector.load %arg6[%c0_97, %c0_98] : memref<128x384xbf16, #tpu.memory_space<vmem>>, vector<128x384xbf16>
    %cst_99 = arith.constant dense<0.000000e+00> : vector<8x384xf32>
    %282 = tpu.matmul %280, %281, %cst_99 {dimension_numbers = #tpu.dot_dimension_numbers<[1], [0], [0], [1], [0, 0, 1, 1], [], []>} : vector<8x128xbf16>, vector<128x384xbf16>, vector<8x384xf32> -> vector<8x384xf32>
    %283 = arith.addf %282, %277 : vector<8x384xf32>
    %284 = vector.extract_strided_slice %279 {offsets = [0, 0], sizes = [8, 128], strides = [1, 1]} : vector<8x384xf32> to vector<8x128xf32>
    %285 = vector.extract_strided_slice %283 {offsets = [0, 0], sizes = [8, 128], strides = [1, 1]} : vector<8x384xf32> to vector<8x128xf32>
    %286 = arith.addf %284, %285 : vector<8x128xf32>
    %287 = arith.negf %286 : vector<8x128xf32>
    %288 = math.exp %287 : vector<8x128xf32>
    %cst_100 = arith.constant 1.000000e+00 : f32
    %289 = vector.broadcast %cst_100 : f32 to vector<8x128xf32>
    %290 = arith.addf %289, %288 : vector<8x128xf32>
    %291 = arith.divf %289, %290 : vector<8x128xf32>
    %292 = vector.extract_strided_slice %279 {offsets = [0, 128], sizes = [8, 128], strides = [1, 1]} : vector<8x384xf32> to vector<8x128xf32>
    %293 = vector.extract_strided_slice %283 {offsets = [0, 128], sizes = [8, 128], strides = [1, 1]} : vector<8x384xf32> to vector<8x128xf32>
    %294 = arith.addf %292, %293 : vector<8x128xf32>
    %295 = arith.negf %294 : vector<8x128xf32>
    %296 = math.exp %295 : vector<8x128xf32>
    %cst_101 = arith.constant 1.000000e+00 : f32
    %297 = vector.broadcast %cst_101 : f32 to vector<8x128xf32>
    %298 = arith.addf %297, %296 : vector<8x128xf32>
    %299 = arith.divf %297, %298 : vector<8x128xf32>
    %300 = vector.extract_strided_slice %279 {offsets = [0, 256], sizes = [8, 128], strides = [1, 1]} : vector<8x384xf32> to vector<8x128xf32>
    %301 = vector.extract_strided_slice %283 {offsets = [0, 256], sizes = [8, 128], strides = [1, 1]} : vector<8x384xf32> to vector<8x128xf32>
    %302 = arith.mulf %291, %301 : vector<8x128xf32>
    %303 = arith.addf %300, %302 : vector<8x128xf32>
    %304 = math.tanh %303 : vector<8x128xf32>
    %cst_102 = arith.constant 1.000000e+00 : f32
    %305 = vector.broadcast %cst_102 : f32 to vector<8x128xf32>
    %306 = arith.subf %305, %299 : vector<8x128xf32>
    %307 = arith.mulf %306, %304 : vector<8x128xf32>
    %308 = arith.mulf %299, %278 : vector<8x128xf32>
    %309 = arith.addf %307, %308 : vector<8x128xf32>
    %c8_103 = arith.constant 8 : index
    %c0_104 = arith.constant 0 : index
    %310 = vector.load %arg12[%c8_103, %c0_104] : memref<64x384xf32, #tpu.memory_space<vmem>>, vector<8x384xf32>
    %311 = arith.truncf %309 : vector<8x128xf32> to vector<8x128xbf16>
    %c0_105 = arith.constant 0 : index
    %c0_106 = arith.constant 0 : index
    %312 = vector.load %arg6[%c0_105, %c0_106] : memref<128x384xbf16, #tpu.memory_space<vmem>>, vector<128x384xbf16>
    %cst_107 = arith.constant dense<0.000000e+00> : vector<8x384xf32>
    %313 = tpu.matmul %311, %312, %cst_107 {dimension_numbers = #tpu.dot_dimension_numbers<[1], [0], [0], [1], [0, 0, 1, 1], [], []>} : vector<8x128xbf16>, vector<128x384xbf16>, vector<8x384xf32> -> vector<8x384xf32>
    %314 = arith.addf %313, %277 : vector<8x384xf32>
    %315 = vector.extract_strided_slice %310 {offsets = [0, 0], sizes = [8, 128], strides = [1, 1]} : vector<8x384xf32> to vector<8x128xf32>
    %316 = vector.extract_strided_slice %314 {offsets = [0, 0], sizes = [8, 128], strides = [1, 1]} : vector<8x384xf32> to vector<8x128xf32>
    %317 = arith.addf %315, %316 : vector<8x128xf32>
    %318 = arith.negf %317 : vector<8x128xf32>
    %319 = math.exp %318 : vector<8x128xf32>
    %cst_108 = arith.constant 1.000000e+00 : f32
    %320 = vector.broadcast %cst_108 : f32 to vector<8x128xf32>
    %321 = arith.addf %320, %319 : vector<8x128xf32>
    %322 = arith.divf %320, %321 : vector<8x128xf32>
    %323 = vector.extract_strided_slice %310 {offsets = [0, 128], sizes = [8, 128], strides = [1, 1]} : vector<8x384xf32> to vector<8x128xf32>
    %324 = vector.extract_strided_slice %314 {offsets = [0, 128], sizes = [8, 128], strides = [1, 1]} : vector<8x384xf32> to vector<8x128xf32>
    %325 = arith.addf %323, %324 : vector<8x128xf32>
    %326 = arith.negf %325 : vector<8x128xf32>
    %327 = math.exp %326 : vector<8x128xf32>
    %cst_109 = arith.constant 1.000000e+00 : f32
    %328 = vector.broadcast %cst_109 : f32 to vector<8x128xf32>
    %329 = arith.addf %328, %327 : vector<8x128xf32>
    %330 = arith.divf %328, %329 : vector<8x128xf32>
    %331 = vector.extract_strided_slice %310 {offsets = [0, 256], sizes = [8, 128], strides = [1, 1]} : vector<8x384xf32> to vector<8x128xf32>
    %332 = vector.extract_strided_slice %314 {offsets = [0, 256], sizes = [8, 128], strides = [1, 1]} : vector<8x384xf32> to vector<8x128xf32>
    %333 = arith.mulf %322, %332 : vector<8x128xf32>
    %334 = arith.addf %331, %333 : vector<8x128xf32>
    %335 = math.tanh %334 : vector<8x128xf32>
    %cst_110 = arith.constant 1.000000e+00 : f32
    %336 = vector.broadcast %cst_110 : f32 to vector<8x128xf32>
    %337 = arith.subf %336, %330 : vector<8x128xf32>
    %338 = arith.mulf %337, %335 : vector<8x128xf32>
    %339 = arith.mulf %330, %309 : vector<8x128xf32>
    %340 = arith.addf %338, %339 : vector<8x128xf32>
    %c16_111 = arith.constant 16 : index
    %c0_112 = arith.constant 0 : index
    %341 = vector.load %arg12[%c16_111, %c0_112] : memref<64x384xf32, #tpu.memory_space<vmem>>, vector<8x384xf32>
    %342 = arith.truncf %340 : vector<8x128xf32> to vector<8x128xbf16>
    %c0_113 = arith.constant 0 : index
    %c0_114 = arith.constant 0 : index
    %343 = vector.load %arg6[%c0_113, %c0_114] : memref<128x384xbf16, #tpu.memory_space<vmem>>, vector<128x384xbf16>
    %cst_115 = arith.constant dense<0.000000e+00> : vector<8x384xf32>
    %344 = tpu.matmul %342, %343, %cst_115 {dimension_numbers = #tpu.dot_dimension_numbers<[1], [0], [0], [1], [0, 0, 1, 1], [], []>} : vector<8x128xbf16>, vector<128x384xbf16>, vector<8x384xf32> -> vector<8x384xf32>
    %345 = arith.addf %344, %277 : vector<8x384xf32>
    %346 = vector.extract_strided_slice %341 {offsets = [0, 0], sizes = [8, 128], strides = [1, 1]} : vector<8x384xf32> to vector<8x128xf32>
    %347 = vector.extract_strided_slice %345 {offsets = [0, 0], sizes = [8, 128], strides = [1, 1]} : vector<8x384xf32> to vector<8x128xf32>
    %348 = arith.addf %346, %347 : vector<8x128xf32>
    %349 = arith.negf %348 : vector<8x128xf32>
    %350 = math.exp %349 : vector<8x128xf32>
    %cst_116 = arith.constant 1.000000e+00 : f32
    %351 = vector.broadcast %cst_116 : f32 to vector<8x128xf32>
    %352 = arith.addf %351, %350 : vector<8x128xf32>
    %353 = arith.divf %351, %352 : vector<8x128xf32>
    %354 = vector.extract_strided_slice %341 {offsets = [0, 128], sizes = [8, 128], strides = [1, 1]} : vector<8x384xf32> to vector<8x128xf32>
    %355 = vector.extract_strided_slice %345 {offsets = [0, 128], sizes = [8, 128], strides = [1, 1]} : vector<8x384xf32> to vector<8x128xf32>
    %356 = arith.addf %354, %355 : vector<8x128xf32>
    %357 = arith.negf %356 : vector<8x128xf32>
    %358 = math.exp %357 : vector<8x128xf32>
    %cst_117 = arith.constant 1.000000e+00 : f32
    %359 = vector.broadcast %cst_117 : f32 to vector<8x128xf32>
    %360 = arith.addf %359, %358 : vector<8x128xf32>
    %361 = arith.divf %359, %360 : vector<8x128xf32>
    %362 = vector.extract_strided_slice %341 {offsets = [0, 256], sizes = [8, 128], strides = [1, 1]} : vector<8x384xf32> to vector<8x128xf32>
    %363 = vector.extract_strided_slice %345 {offsets = [0, 256], sizes = [8, 128], strides = [1, 1]} : vector<8x384xf32> to vector<8x128xf32>
    %364 = arith.mulf %353, %363 : vector<8x128xf32>
    %365 = arith.addf %362, %364 : vector<8x128xf32>
    %366 = math.tanh %365 : vector<8x128xf32>
    %cst_118 = arith.constant 1.000000e+00 : f32
    %367 = vector.broadcast %cst_118 : f32 to vector<8x128xf32>
    %368 = arith.subf %367, %361 : vector<8x128xf32>
    %369 = arith.mulf %368, %366 : vector<8x128xf32>
    %370 = arith.mulf %361, %340 : vector<8x128xf32>
    %371 = arith.addf %369, %370 : vector<8x128xf32>
    %c24_119 = arith.constant 24 : index
    %c0_120 = arith.constant 0 : index
    %372 = vector.load %arg12[%c24_119, %c0_120] : memref<64x384xf32, #tpu.memory_space<vmem>>, vector<8x384xf32>
    %373 = arith.truncf %371 : vector<8x128xf32> to vector<8x128xbf16>
    %c0_121 = arith.constant 0 : index
    %c0_122 = arith.constant 0 : index
    %374 = vector.load %arg6[%c0_121, %c0_122] : memref<128x384xbf16, #tpu.memory_space<vmem>>, vector<128x384xbf16>
    %cst_123 = arith.constant dense<0.000000e+00> : vector<8x384xf32>
    %375 = tpu.matmul %373, %374, %cst_123 {dimension_numbers = #tpu.dot_dimension_numbers<[1], [0], [0], [1], [0, 0, 1, 1], [], []>} : vector<8x128xbf16>, vector<128x384xbf16>, vector<8x384xf32> -> vector<8x384xf32>
    %376 = arith.addf %375, %277 : vector<8x384xf32>
    %377 = vector.extract_strided_slice %372 {offsets = [0, 0], sizes = [8, 128], strides = [1, 1]} : vector<8x384xf32> to vector<8x128xf32>
    %378 = vector.extract_strided_slice %376 {offsets = [0, 0], sizes = [8, 128], strides = [1, 1]} : vector<8x384xf32> to vector<8x128xf32>
    %379 = arith.addf %377, %378 : vector<8x128xf32>
    %380 = arith.negf %379 : vector<8x128xf32>
    %381 = math.exp %380 : vector<8x128xf32>
    %cst_124 = arith.constant 1.000000e+00 : f32
    %382 = vector.broadcast %cst_124 : f32 to vector<8x128xf32>
    %383 = arith.addf %382, %381 : vector<8x128xf32>
    %384 = arith.divf %382, %383 : vector<8x128xf32>
    %385 = vector.extract_strided_slice %372 {offsets = [0, 128], sizes = [8, 128], strides = [1, 1]} : vector<8x384xf32> to vector<8x128xf32>
    %386 = vector.extract_strided_slice %376 {offsets = [0, 128], sizes = [8, 128], strides = [1, 1]} : vector<8x384xf32> to vector<8x128xf32>
    %387 = arith.addf %385, %386 : vector<8x128xf32>
    %388 = arith.negf %387 : vector<8x128xf32>
    %389 = math.exp %388 : vector<8x128xf32>
    %cst_125 = arith.constant 1.000000e+00 : f32
    %390 = vector.broadcast %cst_125 : f32 to vector<8x128xf32>
    %391 = arith.addf %390, %389 : vector<8x128xf32>
    %392 = arith.divf %390, %391 : vector<8x128xf32>
    %393 = vector.extract_strided_slice %372 {offsets = [0, 256], sizes = [8, 128], strides = [1, 1]} : vector<8x384xf32> to vector<8x128xf32>
    %394 = vector.extract_strided_slice %376 {offsets = [0, 256], sizes = [8, 128], strides = [1, 1]} : vector<8x384xf32> to vector<8x128xf32>
    %395 = arith.mulf %384, %394 : vector<8x128xf32>
    %396 = arith.addf %393, %395 : vector<8x128xf32>
    %397 = math.tanh %396 : vector<8x128xf32>
    %cst_126 = arith.constant 1.000000e+00 : f32
    %398 = vector.broadcast %cst_126 : f32 to vector<8x128xf32>
    %399 = arith.subf %398, %392 : vector<8x128xf32>
    %400 = arith.mulf %399, %397 : vector<8x128xf32>
    %401 = arith.mulf %392, %371 : vector<8x128xf32>
    %402 = arith.addf %400, %401 : vector<8x128xf32>
    %c32_127 = arith.constant 32 : index
    %c0_128 = arith.constant 0 : index
    %403 = vector.load %arg12[%c32_127, %c0_128] : memref<64x384xf32, #tpu.memory_space<vmem>>, vector<8x384xf32>
    %404 = arith.truncf %402 : vector<8x128xf32> to vector<8x128xbf16>
    %c0_129 = arith.constant 0 : index
    %c0_130 = arith.constant 0 : index
    %405 = vector.load %arg6[%c0_129, %c0_130] : memref<128x384xbf16, #tpu.memory_space<vmem>>, vector<128x384xbf16>
    %cst_131 = arith.constant dense<0.000000e+00> : vector<8x384xf32>
    %406 = tpu.matmul %404, %405, %cst_131 {dimension_numbers = #tpu.dot_dimension_numbers<[1], [0], [0], [1], [0, 0, 1, 1], [], []>} : vector<8x128xbf16>, vector<128x384xbf16>, vector<8x384xf32> -> vector<8x384xf32>
    %407 = arith.addf %406, %277 : vector<8x384xf32>
    %408 = vector.extract_strided_slice %403 {offsets = [0, 0], sizes = [8, 128], strides = [1, 1]} : vector<8x384xf32> to vector<8x128xf32>
    %409 = vector.extract_strided_slice %407 {offsets = [0, 0], sizes = [8, 128], strides = [1, 1]} : vector<8x384xf32> to vector<8x128xf32>
    %410 = arith.addf %408, %409 : vector<8x128xf32>
    %411 = arith.negf %410 : vector<8x128xf32>
    %412 = math.exp %411 : vector<8x128xf32>
    %cst_132 = arith.constant 1.000000e+00 : f32
    %413 = vector.broadcast %cst_132 : f32 to vector<8x128xf32>
    %414 = arith.addf %413, %412 : vector<8x128xf32>
    %415 = arith.divf %413, %414 : vector<8x128xf32>
    %416 = vector.extract_strided_slice %403 {offsets = [0, 128], sizes = [8, 128], strides = [1, 1]} : vector<8x384xf32> to vector<8x128xf32>
    %417 = vector.extract_strided_slice %407 {offsets = [0, 128], sizes = [8, 128], strides = [1, 1]} : vector<8x384xf32> to vector<8x128xf32>
    %418 = arith.addf %416, %417 : vector<8x128xf32>
    %419 = arith.negf %418 : vector<8x128xf32>
    %420 = math.exp %419 : vector<8x128xf32>
    %cst_133 = arith.constant 1.000000e+00 : f32
    %421 = vector.broadcast %cst_133 : f32 to vector<8x128xf32>
    %422 = arith.addf %421, %420 : vector<8x128xf32>
    %423 = arith.divf %421, %422 : vector<8x128xf32>
    %424 = vector.extract_strided_slice %403 {offsets = [0, 256], sizes = [8, 128], strides = [1, 1]} : vector<8x384xf32> to vector<8x128xf32>
    %425 = vector.extract_strided_slice %407 {offsets = [0, 256], sizes = [8, 128], strides = [1, 1]} : vector<8x384xf32> to vector<8x128xf32>
    %426 = arith.mulf %415, %425 : vector<8x128xf32>
    %427 = arith.addf %424, %426 : vector<8x128xf32>
    %428 = math.tanh %427 : vector<8x128xf32>
    %cst_134 = arith.constant 1.000000e+00 : f32
    %429 = vector.broadcast %cst_134 : f32 to vector<8x128xf32>
    %430 = arith.subf %429, %423 : vector<8x128xf32>
    %431 = arith.mulf %430, %428 : vector<8x128xf32>
    %432 = arith.mulf %423, %402 : vector<8x128xf32>
    %433 = arith.addf %431, %432 : vector<8x128xf32>
    %c40_135 = arith.constant 40 : index
    %c0_136 = arith.constant 0 : index
    %434 = vector.load %arg12[%c40_135, %c0_136] : memref<64x384xf32, #tpu.memory_space<vmem>>, vector<8x384xf32>
    %435 = arith.truncf %433 : vector<8x128xf32> to vector<8x128xbf16>
    %c0_137 = arith.constant 0 : index
    %c0_138 = arith.constant 0 : index
    %436 = vector.load %arg6[%c0_137, %c0_138] : memref<128x384xbf16, #tpu.memory_space<vmem>>, vector<128x384xbf16>
    %cst_139 = arith.constant dense<0.000000e+00> : vector<8x384xf32>
    %437 = tpu.matmul %435, %436, %cst_139 {dimension_numbers = #tpu.dot_dimension_numbers<[1], [0], [0], [1], [0, 0, 1, 1], [], []>} : vector<8x128xbf16>, vector<128x384xbf16>, vector<8x384xf32> -> vector<8x384xf32>
    %438 = arith.addf %437, %277 : vector<8x384xf32>
    %439 = vector.extract_strided_slice %434 {offsets = [0, 0], sizes = [8, 128], strides = [1, 1]} : vector<8x384xf32> to vector<8x128xf32>
    %440 = vector.extract_strided_slice %438 {offsets = [0, 0], sizes = [8, 128], strides = [1, 1]} : vector<8x384xf32> to vector<8x128xf32>
    %441 = arith.addf %439, %440 : vector<8x128xf32>
    %442 = arith.negf %441 : vector<8x128xf32>
    %443 = math.exp %442 : vector<8x128xf32>
    %cst_140 = arith.constant 1.000000e+00 : f32
    %444 = vector.broadcast %cst_140 : f32 to vector<8x128xf32>
    %445 = arith.addf %444, %443 : vector<8x128xf32>
    %446 = arith.divf %444, %445 : vector<8x128xf32>
    %447 = vector.extract_strided_slice %434 {offsets = [0, 128], sizes = [8, 128], strides = [1, 1]} : vector<8x384xf32> to vector<8x128xf32>
    %448 = vector.extract_strided_slice %438 {offsets = [0, 128], sizes = [8, 128], strides = [1, 1]} : vector<8x384xf32> to vector<8x128xf32>
    %449 = arith.addf %447, %448 : vector<8x128xf32>
    %450 = arith.negf %449 : vector<8x128xf32>
    %451 = math.exp %450 : vector<8x128xf32>
    %cst_141 = arith.constant 1.000000e+00 : f32
    %452 = vector.broadcast %cst_141 : f32 to vector<8x128xf32>
    %453 = arith.addf %452, %451 : vector<8x128xf32>
    %454 = arith.divf %452, %453 : vector<8x128xf32>
    %455 = vector.extract_strided_slice %434 {offsets = [0, 256], sizes = [8, 128], strides = [1, 1]} : vector<8x384xf32> to vector<8x128xf32>
    %456 = vector.extract_strided_slice %438 {offsets = [0, 256], sizes = [8, 128], strides = [1, 1]} : vector<8x384xf32> to vector<8x128xf32>
    %457 = arith.mulf %446, %456 : vector<8x128xf32>
    %458 = arith.addf %455, %457 : vector<8x128xf32>
    %459 = math.tanh %458 : vector<8x128xf32>
    %cst_142 = arith.constant 1.000000e+00 : f32
    %460 = vector.broadcast %cst_142 : f32 to vector<8x128xf32>
    %461 = arith.subf %460, %454 : vector<8x128xf32>
    %462 = arith.mulf %461, %459 : vector<8x128xf32>
    %463 = arith.mulf %454, %433 : vector<8x128xf32>
    %464 = arith.addf %462, %463 : vector<8x128xf32>
    %c48_143 = arith.constant 48 : index
    %c0_144 = arith.constant 0 : index
    %465 = vector.load %arg12[%c48_143, %c0_144] : memref<64x384xf32, #tpu.memory_space<vmem>>, vector<8x384xf32>
    %466 = arith.truncf %464 : vector<8x128xf32> to vector<8x128xbf16>
    %c0_145 = arith.constant 0 : index
    %c0_146 = arith.constant 0 : index
    %467 = vector.load %arg6[%c0_145, %c0_146] : memref<128x384xbf16, #tpu.memory_space<vmem>>, vector<128x384xbf16>
    %cst_147 = arith.constant dense<0.000000e+00> : vector<8x384xf32>
    %468 = tpu.matmul %466, %467, %cst_147 {dimension_numbers = #tpu.dot_dimension_numbers<[1], [0], [0], [1], [0, 0, 1, 1], [], []>} : vector<8x128xbf16>, vector<128x384xbf16>, vector<8x384xf32> -> vector<8x384xf32>
    %469 = arith.addf %468, %277 : vector<8x384xf32>
    %470 = vector.extract_strided_slice %465 {offsets = [0, 0], sizes = [8, 128], strides = [1, 1]} : vector<8x384xf32> to vector<8x128xf32>
    %471 = vector.extract_strided_slice %469 {offsets = [0, 0], sizes = [8, 128], strides = [1, 1]} : vector<8x384xf32> to vector<8x128xf32>
    %472 = arith.addf %470, %471 : vector<8x128xf32>
    %473 = arith.negf %472 : vector<8x128xf32>
    %474 = math.exp %473 : vector<8x128xf32>
    %cst_148 = arith.constant 1.000000e+00 : f32
    %475 = vector.broadcast %cst_148 : f32 to vector<8x128xf32>
    %476 = arith.addf %475, %474 : vector<8x128xf32>
    %477 = arith.divf %475, %476 : vector<8x128xf32>
    %478 = vector.extract_strided_slice %465 {offsets = [0, 128], sizes = [8, 128], strides = [1, 1]} : vector<8x384xf32> to vector<8x128xf32>
    %479 = vector.extract_strided_slice %469 {offsets = [0, 128], sizes = [8, 128], strides = [1, 1]} : vector<8x384xf32> to vector<8x128xf32>
    %480 = arith.addf %478, %479 : vector<8x128xf32>
    %481 = arith.negf %480 : vector<8x128xf32>
    %482 = math.exp %481 : vector<8x128xf32>
    %cst_149 = arith.constant 1.000000e+00 : f32
    %483 = vector.broadcast %cst_149 : f32 to vector<8x128xf32>
    %484 = arith.addf %483, %482 : vector<8x128xf32>
    %485 = arith.divf %483, %484 : vector<8x128xf32>
    %486 = vector.extract_strided_slice %465 {offsets = [0, 256], sizes = [8, 128], strides = [1, 1]} : vector<8x384xf32> to vector<8x128xf32>
    %487 = vector.extract_strided_slice %469 {offsets = [0, 256], sizes = [8, 128], strides = [1, 1]} : vector<8x384xf32> to vector<8x128xf32>
    %488 = arith.mulf %477, %487 : vector<8x128xf32>
    %489 = arith.addf %486, %488 : vector<8x128xf32>
    %490 = math.tanh %489 : vector<8x128xf32>
    %cst_150 = arith.constant 1.000000e+00 : f32
    %491 = vector.broadcast %cst_150 : f32 to vector<8x128xf32>
    %492 = arith.subf %491, %485 : vector<8x128xf32>
    %493 = arith.mulf %492, %490 : vector<8x128xf32>
    %494 = arith.mulf %485, %464 : vector<8x128xf32>
    %495 = arith.addf %493, %494 : vector<8x128xf32>
    %c56_151 = arith.constant 56 : index
    %c0_152 = arith.constant 0 : index
    %496 = vector.load %arg12[%c56_151, %c0_152] : memref<64x384xf32, #tpu.memory_space<vmem>>, vector<8x384xf32>
    %497 = arith.truncf %495 : vector<8x128xf32> to vector<8x128xbf16>
    %c0_153 = arith.constant 0 : index
    %c0_154 = arith.constant 0 : index
    %498 = vector.load %arg6[%c0_153, %c0_154] : memref<128x384xbf16, #tpu.memory_space<vmem>>, vector<128x384xbf16>
    %cst_155 = arith.constant dense<0.000000e+00> : vector<8x384xf32>
    %499 = tpu.matmul %497, %498, %cst_155 {dimension_numbers = #tpu.dot_dimension_numbers<[1], [0], [0], [1], [0, 0, 1, 1], [], []>} : vector<8x128xbf16>, vector<128x384xbf16>, vector<8x384xf32> -> vector<8x384xf32>
    %500 = arith.addf %499, %277 : vector<8x384xf32>
    %501 = vector.extract_strided_slice %496 {offsets = [0, 0], sizes = [8, 128], strides = [1, 1]} : vector<8x384xf32> to vector<8x128xf32>
    %502 = vector.extract_strided_slice %500 {offsets = [0, 0], sizes = [8, 128], strides = [1, 1]} : vector<8x384xf32> to vector<8x128xf32>
    %503 = arith.addf %501, %502 : vector<8x128xf32>
    %504 = arith.negf %503 : vector<8x128xf32>
    %505 = math.exp %504 : vector<8x128xf32>
    %cst_156 = arith.constant 1.000000e+00 : f32
    %506 = vector.broadcast %cst_156 : f32 to vector<8x128xf32>
    %507 = arith.addf %506, %505 : vector<8x128xf32>
    %508 = arith.divf %506, %507 : vector<8x128xf32>
    %509 = vector.extract_strided_slice %496 {offsets = [0, 128], sizes = [8, 128], strides = [1, 1]} : vector<8x384xf32> to vector<8x128xf32>
    %510 = vector.extract_strided_slice %500 {offsets = [0, 128], sizes = [8, 128], strides = [1, 1]} : vector<8x384xf32> to vector<8x128xf32>
    %511 = arith.addf %509, %510 : vector<8x128xf32>
    %512 = arith.negf %511 : vector<8x128xf32>
    %513 = math.exp %512 : vector<8x128xf32>
    %cst_157 = arith.constant 1.000000e+00 : f32
    %514 = vector.broadcast %cst_157 : f32 to vector<8x128xf32>
    %515 = arith.addf %514, %513 : vector<8x128xf32>
    %516 = arith.divf %514, %515 : vector<8x128xf32>
    %517 = vector.extract_strided_slice %496 {offsets = [0, 256], sizes = [8, 128], strides = [1, 1]} : vector<8x384xf32> to vector<8x128xf32>
    %518 = vector.extract_strided_slice %500 {offsets = [0, 256], sizes = [8, 128], strides = [1, 1]} : vector<8x384xf32> to vector<8x128xf32>
    %519 = arith.mulf %508, %518 : vector<8x128xf32>
    %520 = arith.addf %517, %519 : vector<8x128xf32>
    %521 = math.tanh %520 : vector<8x128xf32>
    %cst_158 = arith.constant 1.000000e+00 : f32
    %522 = vector.broadcast %cst_158 : f32 to vector<8x128xf32>
    %523 = arith.subf %522, %516 : vector<8x128xf32>
    %524 = arith.mulf %523, %521 : vector<8x128xf32>
    %525 = arith.mulf %516, %495 : vector<8x128xf32>
    %526 = arith.addf %524, %525 : vector<8x128xf32>
    %c0_159 = arith.constant 0 : index
    %c0_160 = arith.constant 0 : index
    %527 = vector.load %arg9[%c0_159, %c0_160] : memref<128x128xf32, #tpu.memory_space<vmem>>, vector<128x128xf32>
    %cst_161 = arith.constant dense<0.000000e+00> : vector<8x128xf32>
    %528 = tpu.matmul %526, %527, %cst_161 {dimension_numbers = #tpu.dot_dimension_numbers<[1], [0], [0], [1], [0, 0, 1, 1], [], []>} : vector<8x128xf32>, vector<128x128xf32>, vector<8x128xf32> -> vector<8x128xf32>
    %c0_162 = arith.constant 0 : index
    %c0_163 = arith.constant 0 : index
    %529 = vector.load %arg10[%c0_162, %c0_163] : memref<1x128xf32, #tpu.memory_space<vmem>>, vector<1x128xf32>
    %530 = vector.broadcast %529 : vector<1x128xf32> to vector<8x128xf32>
    %531 = arith.addf %528, %530 : vector<8x128xf32>
    %c0_164 = arith.constant 0 : index
    %c0_165 = arith.constant 0 : index
    %532 = vector.load %arg11[%c0_164, %c0_165] : memref<8x128xf32, #tpu.memory_space<vmem>>, vector<8x128xf32>
    tpu.vector_store %arg11[%c0_164, %c0_165], %531 {strides = array<i32>} : memref<8x128xf32, #tpu.memory_space<vmem>>, vector<8x128xf32>,
    return
  }
}

</mosaic_0001>

<bundles_post_ra>
// kernel: model_gru_forward.1
= control target key start
LH: loop header
LB: loop body
LE: loop exit
PB: predicated region body
PF: predicated region fallthrough
CT: control target
= control target key end

     0   :  { %vm95_vm0 = vcmask 130048   ;;  %s7168_s1 = inlined_call_operand.vmem [shape: bf16[16,384], index: 1, kind: input, shape index: {}]   ;;  %s7169_s2 = inlined_call_operand.vmem [shape: bf16[128,384], index: 2, kind: input, shape index: {}]   ;;  %s7170_s0 = inlined_call_operand.vmem [shape: bf16[64,16], index: 0, kind: input, shape index: {}]   ;;  %s7171_s3 = inlined_call_operand.vmem [shape: f32[1,384], index: 3, kind: input, shape index: {}]   ;;  %s7172_s4 = inlined_call_operand.vmem [shape: f32[1,384], index: 4, kind: input, shape index: {}]   ;;  %s7173_s5 = inlined_call_operand.vmem [shape: bf16[128,384], index: 5, kind: input, shape index: {}]   ;;  %s7174_s6 = inlined_call_operand.vmem [shape: bf16[128,384], index: 6, kind: input, shape index: {}]   ;;  %s7175_s8 = inlined_call_operand.vmem [shape: f32[1,384], index: 8, kind: input, shape index: {}]   ;;  %s7176_s7 = inlined_call_operand.vmem [shape: f32[1,384], index: 7, kind: input, shape index: {}]   ;;  %s7177_s10 = inlined_call_operand.vmem [shape: f32[1,128], index: 10, kind: input, shape index: {}]   ;;  %s7178_s9 = inlined_call_operand.vmem [shape: f32[128,128], index: 9, kind: input, shape index: {}]   ;;  %s7179_s11 = inlined_call_operand.vmem [shape: f32[8,128], index: 11, kind: output, shape index: {}]  }
   0x1   :  { %v3475_v0 = vld [vmem:[%s7168_s1] sm:$0xf]  ;;  %v4494_v1 = vld [vmem:[%s7168_s1 + $0x8] sm:$0xf0]  ;;  %v3583_v2 = vld [vmem:[%s7169_s2 + $0xa8] sm:$0xf] }
   0x2   :  { %v3476_v3 = vor.u32 %v4494_v1, %v3475_v0  ;;  %v4518_v4 = vld [vmem:[%s7169_s2 + $0xb0] sm:$0xf0]  ;;  %v3571_v5 = vld [vmem:[%s7169_s2 + $0x90] sm:$0xf]  ;;  %v4977_v7 = vld [vmem:[%s7170_s0] sm:$0xff] }
   0x3   :  { %v3584_v6 = vor.u32 %v4518_v4, %v3583_v2  ;;  %v4515_v8 = vld [vmem:[%s7169_s2 + $0x98] sm:$0xf0]  ;;  %v3559_v10 = vld [vmem:[%s7169_s2 + $0x78] sm:$0xf]  ;;  %v4512_v11 = vld [vmem:[%s7169_s2 + $0x80] sm:$0xf0] }
   0x4   :  { %115 = vmatpush.bf16.msra.mxu0 %v3476_v3  ;;  %v3572_v9 = vor.u32 %v4515_v8, %v3571_v5  ;;  %v3591_v12 = vld [vmem:[%s7169_s2 + $0xb0] sm:$0xf]  ;;  %v4519_v13 = vld [vmem:[%s7169_s2 + $0xb8] sm:$0xf0]  ;;  %v3560_v15 = vor.u32 %v4512_v11, %v3559_v10  ;;  %v3579_v16 = vld [vmem:[%s7169_s2 + $0x98] sm:$0xf] }
   0x5   :  { %390 = vmatpush.bf16.msra.mxu3 %v3584_v6  ;;  %v3592_v14 = vor.u32 %v4519_v13, %v3591_v12  ;;  %v4516_v17 = vld [vmem:[%s7169_s2 + $0xa0] sm:$0xf0]  ;;  %v3547_v18 = vld [vmem:[%s7169_s2 + $0x60] sm:$0xf]  ;;  %v4509_v19 = vld [vmem:[%s7169_s2 + $0x68] sm:$0xf0] }
   0x6   :  { %v3580_v20 = vor.u32 %v4516_v17, %v3579_v16  ;;  %v3567_v21 = vld [vmem:[%s7169_s2 + $0x80] sm:$0xf]  ;;  %v4513_v22 = vld [vmem:[%s7169_s2 + $0x88] sm:$0xf0]  ;;  %v3548_v23 = vor.u32 %v4509_v19, %v3547_v18  ;;  %v3535_v25 = vld [vmem:[%s7169_s2 + $0x48] sm:$0xf] }
   0x7   :  { %3485 = vmatmul.msk.bf16.vlgmr.msra.gmra.mxu0 %vm95_vm0, %v4977_v7  ;;  %v3568_v24 = vor.u32 %v4513_v22, %v3567_v21  ;;  %v4506_v26 = vld [vmem:[%s7169_s2 + $0x50] sm:$0xf0]  ;;  %v3523_v28 = vld [vmem:[%s7169_s2 + $0x30] sm:$0xf]  ;;  %v4503_v29 = vld [vmem:[%s7169_s2 + $0x38] sm:$0xf0] }
   0x8   :  { %416 = vmatpush.bf16.msrb.mxu0 %v3592_v14  ;;  %v3536_v27 = vor.u32 %v4506_v26, %v3535_v25  ;;  %v3555_v30 = vld [vmem:[%s7169_s2 + $0x68] sm:$0xf]  ;;  %v4510_v31 = vld [vmem:[%s7169_s2 + $0x70] sm:$0xf0]  ;;  %v3524_v34 = vor.u32 %v4503_v29, %v3523_v28  ;;  %v3511_v35 = vld [vmem:[%s7169_s2 + $0x18] sm:$0xf] }
   0x9   :  { %391 = vmatpush.bf16.msra.mxu3 %v3572_v9  ;;  %v5035_v32 = vld [vmem:[%s7170_s0 + $0x8] sm:$0xff]  ;;  %v3556_v33 = vor.u32 %v4510_v31, %v3555_v30  ;;  %v4500_v36 = vld [vmem:[%s7169_s2 + $0x20] sm:$0xf0]  ;;  %v3543_v37 = vld [vmem:[%s7169_s2 + $0x50] sm:$0xf]  ;;  %v4898_v4 = vmov 0  }
   0xa   :  { %v4507_v38 = vld [vmem:[%s7169_s2 + $0x58] sm:$0xf0]  ;;  %v3512_v40 = vor.u32 %v4500_v36, %v3511_v35  ;;  %v3499_v41 = vld [vmem:[%s7169_s2] sm:$0xf]  ;;  %v4493_v42 = vld [vmem:[%s7168_s1 + $0x4] sm:$0xf] }
   0xb   :  { %v3544_v39 = vor.u32 %v4507_v38, %v3543_v37  ;;  %v3477_v43 = vld [vmem:[%s7168_s1 + $0xc] sm:$0xf0]  ;;  %v4497_v44 = vld [vmem:[%s7169_s2 + $0x8] sm:$0xf0]  ;;  %v3531_v46 = vld [vmem:[%s7169_s2 + $0x38] sm:$0xf] }
   0xc   :  { %417 = vmatpush.bf16.msrb.mxu0 %v3580_v20  ;;  %v3480_v45 = vor.u32 %v4493_v42, %v3477_v43  ;;  %v4504_v47 = vld [vmem:[%s7169_s2 + $0x40] sm:$0xf0]  ;;  %v4517_v48 = vld [vmem:[%s7169_s2 + $0xac] sm:$0xf]  ;;  %v3585_v49 = vld [vmem:[%s7169_s2 + $0xb4] sm:$0xf0]  ;;  %v3500_v51 = vor.u32 %v4497_v44, %v3499_v41 }
   0xd   :  { %392 = vmatpush.bf16.msra.mxu3 %v3560_v15  ;;  %v3532_v50 = vor.u32 %v4504_v47, %v3531_v46  ;;  %v3588_v52 = vor.u32 %v4517_v48, %v3585_v49  ;;  %v3483_v53 = vld [vmem:[%s7168_s1 + $0x8] sm:$0xf]  ;;  %v4495_v54 = vld [vmem:[%s7168_s1 + $0x10] sm:$0xf0]  ;;  %v3519_v55 = vld [vmem:[%s7169_s2 + $0x20] sm:$0xf] }
   0xe   :  { %144 = vmatpush.bf16.msra.mxu1 %v3480_v45  ;;  %v4514_v56 = vld [vmem:[%s7169_s2 + $0x94] sm:$0xf]  ;;  %v3573_v57 = vld [vmem:[%s7169_s2 + $0x9c] sm:$0xf0]  ;;  %v3484_v58 = vor.u32 %v4495_v54, %v3483_v53  ;;  %v4501_v59 = vld [vmem:[%s7169_s2 + $0x28] sm:$0xf0] }
   0xf   :  { %v3520_v60 = vor.u32 %v4501_v59, %v3519_v55  ;;  %v3507_v61 = vld [vmem:[%s7169_s2 + $0x8] sm:$0xf]  ;;  %v4498_v62 = vld [vmem:[%s7169_s2 + $0x10] sm:$0xf0]  ;;  %v3576_v63 = vor.u32 %v4514_v56, %v3573_v57  ;;  %v4511_v2 = vld [vmem:[%s7169_s2 + $0x7c] sm:$0xf] }
  0x10   :  { %418 = vmatpush.bf16.msrb.mxu0 %v3568_v24  ;;  %173 = vmatpush.bf16.msra.mxu2 %v3484_v58  ;;  %v3508_v0 = vor.u32 %v4498_v62, %v3507_v61  ;;  %v4491_v1 = vld [vmem:[%s7170_s0 + $0x10] sm:$0xff]  ;;  %v3561_v3 = vld [vmem:[%s7169_s2 + $0x84] sm:$0xf0]  ;;  %v4508_v6 = vld [vmem:[%s7169_s2 + $0x64] sm:$0xf] }
  0x11   :  { %393 = vmatpush.bf16.msra.mxu3 %v3548_v23  ;;  %3489 = vmatmul.msk.bf16.vlgmr.msra.gmra.mxu1 %vm95_vm0, %v4977_v7  ;;  %v3564_v5 = vor.u32 %v4511_v2, %v3561_v3  ;;  %v3549_v8 = vld [vmem:[%s7169_s2 + $0x6c] sm:$0xf0]  ;;  %v4505_v10 = vld [vmem:[%s7169_s2 + $0x4c] sm:$0xf]  ;;  %v4502_v12 = vld [vmem:[%s7169_s2 + $0x34] sm:$0xf] }
  0x12   :  { %v3552_v9 = vor.u32 %v4508_v6, %v3549_v8  ;;  %v3525_v13 = vld [vmem:[%s7169_s2 + $0x3c] sm:$0xf0]  ;;  %v4492_v15 = vld [vmem:[%s7170_s0 + $0x18] sm:$0xff]  ;;  %v3513_v17 = vld [vmem:[%s7169_s2 + $0x24] sm:$0xf0] }
  0x13   :  { %3493 = vmatmul.msk.bf16.vlgmr.msra.gmra.mxu2 %vm95_vm0, %v4977_v7  ;;  %v3537_v7 = vld [vmem:[%s7169_s2 + $0x54] sm:$0xf0]  ;;  %v3528_v14 = vor.u32 %v4502_v12, %v3525_v13  ;;  %v4499_v16 = vld [vmem:[%s7169_s2 + $0x1c] sm:$0xf]  ;;  %v4496_v19 = vld [vmem:[%s7169_s2 + $0x4] sm:$0xf] }
  0x14   :  { %419 = vmatpush.bf16.msrb.mxu0 %v3556_v33  ;;  %v3540_v11 = vor.u32 %v4505_v10, %v3537_v7  ;;  %v3516_v18 = vor.u32 %v4499_v16, %v3513_v17  ;;  %v3501_v20 = vld [vmem:[%s7169_s2 + $0xc] sm:$0xf0]  ;;  %v5163_v24 = vld [vmem:[%s7171_s3] sm:$0x7]  ;;  %v3681_v28 = vld [vmem:[%s7169_s2 + $0xa8] sm:$0xf] }
  0x15   :  { %394 = vmatpush.bf16.msra.mxu3 %v3536_v27  ;;  %v3504_v21 = vor.u32 %v4496_v19, %v3501_v20  ;;  %v5166_v25 = vperm.slane %v5163_v24, 0  ;;  %v4542_v29 = vld [vmem:[%s7169_s2 + $0xb0] sm:$0xf0]  ;;  %v4541_v30 = vld [vmem:[%s7169_s2 + $0xac] sm:$0xf] }
  0x16   :  { %v3682_v31 = vor.u32 %v4542_v29, %v3681_v28  ;;  %v3669_v33 = vld [vmem:[%s7169_s2 + $0x90] sm:$0xf]  ;;  %v4538_v36 = vld [vmem:[%s7169_s2 + $0x94] sm:$0xf]  ;;  %v3671_v37 = vld [vmem:[%s7169_s2 + $0x9c] sm:$0xf0] }
  0x17   :  { %3486 = vmatmul.msk.bf16.gmra.mxu0 %vm95_vm0, %v5035_v32  ;;  %v3657_v41 = vld [vmem:[%s7169_s2 + $0x78] sm:$0xf]  ;;  %v4536_v42 = vld [vmem:[%s7169_s2 + $0x80] sm:$0xf0]  ;;  %v4535_v43 = vld [vmem:[%s7169_s2 + $0x7c] sm:$0xf] }
  0x18   :  { %420 = vmatpush.bf16.msrb.mxu0 %v3544_v39  ;;  %641 = vmatpush.bf16.msrb.mxu1 %v3682_v31  ;;  %v3674_v39 = vor.u32 %v4538_v36, %v3671_v37  ;;  %v3658_v44 = vor.u32 %v4536_v42, %v3657_v41  ;;  %v3659_v45 = vld [vmem:[%s7169_s2 + $0x84] sm:$0xf0]  ;;  %v5212_v47 = vld [vmem:[%s7172_s4] sm:$0x7]  ;;  %v3689_v55 = vld [vmem:[%s7169_s2 + $0xb0] sm:$0xf] }
  0x19   :  { %395 = vmatpush.bf16.msra.mxu3 %v3524_v34  ;;  %v4539_v34 = vld [vmem:[%s7169_s2 + $0x98] sm:$0xf0]  ;;  %v3662_v46 = vor.u32 %v4535_v43, %v3659_v45  ;;  %v5215_v49 = vperm.slane %v5212_v47, 0  ;;  %v3677_v61 = vld [vmem:[%s7169_s2 + $0x98] sm:$0xf] }
  0x1a   :  { %v3670_v38 = vor.u32 %v4539_v34, %v3669_v33  ;;  %v4543_v56 = vld [vmem:[%s7169_s2 + $0xb8] sm:$0xf0]  ;;  %v4540_v62 = vld [vmem:[%s7169_s2 + $0xa0] sm:$0xf0]  ;;  %v4533_v10 = vld [vmem:[%s7169_s2 + $0x68] sm:$0xf0] }
  0x1b   :  { %v3690_v59 = vor.u32 %v4543_v56, %v3689_v55  ;;  %v4532_v7 = vld [vmem:[%s7169_s2 + $0x64] sm:$0xf]  ;;  %v3633_v17 = vld [vmem:[%s7169_s2 + $0x48] sm:$0xf]  ;;  %v4529_v19 = vld [vmem:[%s7169_s2 + $0x4c] sm:$0xf] }
  0x1c   :  { %421 = vmatpush.bf16.msrb.mxu0 %v3532_v50  ;;  %642 = vmatpush.bf16.msrb.mxu1 %v3670_v38  ;;  %v4531_v28 = vld [vmem:[%s7169_s2 + $0x58] sm:$0xf0]  ;;  %v3621_v33 = vld [vmem:[%s7169_s2 + $0x30] sm:$0xf]  ;;  %v4526_v36 = vld [vmem:[%s7169_s2 + $0x34] sm:$0xf] }
  0x1d   :  { %396 = vmatpush.bf16.msra.mxu3 %v3512_v40  ;;  %v4527_v34 = vld [vmem:[%s7169_s2 + $0x38] sm:$0xf0]  ;;  %v3623_v37 = vld [vmem:[%s7169_s2 + $0x3c] sm:$0xf0]  ;;  %v5304_v38 = vperm.slane %v5212_v47, 1 }
  0x1e   :  { %v3629_v41 = vld [vmem:[%s7169_s2 + $0x38] sm:$0xf]  ;;  %v4528_v42 = vld [vmem:[%s7169_s2 + $0x40] sm:$0xf0]  ;;  %v3611_v56 = vld [vmem:[%s7169_s2 + $0x24] sm:$0xf0] }
  0x1f   :  { %v3630_v45 = vor.u32 %v4528_v42, %v3629_v41 }
  0x20   :  { %422 = vmatpush.bf16.msrb.mxu0 %v3520_v60  ;;  %643 = vmatpush.bf16.msrb.mxu1 %v3658_v44 }
  0x21   :  { %397 = vmatpush.bf16.msra.mxu3 %v3500_v51  ;;  %3490 = vmatmul.msk.bf16.gmra.mxu1 %vm95_vm0, %v5035_v32 }
  0x23   :  { %3494 = vmatmul.msk.bf16.gmra.mxu2 %vm95_vm0, %v5035_v32  ;;  %v3683_v32 = vld [vmem:[%s7169_s2 + $0xb4] sm:$0xf0] }
  0x24   :  { %398 = vmatmul.bf16.vlgmr.msra.gmra.mxu3 %v4898_v4  ;;  %423 = vmatpush.bf16.msrb.mxu0 %v3508_v0  ;;  %v3686_v35 = vor.u32 %v4541_v30, %v3683_v32  ;;  %v3665_v0 = vld [vmem:[%s7169_s2 + $0x80] sm:$0xf]  ;;  %v5289_v32 = vperm.slane %v5163_v24, 1 }
  0x25   :  { %403 = vmatpush.bf16.msrb.mxu3 %v3588_v52 }
  0x26   :  { %654 = vmatpush.bf16.msrb.mxu2 %v3686_v35  ;;  %v3622_v35 = vor.u32 %v4527_v34, %v3621_v33  ;;  %v5364_v33 = vperm.slane %v5163_v24, 2 }
  0x27   :  { %3487 = vmatmul.msk.bf16.gmra.mxu0 %vm95_vm0, %v4491_v1 }
  0x29   :  { %404 = vmatpush.bf16.msrb.mxu3 %v3576_v63  ;;  %v3678_v63 = vor.u32 %v4540_v62, %v3677_v61 }
  0x2a   :  { %655 = vmatpush.bf16.msrb.mxu2 %v3674_v39  ;;  %v3626_v39 = vor.u32 %v4526_v36, %v3623_v37 }
  0x2d   :  { %405 = vmatpush.bf16.msrb.mxu3 %v3564_v5 }
  0x2e   :  { %656 = vmatpush.bf16.msrb.mxu2 %v3662_v46 }
  0x31   :  { %406 = vmatpush.bf16.msrb.mxu3 %v3552_v9  ;;  %3491 = vmatmul.msk.bf16.gmra.mxu1 %vm95_vm0, %v4491_v1  ;;  %v3645_v9 = vld [vmem:[%s7169_s2 + $0x60] sm:$0xf] }
  0x32   :  { %v3646_v12 = vor.u32 %v4533_v10, %v3645_v9  ;;  %v3599_v9 = vld [vmem:[%s7169_s2 + $0xc] sm:$0xf0]  ;;  %v3605_v10 = vld [vmem:[%s7169_s2 + $0x8] sm:$0xf] }
  0x33   :  { %3495 = vmatmul.msk.bf16.gmra.mxu2 %vm95_vm0, %v4491_v1  ;;  %v4537_v1 = vld [vmem:[%s7169_s2 + $0x88] sm:$0xf0] }
  0x34   :  { %v3666_v5 = vor.u32 %v4537_v1, %v3665_v0  ;;  %644 = vmatpush.bf16.msrb.mxu1 %v3646_v12  ;;  %v3597_v1 = vld [vmem:[%s7169_s2] sm:$0xf] }
  0x35   :  { %407 = vmatpush.bf16.msrb.mxu3 %v3540_v11  ;;  %v3647_v11 = vld [vmem:[%s7169_s2 + $0x6c] sm:$0xf0] }
  0x36   :  { %v3650_v13 = vor.u32 %v4532_v7, %v3647_v11  ;;  %v4522_v7 = vld [vmem:[%s7169_s2 + $0x10] sm:$0xf0] }
  0x37   :  { %3488 = vmatmul.msk.bf16.gmra.mxu0 %vm95_vm0, %v4492_v15 }
  0x38   :  { %657 = vmatpush.bf16.msrb.mxu2 %v3650_v13  ;;  %v3606_v13 = vor.u32 %v4522_v7, %v3605_v10  ;;  %v4565_v10 = vld [vmem:[%s7169_s2 + $0xac] sm:$0xf] }
  0x39   :  { %408 = vmatpush.bf16.msrb.mxu3 %v3528_v14  ;;  %v3653_v14 = vld [vmem:[%s7169_s2 + $0x68] sm:$0xf] }
  0x3d   :  { %409 = vmatpush.bf16.msrb.mxu3 %v3516_v18  ;;  %v4530_v18 = vld [vmem:[%s7169_s2 + $0x50] sm:$0xf0] }
  0x41   :  { %410 = vmatpush.bf16.msrb.mxu3 %v3504_v21  ;;  %3492 = vmatmul.msk.bf16.gmra.mxu1 %vm95_vm0, %v4492_v15  ;;  %v3634_v21 = vor.u32 %v4530_v18, %v3633_v17 }
  0x43   :  { %3496 = vmatmul.msk.bf16.gmra.mxu2 %vm95_vm0, %v4492_v15  ;;  %v4534_v15 = vld [vmem:[%s7169_s2 + $0x70] sm:$0xf0]  ;;  %645 = vmatpush.bf16.msrb.mxu1 %v3634_v21 }
  0x44   :  { %411 = vmatmul.bf16.vlgmr.msrb.gmra.mxu3 %v4898_v4  ;;  %v3654_v16 = vor.u32 %v4534_v15, %v3653_v14 }
  0x45   :  { %667 = vmatpush.bf16.msra.mxu3 %v3690_v59  ;;  %v4525_v59 = vld [vmem:[%s7169_s2 + $0x28] sm:$0xf0] }
  0x47   :  { %424 = vmatmul.bf16.vlgmr.msrb.gmra.mxu0 %v4898_v4  ;;  %646 = vmatpush.bf16.msrb.mxu1 %v3622_v35 }
  0x49   :  { %668 = vmatpush.bf16.msra.mxu3 %v3678_v63 }
  0x4d   :  { %669 = vmatpush.bf16.msra.mxu3 %v3666_v5 }
  0x51   :  { %670 = vmatpush.bf16.msra.mxu3 %v3654_v16 }
  0x84   :  { %v117_v22 = vpop.f32.mrf.mxu0 }
  0x85   :  { %v118_v52 = vadd.f32 %v117_v22, %v5166_v25  ;;  %v3635_v22 = vld [vmem:[%s7169_s2 + $0x54] sm:$0xf0] }
  0x86   :  { %v3638_v29 = vor.u32 %v4529_v19, %v3635_v22  ;;  %v5357_v19 = vperm.slane %v5212_v47, 2 }
  0x88   :  { %658 = vmatpush.bf16.msrb.mxu2 %v3638_v29 }
  0x8c   :  { %v5158_v23 = vpop.f32.mrf.mxu0  ;;  %659 = vmatpush.bf16.msrb.mxu2 %v3626_v39 }
  0x8e   :  { %v146_v43 = vpop.f32.mrf.mxu1 }
  0x8f   :  { %v147_v46 = vadd.f32 %v146_v43, %v5289_v32 }
  0x94   :  { %v122_v26 = vpop.f32.mrf.mxu0 }
  0x95   :  { %v5169_v27 = vadd.f32 %v122_v26, %v5166_v25  ;;  %v3641_v26 = vld [vmem:[%s7169_s2 + $0x50] sm:$0xf] }
  0x96   :  { %v3642_v30 = vor.u32 %v4531_v28, %v3641_v26  ;;  %v175_v47 = vpop.f32.mrf.mxu2 }
  0x97   :  { %v176_v36 = vadd.f32 %v175_v47, %v5364_v33 }
  0x98   :  { %671 = vmatpush.bf16.msra.mxu3 %v3642_v30 }
  0x9c   :  { %v5195_v40 = vpop.f32.mrf.mxu0  ;;  %672 = vmatpush.bf16.msra.mxu3 %v3630_v45 }
  0xa4   :  { %v127_v48 = vpop.f32.mrf.mxu0 }
  0xa5   :  { %v5218_v50 = vadd.f32 %v127_v48, %v5166_v25  ;;  %v3609_v48 = vld [vmem:[%s7169_s2 + $0x18] sm:$0xf] }
  0xa7   :  { %v399_v51 = vpop.f32.mrf.mxu3 }
  0xa8   :  { %v400_v53 = vadd.f32 %v399_v51, %v5215_v49  ;;  %v4524_v51 = vld [vmem:[%s7169_s2 + $0x20] sm:$0xf0] }
  0xa9   :  { %v3610_v55 = vor.u32 %v4524_v51, %v3609_v48 }
  0xaa   :  { %v429_v54 = vadd.f32 %v400_v53, %v118_v52  ;;  %v4523_v52 = vld [vmem:[%s7169_s2 + $0x1c] sm:$0xf] }
  0xab   :  { %v3614_v61 = vor.u32 %v4523_v52, %v3611_v56  ;;  %647 = vmatpush.bf16.msrb.mxu1 %v3610_v55  ;;  %v5371_v56 = vpop.f32.mrf.mxu1 }
  0xac   :  { %v3593_v57 = vmul.f32 -1.442695, %v429_v54  ;;  %v5228_v58 = vpop.f32.mrf.mxu0 }
  0xad   :  { %660 = vmatpush.bf16.msrb.mxu2 %v3614_v61 }
  0xae   :  { %4738 = vpow2.f32 %v3593_v57  ;;  %v3617_v57 = vld [vmem:[%s7169_s2 + $0x20] sm:$0xf] }
  0xaf   :  { %v401_v60 = vpop.f32.mrf.mxu3  ;;  %v3618_v62 = vor.u32 %v4525_v59, %v3617_v57  ;;  %v5373_v57 = vpop.f32.mrf.mxu2 }
  0xb1   :  { %673 = vmatpush.bf16.msra.mxu3 %v3618_v62 }
  0xb3   :  { %v5375_v59 = vpop.f32.mrf.mxu1 }
  0xb4   :  { %v4739_v2 = vpop.eup %4738  ;;  %v132_v3 = vpop.f32.mrf.mxu0 }
  0xb5   :  { %v5242_v6 = vadd.f32 1.0, %v4739_v2  ;;  %v5245_v8 = vadd.f32 %v132_v3, %v5166_v25  ;;  %v4521_v2 = vld [vmem:[%s7169_s2 + $0x8] sm:$0xf0]  ;;  %v4520_v3 = vld [vmem:[%s7169_s2 + $0x4] sm:$0xf]  ;;  %674 = vmatpush.bf16.msra.mxu3 %v3606_v13 }
  0xb6   :  { %v3598_v5 = vor.u32 %v4521_v2, %v3597_v1  ;;  %v3602_v12 = vor.u32 %v4520_v3, %v3599_v9  ;;  %v4566_v9 = vld [vmem:[%s7169_s2 + $0xb0] sm:$0xf0]  ;;  %v4567_v13 = vld [vmem:[%s7169_s2 + $0xb8] sm:$0xf0] }
  0xb7   :  { %4740 = vrcp.f32 %v5242_v6  ;;  %v445_v18 = vand.u32 2147483648, %v5242_v6  ;;  %vm439_vm2 = vweird.f32 %v5242_v6  ;;  %v443_v21 = vand.u32 2147483647, %v5242_v6 }
  0xb8   :  { %648 = vmatpush.bf16.msrb.mxu1 %v3598_v5  ;;  %661 = vmatpush.bf16.msrb.mxu2 %v3602_v12  ;;  %v3779_v5 = vld [vmem:[%s7169_s2 + $0xa8] sm:$0xf]  ;;  %v3787_v12 = vld [vmem:[%s7169_s2 + $0xb0] sm:$0xf] }
  0xb9   :  { %v446_v29 = vor.u32 1.1754944e-38, %v445_v18  ;;  %vm444_vm4 = vcmp.eq.f32.partialorder %v443_v21, 8.507059e+37  ;;  %v3780_v7 = vor.u32 %v4566_v9, %v3779_v5  ;;  %v4563_v18 = vld [vmem:[%s7169_s2 + $0x98] sm:$0xf0]  ;;  %v4562_v21 = vld [vmem:[%s7169_s2 + $0x94] sm:$0xf] }
  0xbb   :  { %v5379_v61 = vpop.f32.mrf.mxu1  ;;  %892 = vmatpush.bf16.msra.mxu0 %v3780_v7 }
  0xbc   :  { %v5275_v20 = vpop.f32.mrf.mxu0 }
  0xbd   :  { %v5286_v31 = vpop.eup %4740 }
  0xbe   :  { %v435_v44 = vmul.f32 %v5286_v31, %v5242_v6  ;;  %vm440_vm1 = vweird.f32 %v5286_v31 }
  0xbf   :  { %vm441_vm3 = vmor %vm439_vm2, %vm440_vm1 }
  0xc0   :  { %v436_v63 = vsub.f32 1.0, %v435_v44 }
  0xc2   :  { %v437_v14 = vmul.f32 %v5286_v31, %v436_v63 }
  0xc3   :  { %v5383_v63 = vpop.f32.mrf.mxu1 }
  0xc4   :  { %v425_v54 = vpop.f32.mrf.mxu0  ;;  %v438_v17 = vadd.f32 %v5286_v31, %v437_v14 }
  0xc5   :  { %v426_v30 = vadd.f32 %v425_v54, %v5357_v19 }
  0xc6   :  { %v442_v28 = vsel %vm441_vm3, %v5286_v31, %v438_v17  ;;  %v3767_v17 = vld [vmem:[%s7169_s2 + $0x90] sm:$0xf] }
  0xc7   :  { %v412_v53 = vpop.f32.mrf.mxu3  ;;  %v447_v34 = vsel %vm444_vm4, %v446_v29, %v442_v28  ;;  %v3775_v28 = vld [vmem:[%s7169_s2 + $0x98] sm:$0xf]  ;;  %v4564_v29 = vld [vmem:[%s7169_s2 + $0xa0] sm:$0xf0] }
  0xc8   :  { %v413_v60 = vadd.f32 %v412_v53, %v5304_v38  ;;  %v469_v35 = vmul.f32 %v447_v34, %v426_v30  ;;  %v3776_v34 = vor.u32 %v4564_v29, %v3775_v28  ;;  %v3719_v28 = vld [vmem:[%s7169_s2 + $0x30] sm:$0xf]  ;;  %v4551_v29 = vld [vmem:[%s7169_s2 + $0x38] sm:$0xf0] }
  0xca   :  { %v449_v0 = vadd.f32 %v413_v60, %v147_v46  ;;  %v470_v39 = vadd.f32 %v469_v35, %v176_v36  ;;  %v5377_v60 = vpop.f32.mrf.mxu2  ;;  %v3755_v35 = vld [vmem:[%s7169_s2 + $0x78] sm:$0xf]  ;;  %v4560_v36 = vld [vmem:[%s7169_s2 + $0x80] sm:$0xf0] }
  0xcb   :  { %v5387_v1 = vpop.f32.mrf.mxu1 }
  0xcc   :  { %v3594_v11 = vmul.f32 -1.442695, %v449_v0  ;;  %v427_v16 = vpop.f32.mrf.mxu0 }
  0xce   :  { %4742 = vpow2.f32 %v3594_v11  ;;  %v3781_v11 = vld [vmem:[%s7169_s2 + $0xb4] sm:$0xf0] }
  0xcf   :  { %v414_v15 = vpop.f32.mrf.mxu3  ;;  %v3784_v14 = vor.u32 %v4565_v10, %v3781_v11  ;;  %v120_v10 = vadd.f32 %v5158_v23, %v5166_v25  ;;  %v3731_v11 = vld [vmem:[%s7169_s2 + $0x48] sm:$0xf]  ;;  %v3733_v23 = vld [vmem:[%s7169_s2 + $0x54] sm:$0xf0] }
  0xd0   :  { %v3788_v15 = vor.u32 %v4567_v13, %v3787_v12  ;;  %v4554_v12 = vld [vmem:[%s7169_s2 + $0x50] sm:$0xf0]  ;;  %v4553_v13 = vld [vmem:[%s7169_s2 + $0x4c] sm:$0xf] }
  0xd1   :  { %905 = vmatpush.bf16.msra.mxu1 %v3784_v14  ;;  %v3732_v14 = vor.u32 %v4554_v12, %v3731_v11  ;;  %v4545_v11 = vld [vmem:[%s7169_s2 + $0x8] sm:$0xf0]  ;;  %v4544_v12 = vld [vmem:[%s7169_s2 + $0x4] sm:$0xf] }
  0xd2   :  { %v5381_v62 = vpop.f32.mrf.mxu2  ;;  %918 = vmatpush.bf16.msra.mxu2 %v3788_v15  ;;  %v3739_v15 = vld [vmem:[%s7169_s2 + $0x50] sm:$0xf] }
  0xd3   :  { %v5391_v3 = vpop.f32.mrf.mxu1 }
  0xd4   :  { %v4743_v22 = vpop.eup %4742 }
  0xd5   :  { %v453_v26 = vadd.f32 1.0, %v4743_v22  ;;  %v3768_v22 = vor.u32 %v4563_v18, %v3767_v17  ;;  %v4555_v17 = vld [vmem:[%s7169_s2 + $0x58] sm:$0xf0] }
  0xd6   :  { %919 = vmatpush.bf16.msra.mxu2 %v3776_v34  ;;  %v3720_v34 = vor.u32 %v4551_v29, %v3719_v28 }
  0xd7   :  { %4744 = vrcp.f32 %v453_v26  ;;  %v465_v42 = vand.u32 2147483648, %v453_v26  ;;  %v463_v31 = vand.u32 2147483647, %v453_v26  ;;  %vm459_vm6 = vweird.f32 %v453_v26  ;;  %893 = vmatpush.bf16.msra.mxu0 %v3768_v22 }
  0xd8   :  { %4746 = vtanh.f32 %v470_v39  ;;  %v3757_v39 = vld [vmem:[%s7169_s2 + $0x84] sm:$0xf0]  ;;  %v3740_v22 = vor.u32 %v4555_v17, %v3739_v15  ;;  %v4546_v17 = vld [vmem:[%s7169_s2 + $0x10] sm:$0xf0] }
  0xd9   :  { %v466_v45 = vor.u32 1.1754944e-38, %v465_v42  ;;  %vm464_vm8 = vcmp.eq.f32.partialorder %v463_v31, 8.507059e+37  ;;  %v4561_v42 = vld [vmem:[%s7169_s2 + $0x88] sm:$0xf0]  ;;  %v3703_v15 = vld [vmem:[%s7169_s2 + $0x8] sm:$0xf] }
  0xda   :  { %v5385_v0 = vpop.f32.mrf.mxu2 }
  0xdb   :  { %v5431_v47 = vpop.f32.mrf.mxu1 }
  0xdd   :  { %v4745_v37 = vpop.eup %4744 }
  0xde   :  { %v455_v6 = vmul.f32 %v4745_v37, %v453_v26  ;;  %vm460_vm5 = vweird.f32 %v4745_v37  ;;  %v4747_v51 = vpop.eup %4746  ;;  %v3769_v26 = vld [vmem:[%s7169_s2 + $0x9c] sm:$0xf0] }
  0xdf   :  { %vm461_vm7 = vmor %vm459_vm6, %vm460_vm5  ;;  %v3772_v30 = vor.u32 %v4562_v21, %v3769_v26  ;;  %v3736_v21 = vor.u32 %v4553_v13, %v3733_v23  ;;  %v3697_v23 = vld [vmem:[%s7169_s2 + $0xc] sm:$0xf0] }
  0xe0   :  { %v456_v41 = vsub.f32 1.0, %v455_v6  ;;  %v3756_v6 = vor.u32 %v4560_v36, %v3755_v35  ;;  %v4550_v35 = vld [vmem:[%s7169_s2 + $0x34] sm:$0xf]  ;;  %v3721_v36 = vld [vmem:[%s7169_s2 + $0x3c] sm:$0xf0] }
  0xe1   :  { %906 = vmatpush.bf16.msra.mxu1 %v3772_v30 }
  0xe2   :  { %v457_v43 = vmul.f32 %v4745_v37, %v456_v41  ;;  %v5389_v2 = vpop.f32.mrf.mxu2  ;;  %v3763_v41 = vld [vmem:[%s7169_s2 + $0x80] sm:$0xf]  ;;  %894 = vmatpush.bf16.msra.mxu0 %v3756_v6  ;;  %v149_v6 = vadd.f32 %v5371_v56, %v5289_v32  ;;  %v4548_v56 = vld [vmem:[%s7169_s2 + $0x20] sm:$0xf0] }
  0xe3   :  { %v3764_v31 = vor.u32 %v4561_v42, %v3763_v41  ;;  %v3724_v42 = vor.u32 %v4550_v35, %v3721_v36 }
  0xe4   :  { %v458_v44 = vadd.f32 %v4745_v37, %v457_v43 }
  0xe5   :  { %920 = vmatpush.bf16.msra.mxu2 %v3764_v31 }
  0xe6   :  { %v462_v24 = vsel %vm461_vm7, %v4745_v37, %v458_v44  ;;  %v4559_v37 = vld [vmem:[%s7169_s2 + $0x7c] sm:$0xf]  ;;  %v3743_v44 = vld [vmem:[%s7169_s2 + $0x60] sm:$0xf] }
  0xe7   :  { %v467_v46 = vsel %vm464_vm8, %v466_v45, %v462_v24  ;;  %v3760_v43 = vor.u32 %v4559_v37, %v3757_v39  ;;  %v4557_v45 = vld [vmem:[%s7169_s2 + $0x68] sm:$0xf0]  ;;  %v4556_v24 = vld [vmem:[%s7169_s2 + $0x64] sm:$0xf]  ;;  %v3727_v37 = vld [vmem:[%s7169_s2 + $0x38] sm:$0xf] }
  0xe8   :  { %v472_v48 = vsub.f32 1.0, %v467_v46  ;;  %v474_v53 = vmul.f32 0.0, %v467_v46 }
  0xe9   :  { %907 = vmatpush.bf16.msra.mxu1 %v3760_v43  ;;  %v4552_v43 = vld [vmem:[%s7169_s2 + $0x40] sm:$0xf0] }
  0xea   :  { %v473_v52 = vmul.f32 %v4747_v51, %v472_v48  ;;  %v5411_v16 = vpop.f32.mrf.mxu2  ;;  %v3744_v48 = vor.u32 %v4557_v45, %v3743_v44  ;;  %v3745_v51 = vld [vmem:[%s7169_s2 + $0x6c] sm:$0xf0]  ;;  %v3728_v44 = vor.u32 %v4552_v43, %v3727_v37 }
  0xec   :  { %v5367_v54 = vadd.f32 %v474_v53, %v473_v52  ;;  %v3751_v52 = vld [vmem:[%s7169_s2 + $0x68] sm:$0xf]  ;;  %v4558_v53 = vld [vmem:[%s7169_s2 + $0x70] sm:$0xf0]  ;;  %895 = vmatpush.bf16.msra.mxu0 %v3744_v48  ;;  %v4547_v48 = vld [vmem:[%s7169_s2 + $0x1c] sm:$0xf] }
  0xed   :  { %v3752_v5 = vor.u32 %v4558_v53, %v3751_v52  ;;  %v3709_v52 = vld [vmem:[%s7169_s2 + $0x24] sm:$0xf0]  ;;  %v3715_v53 = vld [vmem:[%s7169_s2 + $0x20] sm:$0xf] }
  0xee   :  { %v480_v55 = vpack.c.bf16 %v5367_v54, %v5367_v54 }
  0xef   :  { %921 = vmatpush.bf16.msra.mxu2 %v3752_v5 }
  0xf0   :  { %649 = vmatmul.bf16.vlgmr.msrb.gmra.mxu1 %v480_v55  ;;  %662 = vmatmul.bf16.vlgmr.msrb.gmra.mxu2 %v480_v55 }
  0xf1   :  { %675 = vmatmul.bf16.vlgmr.msra.gmra.mxu3 %v480_v55  ;;  %v3748_v55 = vor.u32 %v4556_v24, %v3745_v51  ;;  %896 = vmatpush.bf16.msra.mxu0 %v3732_v14  ;;  %v3707_v24 = vld [vmem:[%s7169_s2 + $0x18] sm:$0xf] }
  0xf2   :  { %v5460_v46 = vpop.f32.mrf.mxu2  ;;  %v3708_v51 = vor.u32 %v4548_v56, %v3707_v24 }
  0xf3   :  { %908 = vmatpush.bf16.msra.mxu1 %v3748_v55  ;;  %922 = vmatpush.bf16.msra.mxu2 %v3740_v22  ;;  %v4549_v55 = vld [vmem:[%s7169_s2 + $0x28] sm:$0xf0]  ;;  %v3700_v22 = vor.u32 %v4544_v12, %v3697_v23 }
  0xf5   :  { %897 = vmatpush.bf16.msra.mxu0 %v3720_v34 }
  0xf7   :  { %909 = vmatpush.bf16.msra.mxu1 %v3736_v21  ;;  %923 = vmatpush.bf16.msra.mxu2 %v3728_v44 }
  0xf9   :  { %898 = vmatpush.bf16.msra.mxu0 %v3708_v51 }
  0xfb   :  { %910 = vmatpush.bf16.msra.mxu1 %v3724_v42 }
 0x16d   :  { %v650_v9 = vpop.f32.mrf.mxu1 }
 0x16e   :  { %v651_v7 = vadd.f32 %v650_v9, %v5215_v49  ;;  %v3712_v9 = vor.u32 %v4547_v48, %v3709_v52  ;;  %v178_v48 = vadd.f32 %v5373_v57, %v5364_v33 }
 0x170   :  { %v680_v18 = vadd.f32 %v651_v7, %v120_v10  ;;  %v3716_v10 = vor.u32 %v4549_v55, %v3715_v53  ;;  %v3695_v7 = vld [vmem:[%s7169_s2] sm:$0xf]  ;;  %911 = vmatpush.bf16.msra.mxu1 %v3712_v9 }
 0x171   :  { %v3696_v14 = vor.u32 %v4545_v11, %v3695_v7 }
 0x172   :  { %v3691_v26 = vmul.f32 -1.442695, %v680_v18  ;;  %924 = vmatpush.bf16.msra.mxu2 %v3716_v10 }
 0x173   :  { %v663_v30 = vpop.f32.mrf.mxu2  ;;  %899 = vmatpush.bf16.msra.mxu0 %v3696_v14 }
 0x174   :  { %4748 = vpow2.f32 %v3691_v26  ;;  %v664_v39 = vadd.f32 %v663_v30, %v5304_v38  ;;  %v676_v41 = vpop.f32.mrf.mxu3  ;;  %v3704_v26 = vor.u32 %v4546_v17, %v3703_v15  ;;  %912 = vmatpush.bf16.msra.mxu1 %v3700_v22  ;;  %v3877_v17 = vld [vmem:[%s7169_s2 + $0xa8] sm:$0xf] }
 0x175   :  { %v652_v31 = vpop.f32.mrf.mxu1  ;;  %v677_v24 = vadd.f32 %v676_v41, %v5357_v19 }
 0x176   :  { %v700_v45 = vadd.f32 %v664_v39, %v149_v6  ;;  %925 = vmatpush.bf16.msra.mxu2 %v3704_v26  ;;  %v3879_v26 = vld [vmem:[%s7169_s2 + $0xb4] sm:$0xf0] }
 0x178   :  { %v3692_v5 = vmul.f32 -1.442695, %v700_v45 }
 0x17a   :  { %v4749_v13 = vpop.eup %4748  ;;  %4750 = vpow2.f32 %v3692_v5 }
 0x17b   :  { %v684_v18 = vadd.f32 1.0, %v4749_v13  ;;  %v665_v21 = vpop.f32.mrf.mxu2 }
 0x17c   :  { %v678_v28 = vpop.f32.mrf.mxu3  ;;  %v4589_v21 = vld [vmem:[%s7169_s2 + $0xac] sm:$0xf] }
 0x17d   :  { %4752 = vrcp.f32 %v684_v18  ;;  %v696_v37 = vand.u32 2147483648, %v684_v18  ;;  %v694_v39 = vand.u32 2147483647, %v684_v18  ;;  %vm690_vm10 = vweird.f32 %v684_v18  ;;  %v3885_v28 = vld [vmem:[%s7169_s2 + $0xb0] sm:$0xf] }
 0x17f   :  { %v697_v44 = vor.u32 1.1754944e-38, %v696_v37  ;;  %vm695_vm12 = vcmp.eq.f32.partialorder %v694_v39, 8.507059e+37  ;;  %v4586_v37 = vld [vmem:[%s7169_s2 + $0x94] sm:$0xf]  ;;  %v3867_v39 = vld [vmem:[%s7169_s2 + $0x9c] sm:$0xf0] }
 0x180   :  { %v4751_v29 = vpop.eup %4750 }
 0x181   :  { %v704_v30 = vadd.f32 1.0, %v4751_v29  ;;  %v4591_v29 = vld [vmem:[%s7169_s2 + $0xb8] sm:$0xf0] }
 0x183   :  { %v4753_v34 = vpop.eup %4752  ;;  %4754 = vrcp.f32 %v704_v30  ;;  %v716_v53 = vand.u32 2147483648, %v704_v30  ;;  %v714_v5 = vand.u32 2147483647, %v704_v30  ;;  %vm710_vm14 = vweird.f32 %v704_v30 }
 0x184   :  { %v686_v35 = vmul.f32 %v4753_v34, %v684_v18  ;;  %vm691_vm9 = vweird.f32 %v4753_v34  ;;  %v4590_v18 = vld [vmem:[%s7169_s2 + $0xb0] sm:$0xf0] }
 0x185   :  { %vm692_vm11 = vmor %vm690_vm10, %vm691_vm9  ;;  %v717_v7 = vor.u32 1.1754944e-38, %v716_v53  ;;  %vm715_vm0 = vcmp.eq.f32.partialorder %v714_v5, 8.507059e+37  ;;  %v3878_v22 = vor.u32 %v4590_v18, %v3877_v17  ;;  %v4585_v53 = vld [vmem:[%s7169_s2 + $0x88] sm:$0xf0]  ;;  %v152_v18 = vadd.f32 %v5375_v59, %v5289_v32  ;;  %v3831_v59 = vld [vmem:[%s7169_s2 + $0x54] sm:$0xf0] }
 0x186   :  { %v687_v36 = vsub.f32 1.0, %v686_v35  ;;  %v3865_v35 = vld [vmem:[%s7169_s2 + $0x90] sm:$0xf] }
 0x187   :  { %1143 = vmatpush.bf16.msrb.mxu3 %v3878_v22 }
 0x188   :  { %v688_v6 = vmul.f32 %v4753_v34, %v687_v36  ;;  %v4587_v36 = vld [vmem:[%s7169_s2 + $0x98] sm:$0xf0] }
 0x189   :  { %v4755_v42 = vpop.eup %4754 }
 0x18a   :  { %v706_v43 = vmul.f32 %v4755_v42, %v704_v30  ;;  %v689_v31 = vadd.f32 %v4753_v34, %v688_v6  ;;  %vm711_vm13 = vweird.f32 %v4755_v42  ;;  %v3882_v30 = vor.u32 %v4589_v21, %v3879_v26  ;;  %v3829_v26 = vld [vmem:[%s7169_s2 + $0x48] sm:$0xf] }
 0x18b   :  { %vm712_vm15 = vmor %vm710_vm14, %vm711_vm13  ;;  %v3866_v6 = vor.u32 %v4587_v36, %v3865_v35  ;;  %v4579_v35 = vld [vmem:[%s7169_s2 + $0x58] sm:$0xf0] }
 0x18c   :  { %v707_v45 = vsub.f32 1.0, %v706_v43  ;;  %v693_v56 = vsel %vm692_vm11, %v4753_v34, %v689_v31  ;;  %v3886_v34 = vor.u32 %v4591_v29, %v3885_v28  ;;  %1156 = vmatpush.bf16.msrb.mxu0 %v3882_v30  ;;  %v4588_v43 = vld [vmem:[%s7169_s2 + $0xa0] sm:$0xf0]  ;;  %v3870_v31 = vor.u32 %v4586_v37, %v3867_v39  ;;  %v4578_v28 = vld [vmem:[%s7169_s2 + $0x50] sm:$0xf0] }
 0x18d   :  { %v698_v51 = vsel %vm695_vm12, %v697_v44, %v693_v56  ;;  %1144 = vmatpush.bf16.msrb.mxu3 %v3866_v6  ;;  %v4583_v56 = vld [vmem:[%s7169_s2 + $0x7c] sm:$0xf]  ;;  %v4577_v29 = vld [vmem:[%s7169_s2 + $0x4c] sm:$0xf]  ;;  %v3830_v30 = vor.u32 %v4578_v28, %v3829_v26  ;;  %v3795_v26 = vld [vmem:[%s7169_s2 + $0xc] sm:$0xf0] }
 0x18e   :  { %v708_v52 = vmul.f32 %v4755_v42, %v707_v45  ;;  %v720_v55 = vmul.f32 %v698_v51, %v677_v24  ;;  %1169 = vmatpush.bf16.msrb.mxu1 %v3886_v34  ;;  %v3853_v45 = vld [vmem:[%s7169_s2 + $0x78] sm:$0xf]  ;;  %v4584_v24 = vld [vmem:[%s7169_s2 + $0x80] sm:$0xf0]  ;;  %v3855_v51 = vld [vmem:[%s7169_s2 + $0x84] sm:$0xf0]  ;;  %v3834_v6 = vor.u32 %v4577_v29, %v3831_v59 }
 0x18f   :  { %v3837_v34 = vld [vmem:[%s7169_s2 + $0x50] sm:$0xf]  ;;  %v3801_v28 = vld [vmem:[%s7169_s2 + $0x8] sm:$0xf]  ;;  %v4570_v29 = vld [vmem:[%s7169_s2 + $0x10] sm:$0xf0] }
 0x190   :  { %v709_v9 = vadd.f32 %v4755_v42, %v708_v52  ;;  %v721_v10 = vadd.f32 %v720_v55, %v178_v48  ;;  %1157 = vmatpush.bf16.msrb.mxu0 %v3870_v31  ;;  %v3854_v48 = vor.u32 %v4584_v24, %v3853_v45  ;;  %v3861_v52 = vld [vmem:[%s7169_s2 + $0x80] sm:$0xf]  ;;  %v3858_v55 = vor.u32 %v4583_v56, %v3855_v51  ;;  %v3817_v31 = vld [vmem:[%s7169_s2 + $0x30] sm:$0xf]  ;;  %v3825_v51 = vld [vmem:[%s7169_s2 + $0x38] sm:$0xf] }
 0x191   :  { %v3862_v5 = vor.u32 %v4585_v53, %v3861_v52  ;;  %v3838_v39 = vor.u32 %v4579_v35, %v3837_v34  ;;  %v3819_v45 = vld [vmem:[%s7169_s2 + $0x3c] sm:$0xf0]  ;;  %v4576_v52 = vld [vmem:[%s7169_s2 + $0x40] sm:$0xf0]  ;;  %v3802_v35 = vor.u32 %v4570_v29, %v3801_v28  ;;  %v4613_v28 = vld [vmem:[%s7169_s2 + $0xac] sm:$0xf] }
 0x192   :  { %v713_v11 = vsel %vm712_vm15, %v4755_v42, %v709_v9  ;;  %4756 = vtanh.f32 %v721_v10  ;;  %v3873_v42 = vld [vmem:[%s7169_s2 + $0x98] sm:$0xf]  ;;  %1145 = vmatpush.bf16.msrb.mxu3 %v3854_v48  ;;  %v3841_v9 = vld [vmem:[%s7169_s2 + $0x60] sm:$0xf]  ;;  %v4581_v10 = vld [vmem:[%s7169_s2 + $0x68] sm:$0xf0] }
 0x193   :  { %v718_v41 = vsel %vm715_vm0, %v717_v7, %v713_v11  ;;  %v3874_v44 = vor.u32 %v4588_v43, %v3873_v42  ;;  %v4580_v7 = vld [vmem:[%s7169_s2 + $0x64] sm:$0xf]  ;;  %v3842_v11 = vor.u32 %v4581_v10, %v3841_v9  ;;  %v3805_v9 = vld [vmem:[%s7169_s2 + $0x18] sm:$0xf] }
 0x194   :  { %v723_v12 = vsub.f32 1.0, %v718_v41  ;;  %v725_v57 = vmul.f32 %v718_v41, %v5367_v54  ;;  %1158 = vmatpush.bf16.msrb.mxu0 %v3858_v55  ;;  %v3843_v41 = vld [vmem:[%s7169_s2 + $0x6c] sm:$0xf0]  ;;  %v4572_v10 = vld [vmem:[%s7169_s2 + $0x20] sm:$0xf0] }
 0x195   :  { %1170 = vmatpush.bf16.msrb.mxu1 %v3874_v44  ;;  %v4575_v44 = vld [vmem:[%s7169_s2 + $0x38] sm:$0xf0] }
 0x196   :  { %1146 = vmatpush.bf16.msrb.mxu3 %v3842_v11  ;;  %v3818_v56 = vor.u32 %v4575_v44, %v3817_v31  ;;  %v3806_v11 = vor.u32 %v4572_v10, %v3805_v9  ;;  %v181_v10 = vadd.f32 %v5377_v60, %v5364_v33 }
 0x198   :  { %v4757_v13 = vpop.eup %4756 }
 0x199   :  { %v724_v14 = vmul.f32 %v4757_v13, %v723_v12  ;;  %1171 = vmatpush.bf16.msrb.mxu1 %v3862_v5  ;;  %v3849_v12 = vld [vmem:[%s7169_s2 + $0x68] sm:$0xf]  ;;  %v4582_v13 = vld [vmem:[%s7169_s2 + $0x70] sm:$0xf0]  ;;  %v3826_v5 = vor.u32 %v4576_v52, %v3825_v51 }
 0x19a   :  { %1147 = vmatpush.bf16.msrb.mxu3 %v3830_v30 }
 0x19b   :  { %v5553_v23 = vadd.f32 %v725_v57, %v724_v14  ;;  %v3846_v14 = vor.u32 %v4580_v7, %v3843_v41  ;;  %v3850_v57 = vor.u32 %v4582_v13, %v3849_v12  ;;  %v4571_v7 = vld [vmem:[%s7169_s2 + $0x1c] sm:$0xf]  ;;  %v3807_v41 = vld [vmem:[%s7169_s2 + $0x24] sm:$0xf0]  ;;  %v3813_v12 = vld [vmem:[%s7169_s2 + $0x20] sm:$0xf] }
 0x19c   :  { %v4573_v13 = vld [vmem:[%s7169_s2 + $0x28] sm:$0xf0] }
 0x19d   :  { %v731_v15 = vpack.c.bf16 %v5553_v23, %v5553_v23  ;;  %1159 = vmatpush.bf16.msrb.mxu0 %v3846_v14  ;;  %1172 = vmatpush.bf16.msrb.mxu1 %v3850_v57  ;;  %v3810_v14 = vor.u32 %v4571_v7, %v3807_v41  ;;  %v3814_v57 = vor.u32 %v4573_v13, %v3813_v12 }
 0x19e   :  { %1148 = vmatpush.bf16.msrb.mxu3 %v3818_v56 }
 0x19f   :  { %900 = vmatmul.bf16.vlgmr.msra.gmra.mxu0 %v731_v15  ;;  %913 = vmatmul.bf16.vlgmr.msra.gmra.mxu1 %v731_v15 }
 0x1a0   :  { %926 = vmatmul.bf16.vlgmr.msra.gmra.mxu2 %v731_v15 }
 0x1a1   :  { %1160 = vmatpush.bf16.msrb.mxu0 %v3834_v6  ;;  %1173 = vmatpush.bf16.msrb.mxu1 %v3838_v39 }
 0x1a2   :  { %1149 = vmatpush.bf16.msrb.mxu3 %v3806_v11 }
 0x1a5   :  { %1174 = vmatpush.bf16.msrb.mxu1 %v3826_v5 }
 0x1a9   :  { %1175 = vmatpush.bf16.msrb.mxu1 %v3814_v57 }
 0x1ad   :  { %1176 = vmatpush.bf16.msrb.mxu1 %v3802_v35 }
 0x21c   :  { %v901_v15 = vpop.f32.mrf.mxu0  ;;  %v914_v17 = vpop.f32.mrf.mxu1 }
 0x21d   :  { %v902_v21 = vadd.f32 %v901_v15, %v5215_v49  ;;  %v915_v22 = vadd.f32 %v914_v17, %v5304_v38  ;;  %v3793_v15 = vld [vmem:[%s7169_s2] sm:$0xf]  ;;  %v4569_v17 = vld [vmem:[%s7169_s2 + $0x8] sm:$0xf0] }
 0x21f   :  { %v931_v36 = vadd.f32 %v902_v21, %v5169_v27  ;;  %v951_v37 = vadd.f32 %v915_v22, %v152_v18  ;;  %v4574_v27 = vld [vmem:[%s7169_s2 + $0x34] sm:$0xf]  ;;  %v4568_v18 = vld [vmem:[%s7169_s2 + $0x4] sm:$0xf]  ;;  %v3794_v22 = vor.u32 %v4569_v17, %v3793_v15 }
 0x220   :  { %v3822_v48 = vor.u32 %v4574_v27, %v3819_v45  ;;  %v3798_v34 = vor.u32 %v4568_v18, %v3795_v26  ;;  %v4614_v26 = vld [vmem:[%s7169_s2 + $0xb0] sm:$0xf0] }
 0x221   :  { %v3789_v42 = vmul.f32 -1.442695, %v931_v36  ;;  %v3790_v43 = vmul.f32 -1.442695, %v951_v37  ;;  %1150 = vmatpush.bf16.msrb.mxu3 %v3794_v22  ;;  %v3975_v22 = vld [vmem:[%s7169_s2 + $0xa8] sm:$0xf] }
 0x222   :  { %1161 = vmatpush.bf16.msrb.mxu0 %v3822_v48  ;;  %v3976_v29 = vor.u32 %v4614_v26, %v3975_v22 }
 0x223   :  { %4758 = vpow2.f32 %v3789_v42  ;;  %v927_v24 = vpop.f32.mrf.mxu2 }
 0x224   :  { %4760 = vpow2.f32 %v3790_v43  ;;  %v903_v53 = vpop.f32.mrf.mxu0  ;;  %v916_v55 = vpop.f32.mrf.mxu1  ;;  %1394 = vmatpush.bf16.msrb.mxu2 %v3976_v29  ;;  %v125_v29 = vadd.f32 %v5195_v40, %v5166_v25  ;;  %v3929_v40 = vld [vmem:[%s7169_s2 + $0x54] sm:$0xf0] }
 0x225   :  { %v928_v53 = vadd.f32 %v927_v24, %v5357_v19 }
 0x226   :  { %1162 = vmatpush.bf16.msrb.mxu0 %v3810_v14 }
 0x229   :  { %v4759_v21 = vpop.eup %4758 }
 0x22a   :  { %v4761_v30 = vpop.eup %4760  ;;  %v935_v59 = vadd.f32 1.0, %v4759_v21  ;;  %1163 = vmatpush.bf16.msrb.mxu0 %v3798_v34  ;;  %v4615_v34 = vld [vmem:[%s7169_s2 + $0xb8] sm:$0xf0] }
 0x22b   :  { %v955_v36 = vadd.f32 1.0, %v4761_v30  ;;  %v929_v37 = vpop.f32.mrf.mxu2  ;;  %v3977_v30 = vld [vmem:[%s7169_s2 + $0xb4] sm:$0xf0] }
 0x22c   :  { %4762 = vrcp.f32 %v935_v59  ;;  %v947_v27 = vand.u32 2147483648, %v935_v59  ;;  %v945_v56 = vand.u32 2147483647, %v935_v59  ;;  %vm941_vm2 = vweird.f32 %v935_v59  ;;  %v3963_v37 = vld [vmem:[%s7169_s2 + $0x90] sm:$0xf] }
 0x22d   :  { %4764 = vrcp.f32 %v955_v36  ;;  %v967_v7 = vand.u32 2147483648, %v955_v36  ;;  %vm961_vm6 = vweird.f32 %v955_v36  ;;  %v965_v41 = vand.u32 2147483647, %v955_v36 }
 0x22e   :  { %v948_v52 = vor.u32 1.1754944e-38, %v947_v27  ;;  %vm946_vm4 = vcmp.eq.f32.partialorder %v945_v56, 8.507059e+37  ;;  %v3980_v35 = vor.u32 %v4613_v28, %v3977_v30  ;;  %v3951_v56 = vld [vmem:[%s7169_s2 + $0x78] sm:$0xf] }
 0x22f   :  { %v968_v14 = vor.u32 1.1754944e-38, %v967_v7  ;;  %vm966_vm8 = vcmp.eq.f32.partialorder %v965_v41, 8.507059e+37 }
 0x230   :  { %1407 = vmatpush.bf16.msra.mxu3 %v3980_v35  ;;  %v4601_v35 = vld [vmem:[%s7169_s2 + $0x4c] sm:$0xf] }
 0x232   :  { %v4763_v6 = vpop.eup %4762 }
 0x233   :  { %v4765_v39 = vpop.eup %4764  ;;  %v937_v42 = vmul.f32 %v4763_v6, %v935_v59  ;;  %vm942_vm1 = vweird.f32 %v4763_v6  ;;  %v3983_v59 = vld [vmem:[%s7169_s2 + $0xb0] sm:$0xf] }
 0x234   :  { %v957_v43 = vmul.f32 %v4765_v39, %v955_v36  ;;  %vm943_vm3 = vmor %vm941_vm2, %vm942_vm1  ;;  %vm962_vm5 = vweird.f32 %v4765_v39  ;;  %v3984_v36 = vor.u32 %v4615_v34, %v3983_v59  ;;  %v3927_v59 = vld [vmem:[%s7169_s2 + $0x48] sm:$0xf]  ;;  %v4602_v34 = vld [vmem:[%s7169_s2 + $0x50] sm:$0xf0] }
 0x235   :  { %v938_v31 = vsub.f32 1.0, %v937_v42  ;;  %vm963_vm7 = vmor %vm961_vm6, %vm962_vm5 }
 0x236   :  { %v958_v44 = vsub.f32 1.0, %v957_v43  ;;  %1420 = vmatpush.bf16.msra.mxu0 %v3984_v36  ;;  %v3965_v43 = vld [vmem:[%s7169_s2 + $0x9c] sm:$0xf0] }
 0x237   :  { %v939_v45 = vmul.f32 %v4763_v6, %v938_v31  ;;  %v3971_v31 = vld [vmem:[%s7169_s2 + $0x98] sm:$0xf] }
 0x238   :  { %v959_v48 = vmul.f32 %v4765_v39, %v958_v44  ;;  %v4612_v44 = vld [vmem:[%s7169_s2 + $0xa0] sm:$0xf0] }
 0x239   :  { %v940_v51 = vadd.f32 %v4763_v6, %v939_v45  ;;  %v3972_v45 = vor.u32 %v4612_v44, %v3971_v31  ;;  %v3932_v31 = vor.u32 %v4601_v35, %v3929_v40 }
 0x23a   :  { %v960_v9 = vadd.f32 %v4765_v39, %v959_v48  ;;  %v4608_v48 = vld [vmem:[%s7169_s2 + $0x80] sm:$0xf0] }
 0x23b   :  { %v944_v55 = vsel %vm943_vm3, %v4763_v6, %v940_v51  ;;  %v4611_v6 = vld [vmem:[%s7169_s2 + $0x98] sm:$0xf0]  ;;  %1421 = vmatpush.bf16.msra.mxu0 %v3972_v45 }
 0x23c   :  { %v949_v5 = vsel %vm946_vm4, %v948_v52, %v944_v55  ;;  %v964_v13 = vsel %vm963_vm7, %v4765_v39, %v960_v9  ;;  %v4610_v39 = vld [vmem:[%s7169_s2 + $0x94] sm:$0xf]  ;;  %v3964_v42 = vor.u32 %v4611_v6, %v3963_v37  ;;  %v4607_v51 = vld [vmem:[%s7169_s2 + $0x7c] sm:$0xf]  ;;  %v3953_v55 = vld [vmem:[%s7169_s2 + $0x84] sm:$0xf0]  ;;  %v3928_v37 = vor.u32 %v4602_v34, %v3927_v59 }
 0x23d   :  { %v971_v11 = vmul.f32 %v949_v5, %v928_v53  ;;  %v969_v57 = vsel %vm966_vm8, %v968_v14, %v964_v13  ;;  %v3968_v27 = vor.u32 %v4610_v39, %v3965_v43  ;;  %v3952_v53 = vor.u32 %v4608_v48, %v3951_v56  ;;  %v3959_v5 = vld [vmem:[%s7169_s2 + $0x80] sm:$0xf]  ;;  %v4609_v9 = vld [vmem:[%s7169_s2 + $0x88] sm:$0xf0]  ;;  %v3935_v6 = vld [vmem:[%s7169_s2 + $0x50] sm:$0xf] }
 0x23e   :  { %v974_v24 = vsub.f32 1.0, %v969_v57  ;;  %v976_v18 = vmul.f32 %v969_v57, %v5553_v23  ;;  %1395 = vmatpush.bf16.msrb.mxu2 %v3964_v42  ;;  %v3956_v41 = vor.u32 %v4607_v51, %v3953_v55  ;;  %v3939_v14 = vld [vmem:[%s7169_s2 + $0x60] sm:$0xf]  ;;  %v4605_v57 = vld [vmem:[%s7169_s2 + $0x68] sm:$0xf0] }
 0x23f   :  { %v972_v12 = vadd.f32 %v971_v11, %v181_v10  ;;  %1408 = vmatpush.bf16.msra.mxu3 %v3968_v27  ;;  %v154_v10 = vadd.f32 %v5379_v61, %v5289_v32  ;;  %v4604_v61 = vld [vmem:[%s7169_s2 + $0x64] sm:$0xf]  ;;  %v4603_v39 = vld [vmem:[%s7169_s2 + $0x58] sm:$0xf0]  ;;  %v3915_v27 = vld [vmem:[%s7169_s2 + $0x30] sm:$0xf] }
 0x240   :  { %v3936_v44 = vor.u32 %v4603_v39, %v3935_v6  ;;  %v4599_v45 = vld [vmem:[%s7169_s2 + $0x38] sm:$0xf0]  ;;  %v4598_v56 = vld [vmem:[%s7169_s2 + $0x34] sm:$0xf]  ;;  %v3917_v51 = vld [vmem:[%s7169_s2 + $0x3c] sm:$0xf0] }
 0x241   :  { %4766 = vtanh.f32 %v972_v12  ;;  %v3960_v12 = vor.u32 %v4609_v9, %v3959_v5  ;;  %v3916_v48 = vor.u32 %v4599_v45, %v3915_v27  ;;  %v3920_v5 = vor.u32 %v4598_v56, %v3917_v51 }
 0x242   :  { %1396 = vmatpush.bf16.msrb.mxu2 %v3952_v53  ;;  %v4600_v53 = vld [vmem:[%s7169_s2 + $0x40] sm:$0xf0] }
 0x243   :  { %1409 = vmatpush.bf16.msra.mxu3 %v3956_v41  ;;  %1422 = vmatpush.bf16.msra.mxu0 %v3960_v12  ;;  %v4595_v41 = vld [vmem:[%s7169_s2 + $0x1c] sm:$0xf]  ;;  %v3905_v12 = vld [vmem:[%s7169_s2 + $0x24] sm:$0xf0] }
 0x247   :  { %v4767_v15 = vpop.eup %4766 }
 0x248   :  { %v975_v17 = vmul.f32 %v4767_v15, %v974_v24  ;;  %v3940_v24 = vor.u32 %v4605_v57, %v3939_v14  ;;  %v3941_v15 = vld [vmem:[%s7169_s2 + $0x6c] sm:$0xf0]  ;;  %v4597_v57 = vld [vmem:[%s7169_s2 + $0x28] sm:$0xf0] }
 0x249   :  { %v3944_v22 = vor.u32 %v4604_v61, %v3941_v15 }
 0x24a   :  { %v5710_v21 = vadd.f32 %v976_v18, %v975_v17  ;;  %v3947_v17 = vld [vmem:[%s7169_s2 + $0x68] sm:$0xf]  ;;  %v4606_v18 = vld [vmem:[%s7169_s2 + $0x70] sm:$0xf0]  ;;  %1397 = vmatpush.bf16.msrb.mxu2 %v3940_v24 }
 0x24b   :  { %v3948_v26 = vor.u32 %v4606_v18, %v3947_v17  ;;  %1410 = vmatpush.bf16.msra.mxu3 %v3944_v22  ;;  %v3908_v17 = vor.u32 %v4595_v41, %v3905_v12  ;;  %v4593_v22 = vld [vmem:[%s7169_s2 + $0x8] sm:$0xf0] }
 0x24c   :  { %v982_v60 = vpack.c.bf16 %v5710_v21, %v5710_v21 }
 0x24d   :  { %1423 = vmatpush.bf16.msra.mxu0 %v3948_v26  ;;  %v4592_v26 = vld [vmem:[%s7169_s2 + $0x4] sm:$0xf] }
 0x24e   :  { %1151 = vmatmul.bf16.vlgmr.msrb.gmra.mxu3 %v982_v60  ;;  %1164 = vmatmul.bf16.vlgmr.msrb.gmra.mxu0 %v982_v60 }
 0x24f   :  { %1177 = vmatmul.bf16.vlgmr.msrb.gmra.mxu1 %v982_v60  ;;  %1398 = vmatpush.bf16.msrb.mxu2 %v3928_v37 }
 0x250   :  { %1411 = vmatpush.bf16.msra.mxu3 %v3932_v31 }
 0x251   :  { %1424 = vmatpush.bf16.msra.mxu0 %v3936_v44 }
 0x253   :  { %1399 = vmatpush.bf16.msrb.mxu2 %v3916_v48 }
 0x254   :  { %1412 = vmatpush.bf16.msra.mxu3 %v3920_v5 }
 0x258   :  { %1413 = vmatpush.bf16.msra.mxu3 %v3908_v17 }
 0x2cb   :  { %v1165_v52 = vpop.f32.mrf.mxu0 }
 0x2cc   :  { %v1166_v7 = vadd.f32 %v1165_v52, %v5304_v38  ;;  %v5771_v11 = vpop.f32.mrf.mxu1  ;;  %v3923_v52 = vld [vmem:[%s7169_s2 + $0x38] sm:$0xf] }
 0x2cd   :  { %v3924_v9 = vor.u32 %v4600_v53, %v3923_v52  ;;  %v1179_v52 = vadd.f32 %v5771_v11, %v5357_v19 }
 0x2ce   :  { %v1202_v13 = vadd.f32 %v1166_v7, %v154_v10  ;;  %v3903_v10 = vld [vmem:[%s7169_s2 + $0x18] sm:$0xf]  ;;  %v4596_v7 = vld [vmem:[%s7169_s2 + $0x20] sm:$0xf0] }
 0x2cf   :  { %v3904_v15 = vor.u32 %v4596_v7, %v3903_v10  ;;  %1425 = vmatpush.bf16.msra.mxu0 %v3924_v9  ;;  %v183_v9 = vadd.f32 %v5381_v62, %v5364_v33 }
 0x2d0   :  { %v3888_v60 = vmul.f32 -1.442695, %v1202_v13  ;;  %v3911_v13 = vld [vmem:[%s7169_s2 + $0x20] sm:$0xf] }
 0x2d1   :  { %v1152_v28 = vpop.f32.mrf.mxu3  ;;  %v3912_v18 = vor.u32 %v4597_v57, %v3911_v13  ;;  %1400 = vmatpush.bf16.msrb.mxu2 %v3904_v15 }
 0x2d2   :  { %4768 = vpow2.f32 %v3888_v60  ;;  %v1153_v30 = vadd.f32 %v1152_v28, %v5215_v49  ;;  %v3891_v60 = vld [vmem:[%s7169_s2] sm:$0xf]  ;;  %v3893_v28 = vld [vmem:[%s7169_s2 + $0xc] sm:$0xf0] }
 0x2d3   :  { %v1167_v36 = vpop.f32.mrf.mxu0  ;;  %v3892_v59 = vor.u32 %v4593_v22, %v3891_v60  ;;  %1426 = vmatpush.bf16.msra.mxu0 %v3912_v18  ;;  %v3896_v35 = vor.u32 %v4592_v26, %v3893_v28  ;;  %v4638_v60 = vld [vmem:[%s7169_s2 + $0xb0] sm:$0xf0]  ;;  %v4637_v22 = vld [vmem:[%s7169_s2 + $0xac] sm:$0xf]  ;;  %v4075_v28 = vld [vmem:[%s7169_s2 + $0xb4] sm:$0xf0] }
 0x2d4   :  { %v1182_v42 = vadd.f32 %v1153_v30, %v125_v29  ;;  %v1180_v43 = vpop.f32.mrf.mxu1  ;;  %v3899_v29 = vld [vmem:[%s7169_s2 + $0x8] sm:$0xf]  ;;  %v4594_v30 = vld [vmem:[%s7169_s2 + $0x10] sm:$0xf0] }
 0x2d5   :  { %v3900_v36 = vor.u32 %v4594_v30, %v3899_v29  ;;  %1401 = vmatpush.bf16.msrb.mxu2 %v3892_v59  ;;  %1414 = vmatpush.bf16.msra.mxu3 %v3896_v35  ;;  %v4081_v29 = vld [vmem:[%s7169_s2 + $0xb0] sm:$0xf]  ;;  %v4639_v30 = vld [vmem:[%s7169_s2 + $0xb8] sm:$0xf0]  ;;  %v4078_v59 = vor.u32 %v4637_v22, %v4075_v28  ;;  %v4626_v22 = vld [vmem:[%s7169_s2 + $0x50] sm:$0xf0] }
 0x2d6   :  { %v3887_v55 = vmul.f32 -1.442695, %v1182_v42  ;;  %v4061_v35 = vld [vmem:[%s7169_s2 + $0x90] sm:$0xf] }
 0x2d7   :  { %1427 = vmatpush.bf16.msra.mxu0 %v3900_v36  ;;  %v4635_v36 = vld [vmem:[%s7169_s2 + $0x98] sm:$0xf0] }
 0x2d8   :  { %v4769_v14 = vpop.eup %4768  ;;  %4770 = vpow2.f32 %v3887_v55 }
 0x2d9   :  { %v1206_v61 = vadd.f32 1.0, %v4769_v14  ;;  %v1154_v24 = vpop.f32.mrf.mxu3  ;;  %1658 = vmatpush.bf16.msra.mxu2 %v4078_v59 }
 0x2db   :  { %4772 = vrcp.f32 %v1206_v61  ;;  %v1218_v10 = vand.u32 2147483648, %v1206_v61  ;;  %vm1212_vm14 = vweird.f32 %v1206_v61  ;;  %v1216_v41 = vand.u32 2147483647, %v1206_v61 }
 0x2dd   :  { %v1219_v14 = vor.u32 1.1754944e-38, %v1218_v10  ;;  %vm1217_vm0 = vcmp.eq.f32.partialorder %v1216_v41, 8.507059e+37  ;;  %v4629_v10 = vld [vmem:[%s7169_s2 + $0x68] sm:$0xf0] }
 0x2de   :  { %v4771_v34 = vpop.eup %4770 }
 0x2df   :  { %v1186_v37 = vadd.f32 1.0, %v4771_v34  ;;  %v4082_v34 = vor.u32 %v4639_v30, %v4081_v29  ;;  %v4033_v29 = vld [vmem:[%s7169_s2 + $0x50] sm:$0xf]  ;;  %v4627_v30 = vld [vmem:[%s7169_s2 + $0x58] sm:$0xf0] }
 0x2e1   :  { %4774 = vrcp.f32 %v1186_v37  ;;  %v4773_v40 = vpop.eup %4772  ;;  %v1198_v44 = vand.u32 2147483648, %v1186_v37  ;;  %v1196_v45 = vand.u32 2147483647, %v1186_v37  ;;  %vm1192_vm10 = vweird.f32 %v1186_v37  ;;  %1671 = vmatpush.bf16.msrb.mxu3 %v4082_v34 }
 0x2e2   :  { %v1208_v6 = vmul.f32 %v4773_v40, %v1206_v61  ;;  %vm1213_vm13 = vweird.f32 %v4773_v40  ;;  %v4073_v61 = vld [vmem:[%s7169_s2 + $0xa8] sm:$0xf] }
 0x2e3   :  { %v1199_v51 = vor.u32 1.1754944e-38, %v1198_v44  ;;  %vm1197_vm12 = vcmp.eq.f32.partialorder %v1196_v45, 8.507059e+37  ;;  %vm1214_vm15 = vmor %vm1212_vm14, %vm1213_vm13  ;;  %v4074_v26 = vor.u32 %v4638_v60, %v4073_v61  ;;  %v4049_v44 = vld [vmem:[%s7169_s2 + $0x78] sm:$0xf]  ;;  %v4631_v45 = vld [vmem:[%s7169_s2 + $0x7c] sm:$0xf] }
 0x2e4   :  { %v1209_v43 = vsub.f32 1.0, %v1208_v6  ;;  %v4063_v6 = vld [vmem:[%s7169_s2 + $0x9c] sm:$0xf0]  ;;  %v4025_v60 = vld [vmem:[%s7169_s2 + $0x48] sm:$0xf] }
 0x2e5   :  { %1645 = vmatpush.bf16.msra.mxu1 %v4074_v26  ;;  %v4625_v26 = vld [vmem:[%s7169_s2 + $0x4c] sm:$0xf]  ;;  %v4026_v28 = vor.u32 %v4626_v22, %v4025_v60 }
 0x2e6   :  { %v1210_v56 = vmul.f32 %v4773_v40, %v1209_v43 }
 0x2e7   :  { %v4775_v39 = vpop.eup %4774 }
 0x2e8   :  { %v1188_v42 = vmul.f32 %v4775_v39, %v1186_v37  ;;  %vm1193_vm9 = vweird.f32 %v4775_v39  ;;  %v1211_v5 = vadd.f32 %v4773_v40, %v1210_v56  ;;  %v4634_v37 = vld [vmem:[%s7169_s2 + $0x94] sm:$0xf] }
 0x2e9   :  { %vm1194_vm11 = vmor %vm1192_vm10, %vm1193_vm9  ;;  %v4066_v43 = vor.u32 %v4634_v37, %v4063_v6  ;;  %v4034_v37 = vor.u32 %v4627_v30, %v4033_v29  ;;  %v4623_v6 = vld [vmem:[%s7169_s2 + $0x38] sm:$0xf0] }
 0x2ea   :  { %v1189_v31 = vsub.f32 1.0, %v1188_v42  ;;  %v1215_v13 = vsel %vm1214_vm15, %v4773_v40, %v1211_v5  ;;  %v4062_v40 = vor.u32 %v4635_v36, %v4061_v35  ;;  %v4636_v42 = vld [vmem:[%s7169_s2 + $0xa0] sm:$0xf0] }
 0x2eb   :  { %v1220_v57 = vsel %vm1217_vm0, %v1219_v14, %v1215_v13  ;;  %1659 = vmatpush.bf16.msra.mxu2 %v4066_v43  ;;  %v4045_v13 = vld [vmem:[%s7169_s2 + $0x68] sm:$0xf]  ;;  %v4630_v14 = vld [vmem:[%s7169_s2 + $0x70] sm:$0xf0]  ;;  %v4021_v43 = vld [vmem:[%s7169_s2 + $0x38] sm:$0xf] }
 0x2ec   :  { %v1190_v27 = vmul.f32 %v4775_v39, %v1189_v31  ;;  %v1225_v11 = vsub.f32 1.0, %v1220_v57  ;;  %v1227_v17 = vmul.f32 %v1220_v57, %v5710_v21  ;;  %1646 = vmatpush.bf16.msra.mxu1 %v4062_v40  ;;  %v4013_v40 = vld [vmem:[%s7169_s2 + $0x30] sm:$0xf] }
 0x2ee   :  { %v1191_v48 = vadd.f32 %v4775_v39, %v1190_v27  ;;  %v4632_v27 = vld [vmem:[%s7169_s2 + $0x80] sm:$0xf0] }
 0x2ef   :  { %v4050_v56 = vor.u32 %v4632_v27, %v4049_v44 }
 0x2f0   :  { %v1195_v53 = vsel %vm1194_vm11, %v4775_v39, %v1191_v48  ;;  %v4069_v39 = vld [vmem:[%s7169_s2 + $0x98] sm:$0xf]  ;;  %v4051_v48 = vld [vmem:[%s7169_s2 + $0x84] sm:$0xf0] }
 0x2f1   :  { %v1200_v55 = vsel %vm1197_vm12, %v1199_v51, %v1195_v53  ;;  %v4070_v31 = vor.u32 %v4636_v42, %v4069_v39  ;;  %v4057_v51 = vld [vmem:[%s7169_s2 + $0x80] sm:$0xf]  ;;  %1647 = vmatpush.bf16.msra.mxu1 %v4050_v56  ;;  %v4622_v39 = vld [vmem:[%s7169_s2 + $0x34] sm:$0xf]  ;;  %v4014_v42 = vor.u32 %v4623_v6, %v4013_v40 }
 0x2f2   :  { %v1222_v7 = vmul.f32 %v1200_v55, %v1179_v52  ;;  %v4633_v52 = vld [vmem:[%s7169_s2 + $0x88] sm:$0xf0]  ;;  %v4054_v55 = vor.u32 %v4631_v45, %v4051_v48  ;;  %v4001_v48 = vld [vmem:[%s7169_s2 + $0x18] sm:$0xf] }
 0x2f3   :  { %1672 = vmatpush.bf16.msrb.mxu3 %v4070_v31  ;;  %v4058_v5 = vor.u32 %v4633_v52, %v4057_v51  ;;  %v4624_v31 = vld [vmem:[%s7169_s2 + $0x40] sm:$0xf0]  ;;  %v4619_v52 = vld [vmem:[%s7169_s2 + $0x1c] sm:$0xf] }
 0x2f4   :  { %v1223_v12 = vadd.f32 %v1222_v7, %v183_v9  ;;  %1660 = vmatpush.bf16.msra.mxu2 %v4054_v55  ;;  %v4037_v9 = vld [vmem:[%s7169_s2 + $0x60] sm:$0xf]  ;;  %v4628_v7 = vld [vmem:[%s7169_s2 + $0x64] sm:$0xf]  ;;  %v4022_v56 = vor.u32 %v4624_v31, %v4021_v43  ;;  %v4003_v55 = vld [vmem:[%s7169_s2 + $0x24] sm:$0xf0] }
 0x2f5   :  { %v4038_v41 = vor.u32 %v4629_v10, %v4037_v9  ;;  %v4620_v51 = vld [vmem:[%s7169_s2 + $0x20] sm:$0xf0]  ;;  %v4621_v9 = vld [vmem:[%s7169_s2 + $0x28] sm:$0xf0] }
 0x2f6   :  { %4776 = vtanh.f32 %v1223_v12  ;;  %v4039_v12 = vld [vmem:[%s7169_s2 + $0x6c] sm:$0xf0] }
 0x2f7   :  { %1673 = vmatpush.bf16.msrb.mxu3 %v4058_v5  ;;  %v4042_v57 = vor.u32 %v4628_v7, %v4039_v12  ;;  %1648 = vmatpush.bf16.msra.mxu1 %v4038_v41  ;;  %v4009_v5 = vld [vmem:[%s7169_s2 + $0x20] sm:$0xf]  ;;  %v4002_v41 = vor.u32 %v4620_v51, %v4001_v48  ;;  %v4006_v12 = vor.u32 %v4619_v52, %v4003_v55 }
 0x2f9   :  { %1661 = vmatpush.bf16.msra.mxu2 %v4042_v57  ;;  %v4617_v57 = vld [vmem:[%s7169_s2 + $0x8] sm:$0xf0] }
 0x2fb   :  { %1649 = vmatpush.bf16.msra.mxu1 %v4026_v28 }
 0x2fc   :  { %v4777_v24 = vpop.eup %4776 }
 0x2fd   :  { %v1226_v15 = vmul.f32 %v4777_v24, %v1225_v11  ;;  %v4046_v11 = vor.u32 %v4630_v14, %v4045_v13  ;;  %v4010_v13 = vor.u32 %v4621_v9, %v4009_v5  ;;  %v3989_v14 = vld [vmem:[%s7169_s2] sm:$0xf] }
 0x2ff   :  { %v5871_v18 = vadd.f32 %v1227_v17, %v1226_v15  ;;  %v157_v17 = vadd.f32 %v5383_v63, %v5289_v32  ;;  %1674 = vmatpush.bf16.msrb.mxu3 %v4046_v11  ;;  %v4027_v63 = vld [vmem:[%s7169_s2 + $0x54] sm:$0xf0]  ;;  %1650 = vmatpush.bf16.msra.mxu1 %v4014_v42  ;;  %v4616_v11 = vld [vmem:[%s7169_s2 + $0x4] sm:$0xf] }
 0x300   :  { %v4030_v36 = vor.u32 %v4625_v26, %v4027_v63 }
 0x301   :  { %v1233_v62 = vpack.c.bf16 %v5871_v18, %v5871_v18 }
 0x302   :  { %1662 = vmatpush.bf16.msra.mxu2 %v4030_v36 }
 0x303   :  { %1402 = vmatmul.bf16.vlgmr.msrb.gmra.mxu2 %v1233_v62  ;;  %1415 = vmatmul.bf16.vlgmr.msra.gmra.mxu3 %v1233_v62 }
 0x304   :  { %1428 = vmatmul.bf16.vlgmr.msra.gmra.mxu0 %v1233_v62  ;;  %1675 = vmatpush.bf16.msrb.mxu3 %v4034_v37 }
 0x305   :  { %1651 = vmatpush.bf16.msra.mxu1 %v4002_v41 }
 0x308   :  { %1676 = vmatpush.bf16.msrb.mxu3 %v4022_v56 }
 0x30c   :  { %1677 = vmatpush.bf16.msrb.mxu3 %v4010_v13  ;;  %v4179_v13 = vld [vmem:[%s7169_s2 + $0xb0] sm:$0xf] }
 0x381   :  { %v5929_v53 = vpop.f32.mrf.mxu0 }
 0x382   :  { %v1430_v43 = vadd.f32 %v5929_v53, %v5357_v19 }
 0x386   :  { %v1403_v24 = vpop.f32.mrf.mxu2  ;;  %v1416_v15 = vpop.f32.mrf.mxu3 }
 0x387   :  { %v1404_v62 = vadd.f32 %v1403_v24, %v5215_v49  ;;  %v1417_v61 = vadd.f32 %v1416_v15, %v5304_v38  ;;  %v3991_v24 = vld [vmem:[%s7169_s2 + $0xc] sm:$0xf0]  ;;  %v3997_v15 = vld [vmem:[%s7169_s2 + $0x8] sm:$0xf] }
 0x388   :  { %v3994_v60 = vor.u32 %v4616_v11, %v3991_v24  ;;  %v4167_v11 = vld [vmem:[%s7169_s2 + $0x98] sm:$0xf]  ;;  %v4660_v24 = vld [vmem:[%s7169_s2 + $0xa0] sm:$0xf0] }
 0x389   :  { %v1433_v59 = vadd.f32 %v1404_v62, %v5218_v50  ;;  %v1453_v34 = vadd.f32 %v1417_v61, %v157_v17  ;;  %v1431_v35 = vpop.f32.mrf.mxu0  ;;  %v4015_v50 = vld [vmem:[%s7169_s2 + $0x3c] sm:$0xf0]  ;;  %v4618_v17 = vld [vmem:[%s7169_s2 + $0x10] sm:$0xf0]  ;;  %v3990_v62 = vor.u32 %v4617_v57, %v3989_v14  ;;  %v4663_v14 = vld [vmem:[%s7169_s2 + $0xb8] sm:$0xf0] }
 0x38a   :  { %v4018_v45 = vor.u32 %v4622_v39, %v4015_v50  ;;  %v3998_v22 = vor.u32 %v4618_v17, %v3997_v15  ;;  %v4180_v57 = vor.u32 %v4663_v14, %v4179_v13  ;;  %v4168_v15 = vor.u32 %v4660_v24, %v4167_v11  ;;  %v4155_v17 = vld [vmem:[%s7169_s2 + $0x80] sm:$0xf]  ;;  %v4137_v13 = vld [vmem:[%s7169_s2 + $0x6c] sm:$0xf0]  ;;  %v4095_v11 = vld [vmem:[%s7169_s2 + $0x8] sm:$0xf] }
 0x38b   :  { %v3985_v44 = vmul.f32 -1.442695, %v1433_v59  ;;  %v3986_v27 = vmul.f32 -1.442695, %v1453_v34  ;;  %1652 = vmatpush.bf16.msra.mxu1 %v3990_v62  ;;  %v4657_v62 = vld [vmem:[%s7169_s2 + $0x88] sm:$0xf0] }
 0x38c   :  { %1663 = vmatpush.bf16.msra.mxu2 %v4018_v45  ;;  %1678 = vmatpush.bf16.msrb.mxu3 %v3998_v22  ;;  %v186_v45 = vadd.f32 %v5385_v0, %v5364_v33  ;;  %v4654_v22 = vld [vmem:[%s7169_s2 + $0x70] sm:$0xf0] }
 0x38d   :  { %4778 = vpow2.f32 %v3985_v44  ;;  %v4642_v24 = vld [vmem:[%s7169_s2 + $0x10] sm:$0xf0] }
 0x38e   :  { %4780 = vpow2.f32 %v3986_v27  ;;  %v1405_v10 = vpop.f32.mrf.mxu2  ;;  %v1418_v7 = vpop.f32.mrf.mxu3 }
 0x390   :  { %1664 = vmatpush.bf16.msra.mxu2 %v4006_v12 }
 0x393   :  { %v4779_v61 = vpop.eup %4778 }
 0x394   :  { %v4781_v26 = vpop.eup %4780  ;;  %v1437_v28 = vadd.f32 1.0, %v4779_v61  ;;  %1665 = vmatpush.bf16.msra.mxu2 %v3994_v60  ;;  %v4156_v61 = vor.u32 %v4657_v62, %v4155_v17  ;;  %v4143_v60 = vld [vmem:[%s7169_s2 + $0x68] sm:$0xf]  ;;  %v4096_v62 = vor.u32 %v4642_v24, %v4095_v11  ;;  %v4089_v24 = vld [vmem:[%s7169_s2 + $0xc] sm:$0xf0] }
 0x395   :  { %v1457_v63 = vadd.f32 1.0, %v4781_v26  ;;  %v4144_v26 = vor.u32 %v4654_v22, %v4143_v60  ;;  %v4650_v60 = vld [vmem:[%s7169_s2 + $0x50] sm:$0xf0]  ;;  %v4649_v22 = vld [vmem:[%s7169_s2 + $0x4c] sm:$0xf] }
 0x396   :  { %4782 = vrcp.f32 %v1437_v28  ;;  %v1449_v36 = vand.u32 2147483648, %v1437_v28  ;;  %v1447_v6 = vand.u32 2147483647, %v1437_v28  ;;  %vm1443_vm2 = vweird.f32 %v1437_v28 }
 0x397   :  { %4784 = vrcp.f32 %v1457_v63  ;;  %v1469_v48 = vand.u32 2147483648, %v1457_v63  ;;  %vm1463_vm6 = vweird.f32 %v1457_v63  ;;  %v1467_v51 = vand.u32 2147483647, %v1457_v63 }
 0x398   :  { %v1450_v50 = vor.u32 1.1754944e-38, %v1449_v36  ;;  %vm1448_vm4 = vcmp.eq.f32.partialorder %v1447_v6, 8.507059e+37  ;;  %1922 = vmatpush.bf16.msrb.mxu2 %v4180_v57  ;;  %v4651_v36 = vld [vmem:[%s7169_s2 + $0x58] sm:$0xf0] }
 0x399   :  { %v1470_v5 = vor.u32 1.1754944e-38, %v1469_v48  ;;  %vm1468_vm8 = vcmp.eq.f32.partialorder %v1467_v51, 8.507059e+37  ;;  %v4659_v6 = vld [vmem:[%s7169_s2 + $0x98] sm:$0xf0] }
 0x39a   :  { %v4655_v48 = vld [vmem:[%s7169_s2 + $0x7c] sm:$0xf] }
 0x39c   :  { %v4783_v29 = vpop.eup %4782  ;;  %1923 = vmatpush.bf16.msrb.mxu2 %v4168_v15  ;;  %v130_v15 = vadd.f32 %v5228_v58, %v5166_v25  ;;  %v4125_v58 = vld [vmem:[%s7169_s2 + $0x54] sm:$0xf0] }
 0x39d   :  { %v4785_v30 = vpop.eup %4784  ;;  %v1439_v59 = vmul.f32 %v4783_v29, %v1437_v28  ;;  %vm1444_vm1 = vweird.f32 %v4783_v29  ;;  %v4171_v28 = vld [vmem:[%s7169_s2 + $0xa8] sm:$0xf] }
 0x39e   :  { %v1459_v34 = vmul.f32 %v4785_v30, %v1457_v63  ;;  %vm1445_vm3 = vmor %vm1443_vm2, %vm1444_vm1  ;;  %vm1464_vm5 = vweird.f32 %v4785_v30  ;;  %v4662_v63 = vld [vmem:[%s7169_s2 + $0xb0] sm:$0xf0] }
 0x39f   :  { %v1440_v35 = vsub.f32 1.0, %v1439_v59  ;;  %vm1465_vm7 = vmor %vm1463_vm6, %vm1464_vm5  ;;  %v4173_v59 = vld [vmem:[%s7169_s2 + $0xb4] sm:$0xf0] }
 0x3a0   :  { %v1460_v37 = vsub.f32 1.0, %v1459_v34  ;;  %1924 = vmatpush.bf16.msrb.mxu2 %v4156_v61  ;;  %v4123_v61 = vld [vmem:[%s7169_s2 + $0x48] sm:$0xf] }
 0x3a1   :  { %v1441_v40 = vmul.f32 %v4783_v29, %v1440_v35  ;;  %v4131_v35 = vld [vmem:[%s7169_s2 + $0x50] sm:$0xf] }
 0x3a2   :  { %v1461_v39 = vmul.f32 %v4785_v30, %v1460_v37  ;;  %v4132_v37 = vor.u32 %v4651_v36, %v4131_v35  ;;  %v4111_v35 = vld [vmem:[%s7169_s2 + $0x30] sm:$0xf]  ;;  %v4647_v36 = vld [vmem:[%s7169_s2 + $0x38] sm:$0xf0] }
 0x3a3   :  { %v1442_v42 = vadd.f32 %v4783_v29, %v1441_v40  ;;  %v4159_v40 = vld [vmem:[%s7169_s2 + $0x90] sm:$0xf] }
 0x3a4   :  { %v1462_v27 = vadd.f32 %v4785_v30, %v1461_v39  ;;  %1925 = vmatpush.bf16.msrb.mxu2 %v4144_v26  ;;  %v4658_v39 = vld [vmem:[%s7169_s2 + $0x94] sm:$0xf]  ;;  %v4124_v26 = vor.u32 %v4650_v60, %v4123_v61 }
 0x3a5   :  { %v1446_v31 = vsel %vm1445_vm3, %v4783_v29, %v1442_v42  ;;  %v4661_v29 = vld [vmem:[%s7169_s2 + $0xac] sm:$0xf]  ;;  %v4160_v42 = vor.u32 %v4659_v6, %v4159_v40  ;;  %v4112_v40 = vor.u32 %v4647_v36, %v4111_v35  ;;  %v4646_v6 = vld [vmem:[%s7169_s2 + $0x34] sm:$0xf] }
 0x3a6   :  { %v1451_v44 = vsel %vm1448_vm4, %v1450_v50, %v1446_v31  ;;  %v1466_v55 = vsel %vm1465_vm7, %v4785_v30, %v1462_v27  ;;  %v4172_v30 = vor.u32 %v4662_v63, %v4171_v28  ;;  %v4176_v34 = vor.u32 %v4661_v29, %v4173_v59  ;;  %v4161_v50 = vld [vmem:[%s7169_s2 + $0x9c] sm:$0xf0]  ;;  %v4119_v31 = vld [vmem:[%s7169_s2 + $0x38] sm:$0xf]  ;;  %v4367_v28 = vld [vmem:[%s7173_s5 + $0xa8] sm:$0xf] }
 0x3a7   :  { %v1473_v56 = vmul.f32 %v1451_v44, %v1430_v43  ;;  %v1471_v9 = vsel %vm1468_vm8, %v1470_v5, %v1466_v55  ;;  %v4164_v43 = vor.u32 %v4658_v39, %v4161_v50  ;;  %v4648_v44 = vld [vmem:[%s7169_s2 + $0x40] sm:$0xf0]  ;;  %v4107_v5 = vld [vmem:[%s7169_s2 + $0x20] sm:$0xf]  ;;  %v4710_v63 = vld [vmem:[%s7173_s5 + $0xb0] sm:$0xf0]  ;;  %v159_v50 = vadd.f32 %v5387_v1, %v5289_v32 }
 0x3a8   :  { %v1476_v53 = vsub.f32 1.0, %v1471_v9  ;;  %v1478_v41 = vmul.f32 %v1471_v9, %v5871_v18  ;;  %1896 = vmatpush.bf16.msrb.mxu0 %v4172_v30  ;;  %1909 = vmatpush.bf16.msrb.mxu1 %v4176_v34  ;;  %v4120_v27 = vor.u32 %v4648_v44, %v4119_v31  ;;  %v4645_v9 = vld [vmem:[%s7169_s2 + $0x28] sm:$0xf0]  ;;  %v4128_v30 = vor.u32 %v4649_v22, %v4125_v58  ;;  %v4113_v39 = vld [vmem:[%s7169_s2 + $0x3c] sm:$0xf0] }
 0x3a9   :  { %v1474_v52 = vadd.f32 %v1473_v56, %v186_v45  ;;  %1926 = vmatpush.bf16.msrb.mxu2 %v4132_v37  ;;  %v4147_v45 = vld [vmem:[%s7169_s2 + $0x78] sm:$0xf]  ;;  %v4656_v56 = vld [vmem:[%s7169_s2 + $0x80] sm:$0xf0]  ;;  %v4368_v59 = vor.u32 %v4710_v63, %v4367_v28  ;;  %v4116_v44 = vor.u32 %v4646_v6, %v4113_v39  ;;  %v4319_v58 = vld [vmem:[%s7173_s5 + $0x48] sm:$0xf] }
 0x3aa   :  { %v4148_v51 = vor.u32 %v4656_v56, %v4147_v45  ;;  %v4644_v1 = vld [vmem:[%s7169_s2 + $0x20] sm:$0xf0]  ;;  %v4698_v28 = vld [vmem:[%s7173_s5 + $0x50] sm:$0xf0] }
 0x3ab   :  { %4786 = vtanh.f32 %v1474_v52  ;;  %v4149_v52 = vld [vmem:[%s7169_s2 + $0x84] sm:$0xf0]  ;;  %v4320_v63 = vor.u32 %v4698_v28, %v4319_v58  ;;  %v4692_v6 = vld [vmem:[%s7173_s5 + $0x20] sm:$0xf0]  ;;  %v4687_v58 = vld [vmem:[%s7169_s2 + $0xb8] sm:$0xf0] }
 0x3ac   :  { %1897 = vmatpush.bf16.msrb.mxu0 %v4160_v42  ;;  %1910 = vmatpush.bf16.msrb.mxu1 %v4164_v43  ;;  %v4152_v55 = vor.u32 %v4655_v48, %v4149_v52  ;;  %v4355_v42 = vld [vmem:[%s7173_s5 + $0x90] sm:$0xf]  ;;  %v4643_v52 = vld [vmem:[%s7169_s2 + $0x1c] sm:$0xf]  ;;  %v4265_v28 = vld [vmem:[%s7169_s2 + $0x98] sm:$0xf] }
 0x3ad   :  { %1927 = vmatpush.bf16.msrb.mxu2 %v4120_v27  ;;  %v4707_v27 = vld [vmem:[%s7173_s5 + $0x98] sm:$0xf0] }
 0x3ae   :  { %v4356_v56 = vor.u32 %v4707_v27, %v4355_v42  ;;  %v4283_v27 = vld [vmem:[%s7173_s5] sm:$0xf] }
 0x3b0   :  { %1898 = vmatpush.bf16.msrb.mxu0 %v4148_v51  ;;  %1911 = vmatpush.bf16.msrb.mxu1 %v4152_v55  ;;  %v4099_v51 = vld [vmem:[%s7169_s2 + $0x18] sm:$0xf] }
 0x3b1   :  { %v4787_v10 = vpop.eup %4786  ;;  %v4100_v55 = vor.u32 %v4644_v1, %v4099_v51 }
 0x3b2   :  { %v1477_v7 = vmul.f32 %v4787_v10, %v1476_v53  ;;  %v4108_v53 = vor.u32 %v4645_v9, %v4107_v5  ;;  %v4135_v10 = vld [vmem:[%s7169_s2 + $0x60] sm:$0xf]  ;;  %v4101_v5 = vld [vmem:[%s7169_s2 + $0x24] sm:$0xf0]  ;;  %v4343_v9 = vld [vmem:[%s7173_s5 + $0x78] sm:$0xf] }
 0x3b4   :  { %v6031_v12 = vadd.f32 %v1478_v41, %v1477_v7  ;;  %v4653_v7 = vld [vmem:[%s7169_s2 + $0x68] sm:$0xf0]  ;;  %v4652_v41 = vld [vmem:[%s7169_s2 + $0x64] sm:$0xf]  ;;  %1928 = vmatpush.bf16.msrb.mxu2 %v4108_v53 }
 0x3b5   :  { %v4140_v14 = vor.u32 %v4652_v41, %v4137_v13  ;;  %v4704_v53 = vld [vmem:[%s7173_s5 + $0x80] sm:$0xf0]  ;;  %v4641_v13 = vld [vmem:[%s7169_s2 + $0x8] sm:$0xf0] }
 0x3b6   :  { %v1484_v0 = vpack.c.bf16 %v6031_v12, %v6031_v12  ;;  %v4344_v41 = vor.u32 %v4704_v53, %v4343_v9  ;;  %v188_v53 = vadd.f32 %v5389_v2, %v5364_v33 }
 0x3b7   :  { %1912 = vmatpush.bf16.msrb.mxu1 %v4140_v14  ;;  %v4640_v14 = vld [vmem:[%s7169_s2 + $0x4] sm:$0xf] }
 0x3b8   :  { %1653 = vmatmul.bf16.vlgmr.msra.gmra.mxu1 %v1484_v0  ;;  %1666 = vmatmul.bf16.vlgmr.msra.gmra.mxu2 %v1484_v0  ;;  %v4092_v60 = vor.u32 %v4640_v14, %v4089_v24 }
 0x3b9   :  { %1679 = vmatmul.bf16.vlgmr.msrb.gmra.mxu3 %v1484_v0  ;;  %v4136_v0 = vor.u32 %v4653_v7, %v4135_v10  ;;  %1929 = vmatpush.bf16.msrb.mxu2 %v4096_v62  ;;  %v4104_v7 = vor.u32 %v4643_v52, %v4101_v5 }
 0x3bb   :  { %1899 = vmatpush.bf16.msrb.mxu0 %v4136_v0  ;;  %1913 = vmatpush.bf16.msrb.mxu1 %v4128_v30  ;;  %v4087_v0 = vld [vmem:[%s7169_s2] sm:$0xf]  ;;  %v4307_v30 = vld [vmem:[%s7173_s5 + $0x30] sm:$0xf] }
 0x3bc   :  { %v4088_v11 = vor.u32 %v4641_v13, %v4087_v0 }
 0x3bd   :  { %2414 = vmatpush.bf16.msra.mxu2 %v4368_v59  ;;  %v4695_v59 = vld [vmem:[%s7173_s5 + $0x38] sm:$0xf0] }
 0x3be   :  { %v4308_v36 = vor.u32 %v4695_v59, %v4307_v30  ;;  %v4253_v59 = vld [vmem:[%s7169_s2 + $0x80] sm:$0xf] }
 0x3bf   :  { %1900 = vmatpush.bf16.msrb.mxu0 %v4124_v26  ;;  %1914 = vmatpush.bf16.msrb.mxu1 %v4116_v44 }
 0x3c1   :  { %2415 = vmatpush.bf16.msra.mxu2 %v4356_v56 }
 0x3c3   :  { %1901 = vmatpush.bf16.msrb.mxu0 %v4112_v40  ;;  %1915 = vmatpush.bf16.msrb.mxu1 %v4104_v7  ;;  %v4295_v40 = vld [vmem:[%s7173_s5 + $0x18] sm:$0xf] }
 0x3c5   :  { %2416 = vmatpush.bf16.msra.mxu2 %v4344_v41 }
 0x3c7   :  { %1902 = vmatpush.bf16.msrb.mxu0 %v4100_v55  ;;  %1916 = vmatpush.bf16.msrb.mxu1 %v4092_v60 }
 0x3cb   :  { %1903 = vmatpush.bf16.msrb.mxu0 %v4088_v11 }
 0x435   :  { %v1654_v57 = vpop.f32.mrf.mxu1 }
 0x436   :  { %v1655_v17 = vadd.f32 %v1654_v57, %v5215_v49 }
 0x438   :  { %v1684_v29 = vadd.f32 %v1655_v17, %v130_v15  ;;  %v4331_v15 = vld [vmem:[%s7173_s5 + $0x60] sm:$0xf]  ;;  %v4701_v17 = vld [vmem:[%s7173_s5 + $0x68] sm:$0xf0] }
 0x439   :  { %v4332_v22 = vor.u32 %v4701_v17, %v4331_v15 }
 0x43a   :  { %v4083_v34 = vmul.f32 -1.442695, %v1684_v29 }
 0x43b   :  { %v1667_v37 = vpop.f32.mrf.mxu2  ;;  %2417 = vmatpush.bf16.msra.mxu2 %v4332_v22  ;;  %v6246_v22 = vpack.c.bf16 %v5553_v23, %v5367_v54  ;;  %v4684_v54 = vld [vmem:[%s7169_s2 + $0xa0] sm:$0xf0] }
 0x43c   :  { %4788 = vpow2.f32 %v4083_v34  ;;  %v1668_v43 = vadd.f32 %v1667_v37, %v5304_v38  ;;  %v6170_v31 = vpop.f32.mrf.mxu3  ;;  %v4266_v23 = vor.u32 %v4684_v54, %v4265_v28  ;;  %v4674_v28 = vld [vmem:[%s7169_s2 + $0x50] sm:$0xf0] }
 0x43d   :  { %v1656_v45 = vpop.f32.mrf.mxu1  ;;  %v1681_v5 = vadd.f32 %v6170_v31, %v5357_v19 }
 0x43e   :  { %v1704_v48 = vadd.f32 %v1668_v43, %v159_v50  ;;  %v4296_v50 = vor.u32 %v4692_v6, %v4295_v40  ;;  %v4689_v45 = vld [vmem:[%s7173_s5 + $0x8] sm:$0xf0] }
 0x43f   :  { %2418 = vmatpush.bf16.msra.mxu2 %v4320_v63  ;;  %v4284_v52 = vor.u32 %v4689_v45, %v4283_v27  ;;  %v4685_v40 = vld [vmem:[%s7169_s2 + $0xac] sm:$0xf]  ;;  %v4257_v27 = vld [vmem:[%s7169_s2 + $0x90] sm:$0xf]  ;;  %v4683_v45 = vld [vmem:[%s7169_s2 + $0x98] sm:$0xf0] }
 0x440   :  { %v4084_v10 = vmul.f32 -1.442695, %v1704_v48 }
 0x442   :  { %v4789_v57 = vpop.eup %4788  ;;  %4790 = vpow2.f32 %v4084_v10 }
 0x443   :  { %v1688_v62 = vadd.f32 1.0, %v4789_v57  ;;  %v1669_v61 = vpop.f32.mrf.mxu2  ;;  %2419 = vmatpush.bf16.msra.mxu2 %v4308_v36  ;;  %v4269_v36 = vld [vmem:[%s7169_s2 + $0xa8] sm:$0xf] }
 0x444   :  { %v1682_v26 = vpop.f32.mrf.mxu3 }
 0x445   :  { %4792 = vrcp.f32 %v1688_v62  ;;  %v1700_v42 = vand.u32 2147483648, %v1688_v62  ;;  %v1698_v44 = vand.u32 2147483647, %v1688_v62  ;;  %vm1694_vm10 = vweird.f32 %v1688_v62  ;;  %v4277_v26 = vld [vmem:[%s7169_s2 + $0xb0] sm:$0xf] }
 0x446   :  { %v4278_v63 = vor.u32 %v4687_v58, %v4277_v26  ;;  %v4221_v58 = vld [vmem:[%s7169_s2 + $0x48] sm:$0xf] }
 0x447   :  { %v1701_v1 = vor.u32 1.1754944e-38, %v1700_v42  ;;  %2420 = vmatpush.bf16.msra.mxu2 %v4296_v50  ;;  %vm1699_vm12 = vcmp.eq.f32.partialorder %v1698_v44, 8.507059e+37  ;;  %v4229_v50 = vld [vmem:[%s7169_s2 + $0x50] sm:$0xf]  ;;  %v4222_v54 = vor.u32 %v4674_v28, %v4221_v58  ;;  %v4415_v28 = vld [vmem:[%s7174_s6 + $0x48] sm:$0xf] }
 0x448   :  { %v4791_v29 = vpop.eup %4790  ;;  %2173 = vmatpush.bf16.msra.mxu1 %v4278_v63  ;;  %v4673_v63 = vld [vmem:[%s7169_s2 + $0x4c] sm:$0xf] }
 0x449   :  { %v1708_v34 = vadd.f32 1.0, %v4791_v29  ;;  %v6263_v29 = vpack.c.bf16 %v5871_v18, %v5710_v21  ;;  %v4241_v21 = vld [vmem:[%s7169_s2 + $0x68] sm:$0xf]  ;;  %v4678_v18 = vld [vmem:[%s7169_s2 + $0x70] sm:$0xf0] }
 0x44b   :  { %v4793_v35 = vpop.eup %4792  ;;  %4794 = vrcp.f32 %v1708_v34  ;;  %v1720_v41 = vand.u32 2147483648, %v1708_v34  ;;  %v1718_v13 = vand.u32 2147483647, %v1708_v34  ;;  %2421 = vmatpush.bf16.msra.mxu2 %v4284_v52  ;;  %vm1714_vm14 = vweird.f32 %v1708_v34  ;;  %v4217_v52 = vld [vmem:[%s7169_s2 + $0x38] sm:$0xf] }
 0x44c   :  { %v1690_v37 = vmul.f32 %v4793_v35, %v1688_v62  ;;  %vm1695_vm9 = vweird.f32 %v4793_v35  ;;  %2174 = vmatpush.bf16.msra.mxu1 %v4266_v23  ;;  %v4223_v23 = vld [vmem:[%s7169_s2 + $0x54] sm:$0xf0] }
 0x44d   :  { %vm1696_vm11 = vmor %vm1694_vm10, %vm1695_vm9  ;;  %v1721_v11 = vor.u32 1.1754944e-38, %v1720_v41  ;;  %vm1719_vm0 = vcmp.eq.f32.partialorder %v1718_v13, 8.507059e+37  ;;  %v4247_v41 = vld [vmem:[%s7169_s2 + $0x84] sm:$0xf0]  ;;  %v4205_v13 = vld [vmem:[%s7169_s2 + $0x20] sm:$0xf] }
 0x44e   :  { %v1691_v39 = vsub.f32 1.0, %v1690_v37  ;;  %v4686_v37 = vld [vmem:[%s7169_s2 + $0xb0] sm:$0xf0] }
 0x44f   :  { %v4270_v6 = vor.u32 %v4686_v37, %v4269_v36  ;;  %v4670_v36 = vld [vmem:[%s7169_s2 + $0x34] sm:$0xf] }
 0x450   :  { %v1692_v43 = vmul.f32 %v4793_v35, %v1691_v39  ;;  %v4271_v39 = vld [vmem:[%s7169_s2 + $0xb4] sm:$0xf0] }
 0x451   :  { %v4795_v56 = vpop.eup %4794  ;;  %v4274_v42 = vor.u32 %v4685_v40, %v4271_v39  ;;  %2147 = vmatpush.bf16.msra.mxu3 %v4270_v6  ;;  %v4211_v40 = vld [vmem:[%s7169_s2 + $0x3c] sm:$0xf0]  ;;  %v4451_v6 = vld [vmem:[%s7174_s6 + $0x90] sm:$0xf]  ;;  %v4731_v39 = vld [vmem:[%s7174_s6 + $0x98] sm:$0xf0] }
 0x452   :  { %v1710_v48 = vmul.f32 %v4795_v56, %v1708_v34  ;;  %v1693_v51 = vadd.f32 %v4793_v35, %v1692_v43  ;;  %vm1715_vm13 = vweird.f32 %v4795_v56  ;;  %v4681_v34 = vld [vmem:[%s7169_s2 + $0x88] sm:$0xf0]  ;;  %v4675_v43 = vld [vmem:[%s7169_s2 + $0x58] sm:$0xf0] }
 0x453   :  { %vm1716_vm15 = vmor %vm1714_vm14, %vm1715_vm13  ;;  %2160 = vmatpush.bf16.msra.mxu0 %v4274_v42  ;;  %v4230_v44 = vor.u32 %v4675_v43, %v4229_v50  ;;  %v4214_v42 = vor.u32 %v4670_v36, %v4211_v40  ;;  %v6394_v50 = vor.u32 %v4731_v39, %v4451_v6  ;;  %v4197_v43 = vld [vmem:[%s7169_s2 + $0x18] sm:$0xf]  ;;  %v4403_v39 = vld [vmem:[%s7174_s6 + $0x30] sm:$0xf] }
 0x454   :  { %v1711_v55 = vsub.f32 1.0, %v1710_v48  ;;  %v1697_v9 = vsel %vm1696_vm11, %v4793_v35, %v1693_v51  ;;  %v4254_v35 = vor.u32 %v4681_v34, %v4253_v59  ;;  %v4258_v48 = vor.u32 %v4683_v45, %v4257_v27  ;;  %v4259_v51 = vld [vmem:[%s7169_s2 + $0x9c] sm:$0xf0]  ;;  %v4463_v59 = vld [vmem:[%s7174_s6 + $0xa8] sm:$0xf] }
 0x455   :  { %v1702_v10 = vsel %vm1699_vm12, %v1701_v1, %v1697_v9  ;;  %v4245_v9 = vld [vmem:[%s7169_s2 + $0x78] sm:$0xf]  ;;  %v4226_v34 = vor.u32 %v4673_v63, %v4223_v23  ;;  %v4667_v27 = vld [vmem:[%s7169_s2 + $0x1c] sm:$0xf]  ;;  %v4722_v63 = vld [vmem:[%s7174_s6 + $0x50] sm:$0xf0] }
 0x456   :  { %v1712_v7 = vmul.f32 %v4795_v56, %v1711_v55  ;;  %v1724_v0 = vmul.f32 %v1702_v10, %v1681_v5  ;;  %2175 = vmatpush.bf16.msra.mxu1 %v4254_v35  ;;  %2148 = vmatpush.bf16.msra.mxu3 %v4258_v48  ;;  %v4672_v55 = vld [vmem:[%s7169_s2 + $0x40] sm:$0xf0]  ;;  %v4679_v10 = vld [vmem:[%s7169_s2 + $0x7c] sm:$0xf]  ;;  %v4734_v35 = vld [vmem:[%s7174_s6 + $0xb0] sm:$0xf0] }
 0x457   :  { %v4218_v5 = vor.u32 %v4672_v55, %v4217_v52  ;;  %v4439_v48 = vld [vmem:[%s7174_s6 + $0x78] sm:$0xf] }
 0x458   :  { %v1713_v14 = vadd.f32 %v4795_v56, %v1712_v7  ;;  %v1725_v57 = vadd.f32 %v1724_v0, %v188_v53  ;;  %v4680_v53 = vld [vmem:[%s7169_s2 + $0x80] sm:$0xf0]  ;;  %v4250_v0 = vor.u32 %v4679_v10, %v4247_v41 }
 0x459   :  { %v4246_v7 = vor.u32 %v4680_v53, %v4245_v9  ;;  %v4185_v9 = vld [vmem:[%s7169_s2] sm:$0xf]  ;;  %v4665_v53 = vld [vmem:[%s7169_s2 + $0x8] sm:$0xf0]  ;;  %v4664_v10 = vld [vmem:[%s7169_s2 + $0x4] sm:$0xf] }
 0x45a   :  { %v1717_v24 = vsel %vm1716_vm15, %v4795_v56, %v1713_v14  ;;  %4796 = vtanh.f32 %v1725_v57  ;;  %v4682_v56 = vld [vmem:[%s7169_s2 + $0x94] sm:$0xf]  ;;  %v4669_v14 = vld [vmem:[%s7169_s2 + $0x28] sm:$0xf0] }
 0x45b   :  { %v1722_v31 = vsel %vm1719_vm0, %v1721_v11, %v1717_v24  ;;  %v4262_v1 = vor.u32 %v4682_v56, %v4259_v51  ;;  %2149 = vmatpush.bf16.msra.mxu3 %v4246_v7  ;;  %v4206_v57 = vor.u32 %v4669_v14, %v4205_v13  ;;  %v4233_v11 = vld [vmem:[%s7169_s2 + $0x60] sm:$0xf]  ;;  %v4677_v24 = vld [vmem:[%s7169_s2 + $0x68] sm:$0xf0]  ;;  %v4199_v56 = vld [vmem:[%s7169_s2 + $0x24] sm:$0xf0]  ;;  %v162_v7 = vadd.f32 %v5391_v3, %v5289_v32 }
 0x45c   :  { %v1727_v15 = vsub.f32 1.0, %v1722_v31  ;;  %v1729_v2 = vmul.f32 %v1722_v31, %v6031_v12  ;;  %v4676_v31 = vld [vmem:[%s7169_s2 + $0x64] sm:$0xf]  ;;  %v4186_v13 = vor.u32 %v4665_v53, %v4185_v9  ;;  %v4187_v14 = vld [vmem:[%s7169_s2 + $0xc] sm:$0xf0] }
 0x45d   :  { %2161 = vmatpush.bf16.msra.mxu0 %v4262_v1  ;;  %v4728_v51 = vld [vmem:[%s7174_s6 + $0x80] sm:$0xf0]  ;;  %v4202_v1 = vor.u32 %v4667_v27, %v4199_v56  ;;  %v4190_v3 = vor.u32 %v4664_v10, %v4187_v14  ;;  %v4345_v27 = vld [vmem:[%s7173_s5 + $0x84] sm:$0xf0]  ;;  %v4333_v10 = vld [vmem:[%s7173_s5 + $0x6c] sm:$0xf0] }
 0x45e   :  { %v6415_v52 = vor.u32 %v4728_v51, %v4439_v48  ;;  %v4705_v48 = vld [vmem:[%s7173_s5 + $0x88] sm:$0xf0]  ;;  %v4700_v53 = vld [vmem:[%s7173_s5 + $0x64] sm:$0xf]  ;;  %v4702_v14 = vld [vmem:[%s7173_s5 + $0x70] sm:$0xf0] }
 0x460   :  { %v4797_v17 = vpop.eup %4796 }
 0x461   :  { %v1728_v62 = vmul.f32 %v4797_v17, %v1727_v15  ;;  %2162 = vmatpush.bf16.msra.mxu0 %v4250_v0  ;;  %v4234_v15 = vor.u32 %v4677_v24, %v4233_v11  ;;  %v4235_v17 = vld [vmem:[%s7169_s2 + $0x6c] sm:$0xf0]  ;;  %v4725_v11 = vld [vmem:[%s7174_s6 + $0x68] sm:$0xf0] }
 0x463   :  { %v6240_v61 = vadd.f32 %v1729_v2, %v1728_v62  ;;  %v4238_v62 = vor.u32 %v4676_v31, %v4235_v17  ;;  %2150 = vmatpush.bf16.msra.mxu3 %v4234_v15  ;;  %v4193_v2 = vld [vmem:[%s7169_s2 + $0x8] sm:$0xf]  ;;  %v4709_v31 = vld [vmem:[%s7173_s5 + $0xac] sm:$0xf]  ;;  %v4369_v15 = vld [vmem:[%s7173_s5 + $0xb4] sm:$0xf0] }
 0x464   :  { %v4375_v17 = vld [vmem:[%s7173_s5 + $0xb0] sm:$0xf] }
 0x465   :  { %v1735_v60 = vpack.c.bf16 %v6240_v61, %v6240_v61  ;;  %v6268_v30 = vpack.c.bf16 %v6240_v61, %v6031_v12  ;;  %v4242_v12 = vor.u32 %v4678_v18, %v4241_v21  ;;  %2163 = vmatpush.bf16.msra.mxu0 %v4238_v62  ;;  %v6373_v21 = vor.u32 %v4734_v35, %v4463_v59  ;;  %v4209_v18 = vld [vmem:[%s7169_s2 + $0x30] sm:$0xf]  ;;  %v4706_v59 = vld [vmem:[%s7173_s5 + $0x94] sm:$0xf]  ;;  %v4363_v35 = vld [vmem:[%s7173_s5 + $0x98] sm:$0xf] }
 0x467   :  { %1904 = vmatmul.bf16.vlgmr.msrb.gmra.mxu0 %v1735_v60  ;;  %1917 = vmatmul.bf16.vlgmr.msrb.gmra.mxu1 %v1735_v60 }
 0x468   :  { %1930 = vmatmul.bf16.vlgmr.msrb.gmra.mxu2 %v1735_v60  ;;  %2176 = vmatpush.bf16.msra.mxu1 %v4242_v12  ;;  %v4666_v60 = vld [vmem:[%s7169_s2 + $0x10] sm:$0xf0]  ;;  %v4671_v12 = vld [vmem:[%s7169_s2 + $0x38] sm:$0xf0] }
 0x469   :  { %v4194_v26 = vor.u32 %v4666_v60, %v4193_v2  ;;  %2151 = vmatpush.bf16.msra.mxu3 %v4222_v54  ;;  %2164 = vmatpush.bf16.msra.mxu0 %v4226_v34  ;;  %v4210_v37 = vor.u32 %v4671_v12, %v4209_v18  ;;  %v4372_v60 = vor.u32 %v4709_v31, %v4369_v15  ;;  %v4357_v34 = vld [vmem:[%s7173_s5 + $0x9c] sm:$0xf0]  ;;  %v4708_v18 = vld [vmem:[%s7173_s5 + $0xa0] sm:$0xf0]  ;;  %v4713_v15 = vld [vmem:[%s7174_s6 + $0x8] sm:$0xf0] }
 0x46a   :  { %v4360_v36 = vor.u32 %v4706_v59, %v4357_v34  ;;  %v4379_v31 = vld [vmem:[%s7174_s6] sm:$0xf] }
 0x46c   :  { %2177 = vmatpush.bf16.msra.mxu1 %v4230_v44  ;;  %v4668_v44 = vld [vmem:[%s7169_s2 + $0x20] sm:$0xf0] }
 0x46d   :  { %2152 = vmatpush.bf16.msra.mxu3 %v4210_v37  ;;  %2165 = vmatpush.bf16.msra.mxu0 %v4214_v42  ;;  %v4198_v45 = vor.u32 %v4668_v44, %v4197_v43  ;;  %v4364_v37 = vor.u32 %v4708_v18, %v4363_v35  ;;  %v4719_v42 = vld [vmem:[%s7174_s6 + $0x38] sm:$0xf0]  ;;  %v4696_v35 = vld [vmem:[%s7173_s5 + $0x40] sm:$0xf0] }
 0x46e   :  { %v6485_v43 = vor.u32 %v4719_v42, %v4403_v39  ;;  %v4703_v44 = vld [vmem:[%s7173_s5 + $0x7c] sm:$0xf]  ;;  %v4297_v39 = vld [vmem:[%s7173_s5 + $0x24] sm:$0xf0] }
 0x46f   :  { %v4348_v56 = vor.u32 %v4703_v44, %v4345_v27  ;;  %v4303_v27 = vld [vmem:[%s7173_s5 + $0x20] sm:$0xf] }
 0x470   :  { %2178 = vmatpush.bf16.msra.mxu1 %v4218_v5 }
 0x471   :  { %2153 = vmatpush.bf16.msra.mxu3 %v4198_v45  ;;  %2166 = vmatpush.bf16.msra.mxu0 %v4202_v1  ;;  %v4351_v45 = vld [vmem:[%s7173_s5 + $0x80] sm:$0xf]  ;;  %v4391_v1 = vld [vmem:[%s7174_s6 + $0x18] sm:$0xf] }
 0x472   :  { %v4352_v51 = vor.u32 %v4705_v48, %v4351_v45  ;;  %v4693_v45 = vld [vmem:[%s7173_s5 + $0x28] sm:$0xf0] }
 0x474   :  { %2179 = vmatpush.bf16.msra.mxu1 %v4206_v57  ;;  %v4427_v57 = vld [vmem:[%s7174_s6 + $0x60] sm:$0xf] }
 0x475   :  { %v6440_v24 = vor.u32 %v4725_v11, %v4427_v57  ;;  %2154 = vmatpush.bf16.msra.mxu3 %v4186_v13  ;;  %2167 = vmatpush.bf16.msra.mxu0 %v4190_v3  ;;  %v4336_v13 = vor.u32 %v4700_v53, %v4333_v10  ;;  %v4688_v10 = vld [vmem:[%s7173_s5 + $0x4] sm:$0xf] }
 0x478   :  { %2422 = vmatmul.bf16.vlgmr.msra.gmra.mxu2 %v6246_v22  ;;  %2180 = vmatpush.bf16.msra.mxu1 %v4194_v26  ;;  %v4711_v26 = vld [vmem:[%s7173_s5 + $0xb8] sm:$0xf0] }
 0x479   :  { %v4376_v58 = vor.u32 %v4711_v26, %v4375_v17  ;;  %2443 = vmatpush.bf16.msrb.mxu3 %v4372_v60  ;;  %v6533_v17 = vor.u32 %v4713_v15, %v4379_v31  ;;  %v4327_v26 = vld [vmem:[%s7173_s5 + $0x50] sm:$0xf] }
 0x47b   :  { %2472 = vmatpush.bf16.msrb.mxu0 %v4376_v58  ;;  %v4699_v58 = vld [vmem:[%s7173_s5 + $0x58] sm:$0xf0] }
 0x47c   :  { %2696 = vmatpush.bf16.msrb.mxu1 %v6373_v21 }
 0x47d   :  { %2444 = vmatpush.bf16.msrb.mxu3 %v4360_v36 }
 0x47f   :  { %2473 = vmatpush.bf16.msrb.mxu0 %v4364_v37 }
 0x480   :  { %2697 = vmatpush.bf16.msrb.mxu1 %v6394_v50 }
 0x481   :  { %2445 = vmatpush.bf16.msrb.mxu3 %v4348_v56 }
 0x483   :  { %2474 = vmatpush.bf16.msrb.mxu0 %v4352_v51  ;;  %v4304_v51 = vor.u32 %v4693_v45, %v4303_v27  ;;  %v4724_v27 = vld [vmem:[%s7174_s6 + $0x64] sm:$0xf]  ;;  %v4429_v45 = vld [vmem:[%s7174_s6 + $0x6c] sm:$0xf0] }
 0x484   :  { %2698 = vmatpush.bf16.msrb.mxu1 %v6415_v52 }
 0x485   :  { %2446 = vmatpush.bf16.msrb.mxu3 %v4336_v13 }
 0x488   :  { %2427 = vmatmul.bf16.gmra.mxu2 %v6263_v29  ;;  %2699 = vmatpush.bf16.msrb.mxu1 %v6440_v24 }
 0x498   :  { %2432 = vmatmul.bf16.gmra.mxu2 %v6268_v30 }
 0x4e4   :  { %v1905_v55 = vpop.f32.mrf.mxu0  ;;  %v1918_v5 = vpop.f32.mrf.mxu1 }
 0x4e5   :  { %v1906_v41 = vadd.f32 %v1905_v55, %v5215_v49  ;;  %v1919_v0 = vadd.f32 %v1918_v5, %v5304_v38  ;;  %v4716_v55 = vld [vmem:[%s7174_s6 + $0x20] sm:$0xf0] }
 0x4e6   :  { %v6506_v9 = vor.u32 %v4716_v55, %v4391_v1 }
 0x4e7   :  { %v1935_v62 = vadd.f32 %v1906_v41, %v5245_v8  ;;  %v1955_v2 = vadd.f32 %v1919_v0, %v162_v7  ;;  %v6462_v8 = vor.u32 %v4722_v63, %v4415_v28  ;;  %v4339_v7 = vld [vmem:[%s7173_s5 + $0x68] sm:$0xf]  ;;  %v4328_v28 = vor.u32 %v4699_v58, %v4327_v26  ;;  %v4694_v63 = vld [vmem:[%s7173_s5 + $0x34] sm:$0xf] }
 0x4e8   :  { %v4340_v3 = vor.u32 %v4702_v14, %v4339_v7  ;;  %v4285_v7 = vld [vmem:[%s7173_s5 + $0xc] sm:$0xf0] }
 0x4e9   :  { %v4181_v54 = vmul.f32 -1.442695, %v1935_v62  ;;  %v4182_v23 = vmul.f32 -1.442695, %v1955_v2  ;;  %2700 = vmatpush.bf16.msrb.mxu1 %v6462_v8  ;;  %v4697_v62 = vld [vmem:[%s7173_s5 + $0x4c] sm:$0xf]  ;;  %v4288_v14 = vor.u32 %v4688_v10, %v4285_v7 }
 0x4ea   :  { %2475 = vmatpush.bf16.msrb.mxu0 %v4340_v3  ;;  %v4321_v2 = vld [vmem:[%s7173_s5 + $0x54] sm:$0xf0]  ;;  %v4715_v10 = vld [vmem:[%s7174_s6 + $0x1c] sm:$0xf]  ;;  %v4393_v7 = vld [vmem:[%s7174_s6 + $0x24] sm:$0xf0] }
 0x4eb   :  { %4798 = vpow2.f32 %v4181_v54  ;;  %v6476_v12 = vpop.f32.mrf.mxu2  ;;  %v4324_v60 = vor.u32 %v4697_v62, %v4321_v2  ;;  %v4309_v54 = vld [vmem:[%s7173_s5 + $0x3c] sm:$0xf0]  ;;  %v191_v2 = vadd.f32 %v5411_v16, %v5364_v33 }
 0x4ec   :  { %4800 = vpow2.f32 %v4182_v23  ;;  %v1907_v40 = vpop.f32.mrf.mxu0  ;;  %v1920_v6 = vpop.f32.mrf.mxu1  ;;  %v4315_v23 = vld [vmem:[%s7173_s5 + $0x38] sm:$0xf]  ;;  %v4312_v34 = vor.u32 %v4694_v63, %v4309_v54 }
 0x4ed   :  { %2701 = vmatpush.bf16.msrb.mxu1 %v6485_v43  ;;  %2447 = vmatpush.bf16.msrb.mxu3 %v4324_v60  ;;  %v4316_v37 = vor.u32 %v4696_v35, %v4315_v23  ;;  %v4691_v6 = vld [vmem:[%s7173_s5 + $0x1c] sm:$0xf]  ;;  %v4733_v35 = vld [vmem:[%s7174_s6 + $0xac] sm:$0xf] }
 0x4ee   :  { %2476 = vmatpush.bf16.msrb.mxu0 %v4328_v28  ;;  %v4300_v44 = vor.u32 %v4691_v6, %v4297_v39  ;;  %v4727_v39 = vld [vmem:[%s7174_s6 + $0x7c] sm:$0xf] }
 0x4f1   :  { %v4799_v5 = vpop.eup %4798  ;;  %2702 = vmatpush.bf16.msrb.mxu1 %v6506_v9  ;;  %2448 = vmatpush.bf16.msrb.mxu3 %v4312_v34 }
 0x4f2   :  { %v4801_v41 = vpop.eup %4800  ;;  %v6517_v0 = vadd.f32 1.0, %v4799_v5  ;;  %2477 = vmatpush.bf16.msrb.mxu0 %v4316_v37 }
 0x4f3   :  { %v6522_v57 = vadd.f32 1.0, %v4801_v41  ;;  %v1933_v11 = vpop.f32.mrf.mxu2  ;;  %v4291_v41 = vld [vmem:[%s7173_s5 + $0x8] sm:$0xf] }
 0x4f4   :  { %4802 = vrcp.f32 %v6517_v0  ;;  %v1951_v48 = vand.u32 2147483648, %v6517_v0  ;;  %v1949_v55 = vand.u32 2147483647, %v6517_v0  ;;  %vm1945_vm2 = vweird.f32 %v6517_v0 }
 0x4f5   :  { %4804 = vrcp.f32 %v6522_v57  ;;  %2703 = vmatpush.bf16.msrb.mxu1 %v6533_v17  ;;  %2449 = vmatpush.bf16.msrb.mxu3 %v4300_v44  ;;  %v1932_v11 = vadd.f32 %v6476_v12, %v5357_v19  ;;  %v1971_v60 = vand.u32 2147483648, %v6522_v57  ;;  %vm1965_vm6 = vweird.f32 %v6522_v57 }
 0x4f6   :  { %v1952_v13 = vor.u32 1.1754944e-38, %v1951_v48  ;;  %2478 = vmatpush.bf16.msrb.mxu0 %v4304_v51  ;;  %vm1950_vm4 = vcmp.eq.f32.partialorder %v1949_v55, 8.507059e+37  ;;  %v1969_v58 = vand.u32 2147483647, %v6522_v57  ;;  %v4721_v48 = vld [vmem:[%s7174_s6 + $0x4c] sm:$0xf] }
 0x4f7   :  { %v1972_v63 = vor.u32 1.1754944e-38, %v1971_v60  ;;  %v4417_v51 = vld [vmem:[%s7174_s6 + $0x54] sm:$0xf0]  ;;  %v4718_v55 = vld [vmem:[%s7174_s6 + $0x34] sm:$0xf] }
 0x4f8   :  { %vm1970_vm8 = vcmp.eq.f32.partialorder %v1969_v58, 8.507059e+37 }
 0x4f9   :  { %2450 = vmatpush.bf16.msrb.mxu3 %v4288_v14 }
 0x4fa   :  { %v4803_v59 = vpop.eup %4802 }
 0x4fb   :  { %v4805_v18 = vpop.eup %4804  ;;  %v1941_v36 = vmul.f32 %v4803_v59, %v6517_v0  ;;  %vm1946_vm1 = vweird.f32 %v4803_v59  ;;  %v4690_v0 = vld [vmem:[%s7173_s5 + $0x10] sm:$0xf0] }
 0x4fc   :  { %v1961_v40 = vmul.f32 %v4805_v18, %v6522_v57  ;;  %vm1947_vm3 = vmor %vm1945_vm2, %vm1946_vm1  ;;  %v4292_v31 = vor.u32 %v4690_v0, %v4291_v41  ;;  %vm1966_vm5 = vweird.f32 %v4805_v18  ;;  %v4465_v57 = vld [vmem:[%s7174_s6 + $0xb4] sm:$0xf0]  ;;  %v4712_v41 = vld [vmem:[%s7174_s6 + $0x4] sm:$0xf]  ;;  %v164_v0 = vadd.f32 %v5431_v47, %v5289_v32 }
 0x4fd   :  { %v1942_v42 = vsub.f32 1.0, %v1941_v36  ;;  %vm1967_vm7 = vmor %vm1965_vm6, %vm1966_vm5  ;;  %v6607_v37 = vor.u32 %v4733_v35, %v4465_v57  ;;  %v4732_v32 = vld [vmem:[%s7174_s6 + $0xa0] sm:$0xf0] }
 0x4fe   :  { %v1962_v56 = vsub.f32 1.0, %v1961_v40  ;;  %2479 = vmatpush.bf16.msrb.mxu0 %v4292_v31  ;;  %v4730_v40 = vld [vmem:[%s7174_s6 + $0x94] sm:$0xf] }
 0x4ff   :  { %v1943_v1 = vmul.f32 %v4803_v59, %v1942_v42  ;;  %v4441_v42 = vld [vmem:[%s7174_s6 + $0x84] sm:$0xf0] }
 0x500   :  { %v1963_v5 = vmul.f32 %v4805_v18, %v1962_v56  ;;  %v6628_v44 = vor.u32 %v4727_v39, %v4441_v42  ;;  %v6639_v56 = vor.u32 %v4724_v27, %v4429_v45  ;;  %v4423_v42 = vld [vmem:[%s7174_s6 + $0x50] sm:$0xf]  ;;  %v4723_v27 = vld [vmem:[%s7174_s6 + $0x58] sm:$0xf0] }
 0x501   :  { %v1944_v53 = vadd.f32 %v4803_v59, %v1943_v1  ;;  %v6650_v1 = vor.u32 %v4721_v48, %v4417_v51  ;;  %v6770_v48 = vor.u32 %v4723_v27, %v4423_v42 }
 0x502   :  { %v1964_v62 = vadd.f32 %v4805_v18, %v1963_v5  ;;  %v4405_v5 = vld [vmem:[%s7174_s6 + $0x3c] sm:$0xf0] }
 0x503   :  { %v1948_v3 = vsel %vm1947_vm3, %v4803_v59, %v1944_v53  ;;  %v6664_v53 = vor.u32 %v4718_v55, %v4405_v5  ;;  %v4411_v5 = vld [vmem:[%s7174_s6 + $0x38] sm:$0xf] }
 0x504   :  { %v1953_v15 = vsel %vm1950_vm4, %v1952_v13, %v1948_v3  ;;  %v1968_v28 = vsel %vm1967_vm7, %v4805_v18, %v1964_v62  ;;  %v4381_v13 = vld [vmem:[%s7174_s6 + $0xc] sm:$0xf0]  ;;  %v4459_v62 = vld [vmem:[%s7174_s6 + $0x98] sm:$0xf] }
 0x505   :  { %v1975_v26 = vmul.f32 %v1953_v15, %v1932_v11  ;;  %v1973_v54 = vsel %vm1970_vm8, %v1972_v63, %v1968_v28  ;;  %v6686_v14 = vor.u32 %v4712_v41, %v4381_v13  ;;  %v4471_v15 = vld [vmem:[%s7174_s6 + $0xb0] sm:$0xf]  ;;  %v6725_v60 = vor.u32 %v4732_v32, %v4459_v62  ;;  %v4729_v28 = vld [vmem:[%s7174_s6 + $0x88] sm:$0xf0]  ;;  %v4714_v62 = vld [vmem:[%s7174_s6 + $0x10] sm:$0xf0] }
 0x506   :  { %v1978_v23 = vsub.f32 1.0, %v1973_v54  ;;  %v1980_v16 = vmul.f32 %v1973_v54, %v6240_v61  ;;  %v4453_v61 = vld [vmem:[%s7174_s6 + $0x9c] sm:$0xf0] }
 0x507   :  { %v1976_v12 = vadd.f32 %v1975_v26, %v191_v2  ;;  %v6617_v6 = vor.u32 %v4730_v40, %v4453_v61  ;;  %v135_v26 = vadd.f32 %v5275_v20, %v5166_v25  ;;  %v4726_v40 = vld [vmem:[%s7174_s6 + $0x70] sm:$0xf0] }
 0x509   :  { %4806 = vtanh.f32 %v1976_v12  ;;  %v4447_v12 = vld [vmem:[%s7174_s6 + $0x80] sm:$0xf] }
 0x50f   :  { %v4807_v59 = vpop.eup %4806 }
 0x510   :  { %v1979_v34 = vmul.f32 %v4807_v59, %v1978_v23  ;;  %v6739_v59 = vor.u32 %v4729_v28, %v4447_v12 }
 0x512   :  { %v6603_v36 = vadd.f32 %v1980_v16, %v1979_v34 }
 0x514   :  { %v1986_v18 = vpack.c.bf16 %v6603_v36, %v6603_v36 }
 0x516   :  { %2155 = vmatmul.bf16.vlgmr.msra.gmra.mxu3 %v1986_v18  ;;  %2168 = vmatmul.bf16.vlgmr.msra.gmra.mxu0 %v1986_v18 }
 0x517   :  { %2181 = vmatmul.bf16.vlgmr.msra.gmra.mxu1 %v1986_v18  ;;  %2786 = vmatpush.bf16.msra.mxu3 %v6373_v21  ;;  %v4435_v18 = vld [vmem:[%s7174_s6 + $0x68] sm:$0xf] }
 0x518   :  { %2709 = vmatpush.bf16.msra.mxu1 %v6607_v37  ;;  %2799 = vmatpush.bf16.msra.mxu0 %v6607_v37  ;;  %v6757_v61 = vor.u32 %v4726_v40, %v4435_v18 }
 0x51b   :  { %2787 = vmatpush.bf16.msra.mxu3 %v6394_v50 }
 0x51c   :  { %2710 = vmatpush.bf16.msra.mxu1 %v6617_v6  ;;  %2800 = vmatpush.bf16.msra.mxu0 %v6617_v6 }
 0x51f   :  { %2788 = vmatpush.bf16.msra.mxu3 %v6415_v52 }
 0x520   :  { %2711 = vmatpush.bf16.msra.mxu1 %v6628_v44  ;;  %2801 = vmatpush.bf16.msra.mxu0 %v6628_v44 }
 0x523   :  { %2789 = vmatpush.bf16.msra.mxu3 %v6440_v24 }
 0x524   :  { %2712 = vmatpush.bf16.msra.mxu1 %v6639_v56  ;;  %2802 = vmatpush.bf16.msra.mxu0 %v6639_v56 }
 0x526   :  { %2451 = vmatmul.bf16.vlgmr.msrb.gmra.mxu3 %v6246_v22  ;;  %2480 = vmatmul.bf16.vlgmr.msrb.gmra.mxu0 %v6246_v22  ;;  %v6675_v22 = vor.u32 %v4715_v10, %v4393_v7  ;;  %v4720_v10 = vld [vmem:[%s7174_s6 + $0x40] sm:$0xf0]  ;;  %v4399_v7 = vld [vmem:[%s7174_s6 + $0x20] sm:$0xf] }
 0x527   :  { %2704 = vmatmul.bf16.vlgmr.msrb.gmra.mxu1 %v4898_v4  ;;  %2790 = vmatpush.bf16.msra.mxu3 %v6462_v8  ;;  %v6786_v13 = vor.u32 %v4720_v10, %v4411_v5 }
 0x528   :  { %2713 = vmatpush.bf16.msra.mxu1 %v6650_v1  ;;  %2803 = vmatpush.bf16.msra.mxu0 %v6650_v1 }
 0x52b   :  { %2791 = vmatpush.bf16.msra.mxu3 %v6485_v43 }
 0x52c   :  { %2714 = vmatpush.bf16.msra.mxu1 %v6664_v53  ;;  %2804 = vmatpush.bf16.msra.mxu0 %v6664_v53 }
 0x52f   :  { %2792 = vmatpush.bf16.msra.mxu3 %v6506_v9 }
 0x530   :  { %2715 = vmatpush.bf16.msra.mxu1 %v6675_v22  ;;  %2805 = vmatpush.bf16.msra.mxu0 %v6675_v22 }
 0x533   :  { %2793 = vmatpush.bf16.msra.mxu3 %v6533_v17 }
 0x534   :  { %2716 = vmatpush.bf16.msra.mxu1 %v6686_v14  ;;  %2806 = vmatpush.bf16.msra.mxu0 %v6686_v14 }
 0x536   :  { %2456 = vmatmul.bf16.gmra.mxu3 %v6263_v29  ;;  %2485 = vmatmul.bf16.gmra.mxu0 %v6263_v29 }
 0x537   :  { %2889 = vmatpush.bf16.msrb.mxu3 %v6607_v37  ;;  %2717 = vmatmul.bf16.vlgmr.msra.gmra.mxu1 %v4898_v4 }
 0x53b   :  { %2890 = vmatpush.bf16.msrb.mxu3 %v6617_v6 }
 0x53f   :  { %2891 = vmatpush.bf16.msrb.mxu3 %v6628_v44 }
 0x543   :  { %2892 = vmatpush.bf16.msrb.mxu3 %v6639_v56 }
 0x546   :  { %2461 = vmatmul.bf16.gmra.mxu3 %v6268_v30  ;;  %2490 = vmatmul.bf16.gmra.mxu0 %v6268_v30  ;;  %v4735_v30 = vld [vmem:[%s7174_s6 + $0xb8] sm:$0xf0] }
 0x547   :  { %2893 = vmatpush.bf16.msrb.mxu3 %v6650_v1  ;;  %v6719_v2 = vor.u32 %v4735_v30, %v4471_v15  ;;  %v4387_v30 = vld [vmem:[%s7174_s6 + $0x8] sm:$0xf] }
 0x548   :  { %v6806_v12 = vor.u32 %v4714_v62, %v4387_v30 }
 0x549   :  { %2722 = vmatpush.bf16.msrb.mxu2 %v6719_v2  ;;  %2812 = vmatpush.bf16.msrb.mxu1 %v6719_v2 }
 0x54a   :  { %2902 = vmatpush.bf16.msrb.mxu0 %v6719_v2 }
 0x54b   :  { %2894 = vmatpush.bf16.msrb.mxu3 %v6664_v53 }
 0x54d   :  { %2723 = vmatpush.bf16.msrb.mxu2 %v6725_v60  ;;  %2813 = vmatpush.bf16.msrb.mxu1 %v6725_v60 }
 0x54e   :  { %2903 = vmatpush.bf16.msrb.mxu0 %v6725_v60 }
 0x54f   :  { %2895 = vmatpush.bf16.msrb.mxu3 %v6675_v22 }
 0x551   :  { %2724 = vmatpush.bf16.msrb.mxu2 %v6739_v59  ;;  %2814 = vmatpush.bf16.msrb.mxu1 %v6739_v59 }
 0x552   :  { %2904 = vmatpush.bf16.msrb.mxu0 %v6739_v59 }
 0x553   :  { %2896 = vmatpush.bf16.msrb.mxu3 %v6686_v14 }
 0x555   :  { %2725 = vmatpush.bf16.msrb.mxu2 %v6757_v61  ;;  %2815 = vmatpush.bf16.msrb.mxu1 %v6757_v61 }
 0x556   :  { %2905 = vmatpush.bf16.msrb.mxu0 %v6757_v61 }
 0x559   :  { %2726 = vmatpush.bf16.msrb.mxu2 %v6770_v48  ;;  %2816 = vmatpush.bf16.msrb.mxu1 %v6770_v48 }
 0x55a   :  { %2906 = vmatpush.bf16.msrb.mxu0 %v6770_v48 }
 0x55d   :  { %2727 = vmatpush.bf16.msrb.mxu2 %v6786_v13  ;;  %2817 = vmatpush.bf16.msrb.mxu1 %v6786_v13 }
 0x55e   :  { %2907 = vmatpush.bf16.msrb.mxu0 %v6786_v13 }
 0x593   :  { %v2169_v29 = vpop.f32.mrf.mxu0 }
 0x594   :  { %v2170_v11 = vadd.f32 %v2169_v29, %v5304_v38  ;;  %v6708_v3 = vpop.f32.mrf.mxu1  ;;  %v4717_v29 = vld [vmem:[%s7174_s6 + $0x28] sm:$0xf0] }
 0x596   :  { %v2206_v31 = vadd.f32 %v2170_v11, %v164_v0 }
 0x598   :  { %v4280_v38 = vmul.f32 -1.442695, %v2206_v31  ;;  %v6792_v31 = vor.u32 %v4717_v29, %v4399_v7 }
 0x599   :  { %v2156_v47 = vpop.f32.mrf.mxu3 }
 0x59a   :  { %4808 = vpow2.f32 %v4280_v38  ;;  %v2157_v58 = vadd.f32 %v2156_v47, %v5215_v49  ;;  %2728 = vmatpush.bf16.msrb.mxu2 %v6792_v31  ;;  %2818 = vmatpush.bf16.msrb.mxu1 %v6792_v31 }
 0x59b   :  { %v2171_v63 = vpop.f32.mrf.mxu0  ;;  %2908 = vmatpush.bf16.msrb.mxu0 %v6792_v31 }
 0x59c   :  { %v2186_v54 = vadd.f32 %v2157_v58, %v135_v26  ;;  %v2184_v23 = vpop.f32.mrf.mxu1  ;;  %v2183_v63 = vadd.f32 %v6708_v3, %v5357_v19 }
 0x59e   :  { %v4279_v25 = vmul.f32 -1.442695, %v2186_v54  ;;  %2729 = vmatpush.bf16.msrb.mxu2 %v6806_v12  ;;  %2819 = vmatpush.bf16.msrb.mxu1 %v6806_v12 }
 0x59f   :  { %2909 = vmatpush.bf16.msrb.mxu0 %v6806_v12 }
 0x5a0   :  { %v4809_v49 = vpop.eup %4808  ;;  %4810 = vpow2.f32 %v4279_v25 }
 0x5a1   :  { %v6743_v20 = vadd.f32 1.0, %v4809_v49  ;;  %v2158_v34 = vpop.f32.mrf.mxu3  ;;  %v193_v49 = vadd.f32 %v5460_v46, %v5364_v33 }
 0x5a2   :  { %2876 = vmatpush.bf16.msra.mxu2 %v6373_v21  ;;  %2966 = vmatpush.bf16.msra.mxu1 %v6373_v21 }
 0x5a3   :  { %4812 = vrcp.f32 %v6743_v20  ;;  %v2222_v34 = vand.u32 2147483648, %v6743_v20  ;;  %vm2216_vm14 = vweird.f32 %v6743_v20  ;;  %v2220_v19 = vand.u32 2147483647, %v6743_v20 }
 0x5a4   :  { %v6749_v16 = vpop.f32.mrf.mxu1 }
 0x5a5   :  { %v2223_v46 = vor.u32 1.1754944e-38, %v2222_v34  ;;  %vm2221_vm0 = vcmp.eq.f32.partialorder %v2220_v19, 8.507059e+37 }
 0x5a6   :  { %v4811_v35 = vpop.eup %4810  ;;  %2877 = vmatpush.bf16.msra.mxu2 %v6394_v50  ;;  %2967 = vmatpush.bf16.msra.mxu1 %v6394_v50 }
 0x5a7   :  { %v2190_v57 = vadd.f32 1.0, %v4811_v35 }
 0x5a9   :  { %4814 = vrcp.f32 %v2190_v57  ;;  %v6759_v39 = vpop.eup %4812  ;;  %v2202_v15 = vand.u32 2147483648, %v2190_v57  ;;  %v2200_v38 = vand.u32 2147483647, %v2190_v57  ;;  %vm2196_vm10 = vweird.f32 %v2190_v57  ;;  %v2452_v30 = vpop.f32.mrf.mxu3 }
 0x5aa   :  { %v2212_v51 = vmul.f32 %v6759_v39, %v6743_v20  ;;  %vm2217_vm13 = vweird.f32 %v6759_v39  ;;  %2878 = vmatpush.bf16.msra.mxu2 %v6415_v52  ;;  %2968 = vmatpush.bf16.msra.mxu1 %v6415_v52 }
 0x5ab   :  { %v2203_v28 = vor.u32 1.1754944e-38, %v2202_v15  ;;  %vm2201_vm12 = vcmp.eq.f32.partialorder %v2200_v38, 8.507059e+37  ;;  %vm2218_vm15 = vmor %vm2216_vm14, %vm2217_vm13 }
 0x5ac   :  { %v2707_v45 = vpop.f32.mrf.mxu1  ;;  %v2213_v0 = vsub.f32 1.0, %v2212_v51 }
 0x5ae   :  { %v2214_v26 = vmul.f32 %v6759_v39, %v2213_v0  ;;  %2879 = vmatpush.bf16.msra.mxu2 %v6440_v24  ;;  %2969 = vmatpush.bf16.msra.mxu1 %v6440_v24 }
 0x5af   :  { %v4815_v55 = vpop.eup %4814 }
 0x5b0   :  { %v2192_v41 = vmul.f32 %v4815_v55, %v2190_v57  ;;  %vm2197_vm9 = vweird.f32 %v4815_v55  ;;  %v2215_v25 = vadd.f32 %v6759_v39, %v2214_v26 }
 0x5b1   :  { %vm2198_vm11 = vmor %vm2196_vm10, %vm2197_vm9 }
 0x5b2   :  { %v2193_v11 = vsub.f32 1.0, %v2192_v41  ;;  %v2219_v33 = vsel %vm2218_vm15, %v6759_v39, %v2215_v25  ;;  %2880 = vmatpush.bf16.msra.mxu2 %v6462_v8  ;;  %2970 = vmatpush.bf16.msra.mxu1 %v6462_v8 }
 0x5b3   :  { %v2224_v18 = vsel %vm2221_vm0, %v2223_v46, %v2219_v33 }
 0x5b4   :  { %v2194_v32 = vmul.f32 %v4815_v55, %v2193_v11  ;;  %v6802_v47 = vpop.f32.mrf.mxu1  ;;  %v2229_v20 = vsub.f32 1.0, %v2224_v18  ;;  %v2231_v27 = vmul.f32 %v2224_v18, %v6603_v36 }
 0x5b6   :  { %v2195_v58 = vadd.f32 %v4815_v55, %v2194_v32  ;;  %2881 = vmatpush.bf16.msra.mxu2 %v6485_v43  ;;  %2971 = vmatpush.bf16.msra.mxu1 %v6485_v43 }
 0x5b8   :  { %v2199_v54 = vsel %vm2198_vm11, %v4815_v55, %v2195_v58  ;;  %v2278_v55 = vld [vmem:[%s7176_s7] sm:$0x7] }
 0x5b9   :  { %v2204_v23 = vsel %vm2201_vm12, %v2203_v28, %v2199_v54  ;;  %v6862_v7 = vperm.slane %v2278_v55, 0  ;;  %v6869_v15 = vperm.slane %v2278_v55, 1 }
 0x5ba   :  { %v2226_v35 = vmul.f32 %v2204_v23, %v2183_v63  ;;  %2882 = vmatpush.bf16.msra.mxu2 %v6506_v9  ;;  %2972 = vmatpush.bf16.msra.mxu1 %v6506_v9 }
 0x5bb   :  { %v2453_v26 = vadd.f32 %v2452_v30, %v6869_v15 }
 0x5bc   :  { %v2227_v3 = vadd.f32 %v2226_v35, %v193_v49  ;;  %v2720_v57 = vpop.f32.mrf.mxu1 }
 0x5be   :  { %4816 = vtanh.f32 %v2227_v3  ;;  %2883 = vmatpush.bf16.msra.mxu2 %v6533_v17  ;;  %2973 = vmatpush.bf16.msra.mxu1 %v6533_v17 }
 0x5c4   :  { %v4817_v40 = vpop.eup %4816 }
 0x5c5   :  { %v2230_v42 = vmul.f32 %v4817_v40, %v2229_v20 }
 0x5c7   :  { %v2232_v45 = vadd.f32 %v2231_v27, %v2230_v42 }
 0x5c9   :  { %v2245_v39 = vpack.c.bf16 %v2232_v45, %v6603_v36  ;;  %v2423_v36 = vpop.f32.mrf.mxu2 }
 0x5ca   :  { %v2424_v29 = vadd.f32 %v2423_v36, %v6862_v7 }
 0x5cb   :  { %2437 = vmatmul.bf16.gmra.mxu2 %v2245_v39  ;;  %2466 = vmatmul.bf16.gmra.mxu3 %v2245_v39 }
 0x5cc   :  { %2495 = vmatmul.bf16.gmra.mxu0 %v2245_v39  ;;  %v6886_v39 = vperm.slane %v2278_v55, 2 }
 0x5d1   :  { %v6850_v51 = vpop.f32.mrf.mxu2 }
 0x5d9   :  { %v6860_v10 = vpop.f32.mrf.mxu2 }
 0x5db   :  { %2730 = vmatmul.bf16.vlgmr.msrb.gmra.mxu2 %v4898_v4  ;;  %v2525_v4 = vld [vmem:[%s7175_s8] sm:$0x7] }
 0x5dc   :  { %2979 = vmatpush.bf16.msrb.mxu2 %v6607_v37  ;;  %v6858_v5 = vperm.slane %v2525_v4, 0  ;;  %v6867_v0 = vperm.slane %v2525_v4, 1  ;;  %v6884_v42 = vperm.slane %v2525_v4, 2 }
 0x5de   :  { %v2706_v41 = vadd.f32 %v6749_v16, %v6858_v5  ;;  %v2719_v32 = vadd.f32 %v6802_v47, %v6867_v0 }
 0x5e0   :  { %2980 = vmatpush.bf16.msrb.mxu2 %v6617_v6  ;;  %v2735_v11 = vadd.f32 %v2706_v41, %v2424_v29  ;;  %v2755_v58 = vadd.f32 %v2719_v32, %v2453_v26  ;;  %v2481_v41 = vpop.f32.mrf.mxu0 }
 0x5e1   :  { %v6871_v62 = vpop.f32.mrf.mxu2  ;;  %v2482_v26 = vadd.f32 %v2481_v41, %v6886_v39 }
 0x5e2   :  { %v4473_v38 = vmul.f32 -1.442695, %v2735_v11  ;;  %v4474_v28 = vmul.f32 -1.442695, %v2755_v58 }
 0x5e4   :  { %2981 = vmatpush.bf16.msrb.mxu2 %v6628_v44  ;;  %4818 = vpow2.f32 %v4473_v38 }
 0x5e5   :  { %4820 = vpow2.f32 %v4474_v28 }
 0x5e8   :  { %2982 = vmatpush.bf16.msrb.mxu2 %v6639_v56 }
 0x5e9   :  { %v6876_v16 = vpop.f32.mrf.mxu2 }
 0x5ea   :  { %v4819_v63 = vpop.eup %4818 }
 0x5eb   :  { %v2739_v54 = vadd.f32 1.0, %v4819_v63  ;;  %v4821_v23 = vpop.eup %4820 }
 0x5ec   :  { %2983 = vmatpush.bf16.msrb.mxu2 %v6650_v1  ;;  %v2759_v49 = vadd.f32 1.0, %v4821_v23 }
 0x5ed   :  { %4822 = vrcp.f32 %v2739_v54  ;;  %v2751_v40 = vand.u32 2147483648, %v2739_v54  ;;  %vm2745_vm2 = vweird.f32 %v2739_v54  ;;  %v2749_v27 = vand.u32 2147483647, %v2739_v54 }
 0x5ee   :  { %4824 = vrcp.f32 %v2759_v49  ;;  %v2771_v58 = vand.u32 2147483648, %v2759_v49  ;;  %vm2765_vm6 = vweird.f32 %v2759_v49  ;;  %v2769_v28 = vand.u32 2147483647, %v2759_v49 }
 0x5ef   :  { %v2752_v11 = vor.u32 1.1754944e-38, %v2751_v40  ;;  %vm2750_vm4 = vcmp.eq.f32.partialorder %v2749_v27, 8.507059e+37 }
 0x5f0   :  { %2984 = vmatpush.bf16.msrb.mxu2 %v6664_v53  ;;  %vm2770_vm8 = vcmp.eq.f32.partialorder %v2769_v28, 8.507059e+37 }
 0x5f1   :  { %v6878_v25 = vpop.f32.mrf.mxu2 }
 0x5f3   :  { %v4823_v34 = vpop.eup %4822 }
 0x5f4   :  { %2985 = vmatpush.bf16.msrb.mxu2 %v6675_v22  ;;  %v2741_v35 = vmul.f32 %v4823_v34, %v2739_v54  ;;  %v4825_v19 = vpop.eup %4824  ;;  %vm2746_vm1 = vweird.f32 %v4823_v34  ;;  %v2772_v54 = vor.u32 1.1754944e-38, %v2771_v58 }
 0x5f5   :  { %v2761_v57 = vmul.f32 %v4825_v19, %v2759_v49  ;;  %vm2747_vm3 = vmor %vm2745_vm2, %vm2746_vm1  ;;  %vm2766_vm5 = vweird.f32 %v4825_v19  ;;  %v2483_v49 = vpop.f32.mrf.mxu0 }
 0x5f6   :  { %v2742_v3 = vsub.f32 1.0, %v2741_v35  ;;  %vm2767_vm7 = vmor %vm2765_vm6, %vm2766_vm5 }
 0x5f7   :  { %v2762_v18 = vsub.f32 1.0, %v2761_v57 }
 0x5f8   :  { %2986 = vmatpush.bf16.msrb.mxu2 %v6686_v14  ;;  %v2743_v33 = vmul.f32 %v4823_v34, %v2742_v3 }
 0x5f9   :  { %v2763_v45 = vmul.f32 %v4825_v19, %v2762_v18 }
 0x5fa   :  { %v2744_v20 = vadd.f32 %v4823_v34, %v2743_v33 }
 0x5fb   :  { %v2764_v38 = vadd.f32 %v4825_v19, %v2763_v45 }
 0x5fc   :  { %v2748_v36 = vsel %vm2747_vm3, %v4823_v34, %v2744_v20 }
 0x5fd   :  { %v2753_v32 = vsel %vm2750_vm4, %v2752_v11, %v2748_v36  ;;  %v2768_v55 = vsel %vm2767_vm7, %v4825_v19, %v2764_v38  ;;  %v2454_v19 = vpop.f32.mrf.mxu3  ;;  %v6918_v40 = vpop.f32.mrf.mxu0 }
 0x5fe   :  { %v2773_v34 = vsel %vm2770_vm8, %v2772_v54, %v2768_v55  ;;  %v2455_v28 = vadd.f32 %v2454_v19, %v6869_v15 }
 0x5ff   :  { %v2778_v35 = vsub.f32 1.0, %v2773_v34  ;;  %v2780_v33 = vmul.f32 0.0, %v2773_v34 }
 0x605   :  { %v6920_v27 = vpop.f32.mrf.mxu3  ;;  %v6922_v45 = vpop.f32.mrf.mxu0 }
 0x60d   :  { %v6924_v36 = vpop.f32.mrf.mxu3  ;;  %v6926_v41 = vpop.f32.mrf.mxu0 }
 0x615   :  { %v6930_v11 = vpop.f32.mrf.mxu0 }
 0x616   :  { %7182 = vst [vmem:[#allocation6_spill] sm:$0xff] %v6930_v11 }
 0x64e   :  { %v6880_v47 = vpop.f32.mrf.mxu2 }
 0x64f   :  { %7180 = vst [vmem:[#allocation4_spill] sm:$0xff] %v6880_v47 }
 0x656   :  { %v6882_v46 = vpop.f32.mrf.mxu2 }
 0x657   :  { %7181 = vst [vmem:[#allocation5_spill] sm:$0xff] %v6882_v46 }
 0x65e   :  { %v2731_v29 = vpop.f32.mrf.mxu2 }
 0x65f   :  { %v2732_v30 = vadd.f32 %v2731_v29, %v6884_v42  ;;  %v6928_v29 = vpop.f32.mrf.mxu3 }
 0x661   :  { %v2775_v4 = vmul.f32 %v2753_v32, %v2732_v30  ;;  %v6934_v32 = vpop.f32.mrf.mxu0 }
 0x662   :  { %7183 = vst [vmem:[#allocation7_spill] sm:$0xff] %v6934_v32 }
 0x663   :  { %v2776_v63 = vadd.f32 %v2775_v4, %v2482_v26 }
 0x665   :  { %4826 = vtanh.f32 %v2776_v63 }
 0x666   :  { %v2733_v23 = vpop.f32.mrf.mxu2 }
 0x667   :  { %v6932_v30 = vpop.f32.mrf.mxu3 }
 0x669   :  { %v6938_v26 = vpop.f32.mrf.mxu0 }
 0x66a   :  { %7185 = vst [vmem:[#allocation9_spill] sm:$0xff] %v6938_v26 }
 0x66b   :  { %v4827_v3 = vpop.eup %4826 }
 0x66c   :  { %v2779_v57 = vmul.f32 %v4827_v3, %v2778_v35  ;;  %v2426_v35 = vadd.f32 %v6850_v51, %v6862_v7 }
 0x66e   :  { %v6890_v18 = vadd.f32 %v2780_v33, %v2779_v57 }
 0x66f   :  { %v6936_v38 = vpop.f32.mrf.mxu3 }
 0x670   :  { %v2785_v20 = vpack.c.bf16 %v6890_v18, %v6890_v18  ;;  %7184 = vst [vmem:[#allocation8_spill] sm:$0xff] %v6936_v38 }
 0x672   :  { %2794 = vmatmul.bf16.vlgmr.msra.gmra.mxu3 %v2785_v20  ;;  %2807 = vmatmul.bf16.vlgmr.msra.gmra.mxu0 %v2785_v20 }
 0x673   :  { %2820 = vmatmul.bf16.vlgmr.msrb.gmra.mxu1 %v2785_v20  ;;  %2992 = vmatpush.bf16.msra.mxu3 %v6719_v2 }
 0x674   :  { %3056 = vmatpush.bf16.msra.mxu0 %v6373_v21  ;;  %3069 = vmatpush.bf16.msrb.mxu1 %v6607_v37 }
 0x677   :  { %2993 = vmatpush.bf16.msra.mxu3 %v6725_v60  ;;  %v6940_v4 = vpop.f32.mrf.mxu3 }
 0x678   :  { %3057 = vmatpush.bf16.msra.mxu0 %v6394_v50  ;;  %3070 = vmatpush.bf16.msrb.mxu1 %v6617_v6  ;;  %7186 = vst [vmem:[#allocation10_spill] sm:$0xff] %v6940_v4 }
 0x67b   :  { %2994 = vmatpush.bf16.msra.mxu3 %v6739_v59 }
 0x67c   :  { %3058 = vmatpush.bf16.msra.mxu0 %v6415_v52  ;;  %3071 = vmatpush.bf16.msrb.mxu1 %v6628_v44 }
 0x67f   :  { %2995 = vmatpush.bf16.msra.mxu3 %v6757_v61 }
 0x680   :  { %3059 = vmatpush.bf16.msra.mxu0 %v6440_v24  ;;  %3072 = vmatpush.bf16.msrb.mxu1 %v6639_v56 }
 0x683   :  { %2996 = vmatpush.bf16.msra.mxu3 %v6770_v48 }
 0x684   :  { %3060 = vmatpush.bf16.msra.mxu0 %v6462_v8  ;;  %3073 = vmatpush.bf16.msrb.mxu1 %v6650_v1 }
 0x687   :  { %2997 = vmatpush.bf16.msra.mxu3 %v6786_v13 }
 0x688   :  { %3061 = vmatpush.bf16.msra.mxu0 %v6485_v43  ;;  %3074 = vmatpush.bf16.msrb.mxu1 %v6664_v53 }
 0x68b   :  { %2998 = vmatpush.bf16.msra.mxu3 %v6792_v31 }
 0x68c   :  { %3062 = vmatpush.bf16.msra.mxu0 %v6506_v9  ;;  %3075 = vmatpush.bf16.msrb.mxu1 %v6675_v22 }
 0x68f   :  { %2999 = vmatpush.bf16.msra.mxu3 %v6806_v12 }
 0x690   :  { %3063 = vmatpush.bf16.msra.mxu0 %v6533_v17  ;;  %3076 = vmatpush.bf16.msrb.mxu1 %v6686_v14 }
 0x6ef   :  { %v2808_v58 = vpop.f32.mrf.mxu0 }
 0x6f0   :  { %v2809_v63 = vadd.f32 %v2808_v58, %v6867_v0  ;;  %v2821_v55 = vpop.f32.mrf.mxu1 }
 0x6f2   :  { %v2845_v54 = vadd.f32 %v2809_v63, %v2455_v28 }
 0x6f4   :  { %v4476_v23 = vmul.f32 -1.442695, %v2845_v54 }
 0x6f5   :  { %v2795_v34 = vpop.f32.mrf.mxu3 }
 0x6f6   :  { %4828 = vpow2.f32 %v4476_v23  ;;  %v2796_v3 = vadd.f32 %v2795_v34, %v6858_v5 }
 0x6f7   :  { %v2810_v57 = vpop.f32.mrf.mxu0 }
 0x6f8   :  { %v2825_v33 = vadd.f32 %v2796_v3, %v2426_v35  ;;  %v2823_v20 = vpop.f32.mrf.mxu1 }
 0x6fa   :  { %v4475_v26 = vmul.f32 -1.442695, %v2825_v33 }
 0x6fc   :  { %v4829_v4 = vpop.eup %4828  ;;  %4830 = vpow2.f32 %v4475_v26 }
 0x6fd   :  { %v2849_v46 = vadd.f32 1.0, %v4829_v4  ;;  %v2797_v19 = vpop.f32.mrf.mxu3  ;;  %v2822_v4 = vadd.f32 %v2821_v55, %v6884_v42 }
 0x6ff   :  { %4832 = vrcp.f32 %v2849_v46  ;;  %vm2855_vm14 = vweird.f32 %v2849_v46 }
 0x702   :  { %v4831_v58 = vpop.eup %4830 }
 0x703   :  { %v2829_v32 = vadd.f32 1.0, %v4831_v58  ;;  %v2484_v58 = vadd.f32 %v2483_v49, %v6886_v39 }
 0x705   :  { %4834 = vrcp.f32 %v2829_v32  ;;  %v4833_v28 = vpop.eup %4832  ;;  %v2841_v47 = vand.u32 2147483648, %v2829_v32  ;;  %v2839_v35 = vand.u32 2147483647, %v2829_v32  ;;  %vm2835_vm10 = vweird.f32 %v2829_v32 }
 0x706   :  { %v2851_v63 = vmul.f32 %v4833_v28, %v2849_v46  ;;  %vm2856_vm13 = vweird.f32 %v4833_v28 }
 0x707   :  { %v2842_v26 = vor.u32 1.1754944e-38, %v2841_v47  ;;  %vm2840_vm12 = vcmp.eq.f32.partialorder %v2839_v35, 8.507059e+37  ;;  %vm2857_vm15 = vmor %vm2855_vm14, %vm2856_vm13 }
 0x708   :  { %v2852_v51 = vsub.f32 1.0, %v2851_v63  ;;  %v2861_v63 = vand.u32 2147483648, %v2849_v46 }
 0x70a   :  { %v2853_v3 = vmul.f32 %v4833_v28, %v2852_v51 }
 0x70b   :  { %v4835_v54 = vpop.eup %4834 }
 0x70c   :  { %v2831_v38 = vmul.f32 %v4835_v54, %v2829_v32  ;;  %vm2836_vm9 = vweird.f32 %v4835_v54  ;;  %v2854_v20 = vadd.f32 %v4833_v28, %v2853_v3 }
 0x70d   :  { %vm2837_vm11 = vmor %vm2835_vm10, %vm2836_vm9 }
 0x70e   :  { %v2832_v23 = vsub.f32 1.0, %v2831_v38  ;;  %v2858_v51 = vsel %vm2857_vm15, %v4833_v28, %v2854_v20  ;;  %v2429_v28 = vadd.f32 %v6860_v10, %v6862_v7 }
 0x710   :  { %v2833_v34 = vmul.f32 %v4835_v54, %v2832_v23  ;;  %v2859_v23 = vand.u32 2147483647, %v2849_v46 }
 0x712   :  { %v2834_v57 = vadd.f32 %v4835_v54, %v2833_v34  ;;  %v2862_v34 = vor.u32 1.1754944e-38, %v2861_v63  ;;  %vm2860_vm0 = vcmp.eq.f32.partialorder %v2859_v23, 8.507059e+37 }
 0x714   :  { %v2838_v33 = vsel %vm2837_vm11, %v4835_v54, %v2834_v57  ;;  %v2863_v47 = vsel %vm2860_vm0, %v2862_v34, %v2858_v51  ;;  %v2458_v57 = vadd.f32 %v6920_v27, %v6869_v15 }
 0x715   :  { %v2843_v19 = vsel %vm2840_vm12, %v2842_v26, %v2838_v33  ;;  %v2868_v32 = vsub.f32 1.0, %v2863_v47  ;;  %v2870_v35 = vmul.f32 %v2863_v47, %v6890_v18 }
 0x716   :  { %v2865_v38 = vmul.f32 %v2843_v19, %v2822_v4 }
 0x718   :  { %v2866_v11 = vadd.f32 %v2865_v38, %v2484_v58 }
 0x71a   :  { %4836 = vtanh.f32 %v2866_v11 }
 0x720   :  { %v4837_v55 = vpop.eup %4836 }
 0x721   :  { %v2869_v54 = vmul.f32 %v4837_v55, %v2868_v32 }
 0x723   :  { %v6950_v3 = vadd.f32 %v2870_v35, %v2869_v54 }
 0x725   :  { %v2875_v49 = vpack.c.bf16 %v6950_v3, %v6950_v3 }
 0x727   :  { %2884 = vmatmul.bf16.vlgmr.msra.gmra.mxu2 %v2875_v49  ;;  %2897 = vmatmul.bf16.vlgmr.msrb.gmra.mxu3 %v2875_v49 }
 0x728   :  { %2910 = vmatmul.bf16.vlgmr.msrb.gmra.mxu0 %v2875_v49  ;;  %3082 = vmatpush.bf16.msra.mxu2 %v6719_v2 }
 0x729   :  { %3146 = vmatpush.bf16.msrb.mxu3 %v6373_v21  ;;  %3159 = vmatpush.bf16.msrb.mxu0 %v6607_v37 }
 0x72c   :  { %3083 = vmatpush.bf16.msra.mxu2 %v6725_v60 }
 0x72d   :  { %3147 = vmatpush.bf16.msrb.mxu3 %v6394_v50  ;;  %3160 = vmatpush.bf16.msrb.mxu0 %v6617_v6 }
 0x730   :  { %3084 = vmatpush.bf16.msra.mxu2 %v6739_v59 }
 0x731   :  { %3148 = vmatpush.bf16.msrb.mxu3 %v6415_v52  ;;  %3161 = vmatpush.bf16.msrb.mxu0 %v6628_v44 }
 0x734   :  { %3085 = vmatpush.bf16.msra.mxu2 %v6757_v61 }
 0x735   :  { %3149 = vmatpush.bf16.msrb.mxu3 %v6440_v24  ;;  %3162 = vmatpush.bf16.msrb.mxu0 %v6639_v56 }
 0x738   :  { %3086 = vmatpush.bf16.msra.mxu2 %v6770_v48 }
 0x739   :  { %3150 = vmatpush.bf16.msrb.mxu3 %v6462_v8  ;;  %3163 = vmatpush.bf16.msrb.mxu0 %v6650_v1 }
 0x73c   :  { %3087 = vmatpush.bf16.msra.mxu2 %v6786_v13 }
 0x73d   :  { %3151 = vmatpush.bf16.msrb.mxu3 %v6485_v43  ;;  %3164 = vmatpush.bf16.msrb.mxu0 %v6664_v53 }
 0x740   :  { %3088 = vmatpush.bf16.msra.mxu2 %v6792_v31 }
 0x741   :  { %3152 = vmatpush.bf16.msrb.mxu3 %v6506_v9  ;;  %3165 = vmatpush.bf16.msrb.mxu0 %v6675_v22 }
 0x744   :  { %3089 = vmatpush.bf16.msra.mxu2 %v6806_v12 }
 0x745   :  { %3153 = vmatpush.bf16.msrb.mxu3 %v6533_v17  ;;  %3166 = vmatpush.bf16.msrb.mxu0 %v6686_v14 }
 0x7a5   :  { %v2911_v46 = vpop.f32.mrf.mxu0 }
 0x7aa   :  { %v2885_v18 = vpop.f32.mrf.mxu2  ;;  %v2898_v11 = vpop.f32.mrf.mxu3 }
 0x7ab   :  { %v2886_v26 = vadd.f32 %v2885_v18, %v6858_v5  ;;  %v2899_v4 = vadd.f32 %v2898_v11, %v6867_v0 }
 0x7ad   :  { %v2915_v33 = vadd.f32 %v2886_v26, %v2429_v28  ;;  %v2935_v20 = vadd.f32 %v2899_v4, %v2458_v57  ;;  %v2913_v19 = vpop.f32.mrf.mxu0 }
 0x7af   :  { %v4477_v58 = vmul.f32 -1.442695, %v2915_v33  ;;  %v4478_v63 = vmul.f32 -1.442695, %v2935_v20  ;;  %v2912_v33 = vadd.f32 %v2911_v46, %v6884_v42 }
 0x7b1   :  { %4838 = vpow2.f32 %v4477_v58 }
 0x7b2   :  { %4840 = vpow2.f32 %v4478_v63  ;;  %v2887_v38 = vpop.f32.mrf.mxu2  ;;  %v2900_v23 = vpop.f32.mrf.mxu3  ;;  %v2487_v63 = vadd.f32 %v6918_v40, %v6886_v39 }
 0x7b7   :  { %v4839_v51 = vpop.eup %4838 }
 0x7b8   :  { %v4841_v34 = vpop.eup %4840  ;;  %v2919_v47 = vadd.f32 1.0, %v4839_v51 }
 0x7b9   :  { %v2939_v10 = vadd.f32 1.0, %v4841_v34 }
 0x7ba   :  { %4842 = vrcp.f32 %v2919_v47  ;;  %v2931_v49 = vand.u32 2147483648, %v2919_v47  ;;  %v2929_v28 = vand.u32 2147483647, %v2919_v47  ;;  %vm2925_vm2 = vweird.f32 %v2919_v47 }
 0x7bb   :  { %4844 = vrcp.f32 %v2939_v10  ;;  %v2951_v23 = vand.u32 2147483648, %v2939_v10  ;;  %vm2945_vm6 = vweird.f32 %v2939_v10  ;;  %v2949_v51 = vand.u32 2147483647, %v2939_v10 }
 0x7bc   :  { %v2932_v4 = vor.u32 1.1754944e-38, %v2931_v49  ;;  %vm2930_vm4 = vcmp.eq.f32.partialorder %v2929_v28, 8.507059e+37 }
 0x7bd   :  { %vm2950_vm8 = vcmp.eq.f32.partialorder %v2949_v51, 8.507059e+37 }
 0x7c0   :  { %v4843_v27 = vpop.eup %4842 }
 0x7c1   :  { %v4845_v32 = vpop.eup %4844  ;;  %v2921_v55 = vmul.f32 %v4843_v27, %v2919_v47  ;;  %vm2926_vm1 = vweird.f32 %v4843_v27  ;;  %v2952_v47 = vor.u32 1.1754944e-38, %v2951_v23 }
 0x7c2   :  { %v2941_v54 = vmul.f32 %v4845_v32, %v2939_v10  ;;  %vm2927_vm3 = vmor %vm2925_vm2, %vm2926_vm1  ;;  %vm2946_vm5 = vweird.f32 %v4845_v32  ;;  %v2431_v10 = vadd.f32 %v6871_v62, %v6862_v7 }
 0x7c3   :  { %v2922_v35 = vsub.f32 1.0, %v2921_v55  ;;  %vm2947_vm7 = vmor %vm2945_vm6, %vm2946_vm5 }
 0x7c4   :  { %v2942_v18 = vsub.f32 1.0, %v2941_v54 }
 0x7c5   :  { %v2923_v11 = vmul.f32 %v4843_v27, %v2922_v35 }
 0x7c6   :  { %v2943_v57 = vmul.f32 %v4845_v32, %v2942_v18 }
 0x7c7   :  { %v2924_v26 = vadd.f32 %v4843_v27, %v2923_v11 }
 0x7c8   :  { %v2944_v58 = vadd.f32 %v4845_v32, %v2943_v57 }
 0x7c9   :  { %v2928_v20 = vsel %vm2927_vm3, %v4843_v27, %v2924_v26  ;;  %v2460_v26 = vadd.f32 %v6924_v36, %v6869_v15 }
 0x7ca   :  { %v2933_v19 = vsel %vm2930_vm4, %v2932_v4, %v2928_v20  ;;  %v2948_v55 = vsel %vm2947_vm7, %v4845_v32, %v2944_v58 }
 0x7cb   :  { %v2955_v38 = vmul.f32 %v2933_v19, %v2912_v33  ;;  %v2953_v54 = vsel %vm2950_vm8, %v2952_v47, %v2948_v55 }
 0x7cc   :  { %v2958_v46 = vsub.f32 1.0, %v2953_v54  ;;  %v2960_v49 = vmul.f32 %v2953_v54, %v6950_v3 }
 0x7cd   :  { %v2956_v34 = vadd.f32 %v2955_v38, %v2487_v63 }
 0x7cf   :  { %4846 = vtanh.f32 %v2956_v34 }
 0x7d5   :  { %v4847_v27 = vpop.eup %4846 }
 0x7d6   :  { %v2959_v35 = vmul.f32 %v4847_v27, %v2958_v46 }
 0x7d8   :  { %v6988_v18 = vadd.f32 %v2960_v49, %v2959_v35 }
 0x7da   :  { %v2965_v40 = vpack.c.bf16 %v6988_v18, %v6988_v18 }
 0x7dc   :  { %2974 = vmatmul.bf16.vlgmr.msra.gmra.mxu1 %v2965_v40  ;;  %2987 = vmatmul.bf16.vlgmr.msrb.gmra.mxu2 %v2965_v40 }
 0x7dd   :  { %3000 = vmatmul.bf16.vlgmr.msra.gmra.mxu3 %v2965_v40  ;;  %3172 = vmatpush.bf16.msra.mxu1 %v6719_v2 }
 0x7de   :  { %3236 = vmatpush.bf16.msrb.mxu2 %v6373_v21  ;;  %3249 = vmatpush.bf16.msra.mxu3 %v6607_v37 }
 0x7e1   :  { %3173 = vmatpush.bf16.msra.mxu1 %v6725_v60 }
 0x7e2   :  { %3237 = vmatpush.bf16.msrb.mxu2 %v6394_v50  ;;  %3250 = vmatpush.bf16.msra.mxu3 %v6617_v6 }
 0x7e5   :  { %3174 = vmatpush.bf16.msra.mxu1 %v6739_v59 }
 0x7e6   :  { %3238 = vmatpush.bf16.msrb.mxu2 %v6415_v52  ;;  %3251 = vmatpush.bf16.msra.mxu3 %v6628_v44 }
 0x7e9   :  { %3175 = vmatpush.bf16.msra.mxu1 %v6757_v61 }
 0x7ea   :  { %3239 = vmatpush.bf16.msrb.mxu2 %v6440_v24  ;;  %3252 = vmatpush.bf16.msra.mxu3 %v6639_v56 }
 0x7ed   :  { %3176 = vmatpush.bf16.msra.mxu1 %v6770_v48 }
 0x7ee   :  { %3240 = vmatpush.bf16.msrb.mxu2 %v6462_v8  ;;  %3253 = vmatpush.bf16.msra.mxu3 %v6650_v1 }
 0x7f1   :  { %3177 = vmatpush.bf16.msra.mxu1 %v6786_v13 }
 0x7f2   :  { %3241 = vmatpush.bf16.msrb.mxu2 %v6485_v43  ;;  %3254 = vmatpush.bf16.msra.mxu3 %v6664_v53 }
 0x7f5   :  { %3178 = vmatpush.bf16.msra.mxu1 %v6792_v31 }
 0x7f6   :  { %3242 = vmatpush.bf16.msrb.mxu2 %v6506_v9  ;;  %3255 = vmatpush.bf16.msra.mxu3 %v6675_v22 }
 0x7f9   :  { %3179 = vmatpush.bf16.msra.mxu1 %v6806_v12 }
 0x7fa   :  { %3243 = vmatpush.bf16.msrb.mxu2 %v6533_v17  ;;  %3256 = vmatpush.bf16.msra.mxu3 %v6686_v14 }
 0x859   :  { %v2975_v3 = vpop.f32.mrf.mxu1 }
 0x85a   :  { %v2976_v32 = vadd.f32 %v2975_v3, %v6858_v5 }
 0x85c   :  { %v3005_v11 = vadd.f32 %v2976_v32, %v2431_v10 }
 0x85e   :  { %v4479_v28 = vmul.f32 -1.442695, %v3005_v11 }
 0x85f   :  { %v2988_v57 = vpop.f32.mrf.mxu2 }
 0x860   :  { %4848 = vpow2.f32 %v4479_v28  ;;  %v2989_v4 = vadd.f32 %v2988_v57, %v6867_v0  ;;  %v3001_v33 = vpop.f32.mrf.mxu3  ;;  %v2489_v28 = vadd.f32 %v6922_v45, %v6886_v39 }
 0x861   :  { %v2977_v20 = vpop.f32.mrf.mxu1  ;;  %v3002_v32 = vadd.f32 %v3001_v33, %v6884_v42 }
 0x862   :  { %v3025_v19 = vadd.f32 %v2989_v4, %v2460_v26 }
 0x864   :  { %v4480_v58 = vmul.f32 -1.442695, %v3025_v19 }
 0x866   :  { %v4849_v63 = vpop.eup %4848  ;;  %4850 = vpow2.f32 %v4480_v58 }
 0x867   :  { %v3009_v38 = vadd.f32 1.0, %v4849_v63  ;;  %v2990_v23 = vpop.f32.mrf.mxu2 }
 0x868   :  { %v3003_v62 = vpop.f32.mrf.mxu3 }
 0x869   :  { %4852 = vrcp.f32 %v3009_v38  ;;  %v3021_v36 = vand.u32 2147483648, %v3009_v38  ;;  %v3019_v27 = vand.u32 2147483647, %v3009_v38  ;;  %vm3015_vm10 = vweird.f32 %v3009_v38 }
 0x86b   :  { %v3022_v3 = vor.u32 1.1754944e-38, %v3021_v36  ;;  %vm3020_vm12 = vcmp.eq.f32.partialorder %v3019_v27, 8.507059e+37 }
 0x86c   :  { %v4851_v51 = vpop.eup %4850 }
 0x86d   :  { %v3029_v34 = vadd.f32 1.0, %v4851_v51 }
 0x86f   :  { %v4853_v55 = vpop.eup %4852  ;;  %4854 = vrcp.f32 %v3029_v34  ;;  %v3041_v4 = vand.u32 2147483648, %v3029_v34  ;;  %v3039_v19 = vand.u32 2147483647, %v3029_v34  ;;  %vm3035_vm14 = vweird.f32 %v3029_v34 }
 0x870   :  { %v3011_v47 = vmul.f32 %v4853_v55, %v3009_v38  ;;  %vm3016_vm9 = vweird.f32 %v4853_v55 }
 0x871   :  { %vm3017_vm11 = vmor %vm3015_vm10, %vm3016_vm9  ;;  %v3042_v38 = vor.u32 1.1754944e-38, %v3041_v4  ;;  %vm3040_vm0 = vcmp.eq.f32.partialorder %v3039_v19, 8.507059e+37 }
 0x872   :  { %v3012_v54 = vsub.f32 1.0, %v3011_v47 }
 0x874   :  { %v3013_v46 = vmul.f32 %v4853_v55, %v3012_v54 }
 0x875   :  { %v4855_v35 = vpop.eup %4854 }
 0x876   :  { %v3031_v49 = vmul.f32 %v4855_v35, %v3029_v34  ;;  %v3014_v40 = vadd.f32 %v4853_v55, %v3013_v46  ;;  %vm3036_vm13 = vweird.f32 %v4855_v35 }
 0x877   :  { %vm3037_vm15 = vmor %vm3035_vm14, %vm3036_vm13 }
 0x878   :  { %v3032_v10 = vsub.f32 1.0, %v3031_v49  ;;  %v3018_v11 = vsel %vm3017_vm11, %v4853_v55, %v3014_v40 }
 0x879   :  { %v3023_v57 = vsel %vm3020_vm12, %v3022_v3, %v3018_v11 }
 0x87a   :  { %v3033_v26 = vmul.f32 %v4855_v35, %v3032_v10  ;;  %v3045_v20 = vmul.f32 %v3023_v57, %v3002_v32 }
 0x87c   :  { %v3034_v58 = vadd.f32 %v4855_v35, %v3033_v26  ;;  %v3046_v63 = vadd.f32 %v3045_v20, %v2489_v28  ;;  %v2492_v20 = vadd.f32 %v6926_v41, %v6886_v39 }
 0x87e   :  { %v3038_v23 = vsel %vm3037_vm15, %v4855_v35, %v3034_v58  ;;  %4856 = vtanh.f32 %v3046_v63 }
 0x87f   :  { %v3043_v33 = vsel %vm3040_vm0, %v3042_v38, %v3038_v23 }
 0x880   :  { %v3048_v62 = vsub.f32 1.0, %v3043_v33  ;;  %v3050_v45 = vmul.f32 %v3043_v33, %v6988_v18 }
 0x884   :  { %v4857_v51 = vpop.eup %4856 }
 0x885   :  { %v3049_v55 = vmul.f32 %v4857_v51, %v3048_v62 }
 0x887   :  { %v7026_v47 = vadd.f32 %v3050_v45, %v3049_v55 }
 0x889   :  { %v3055_v54 = vpack.c.bf16 %v7026_v47, %v7026_v47 }
 0x88b   :  { %3064 = vmatmul.bf16.vlgmr.msra.gmra.mxu0 %v3055_v54  ;;  %3077 = vmatmul.bf16.vlgmr.msrb.gmra.mxu1 %v3055_v54 }
 0x88c   :  { %3090 = vmatmul.bf16.vlgmr.msra.gmra.mxu2 %v3055_v54  ;;  %3262 = vmatpush.bf16.msra.mxu0 %v6719_v2 }
 0x88d   :  { %3326 = vmatpush.bf16.msrb.mxu1 %v6373_v21  ;;  %3339 = vmatpush.bf16.msra.mxu2 %v6607_v37 }
 0x890   :  { %3263 = vmatpush.bf16.msra.mxu0 %v6725_v60 }
 0x891   :  { %3327 = vmatpush.bf16.msrb.mxu1 %v6394_v50  ;;  %3340 = vmatpush.bf16.msra.mxu2 %v6617_v6 }
 0x894   :  { %3264 = vmatpush.bf16.msra.mxu0 %v6739_v59 }
 0x895   :  { %3328 = vmatpush.bf16.msrb.mxu1 %v6415_v52  ;;  %3341 = vmatpush.bf16.msra.mxu2 %v6628_v44  ;;  %v2434_v52 = vadd.f32 %v6876_v16, %v6862_v7 }
 0x898   :  { %3265 = vmatpush.bf16.msra.mxu0 %v6757_v61 }
 0x899   :  { %3329 = vmatpush.bf16.msrb.mxu1 %v6440_v24  ;;  %3342 = vmatpush.bf16.msra.mxu2 %v6639_v56  ;;  %v2463_v24 = vadd.f32 %v6928_v29, %v6869_v15 }
 0x89c   :  { %3266 = vmatpush.bf16.msra.mxu0 %v6770_v48 }
 0x89d   :  { %3330 = vmatpush.bf16.msrb.mxu1 %v6462_v8  ;;  %3343 = vmatpush.bf16.msra.mxu2 %v6650_v1 }
 0x8a0   :  { %3267 = vmatpush.bf16.msra.mxu0 %v6786_v13 }
 0x8a1   :  { %3331 = vmatpush.bf16.msrb.mxu1 %v6485_v43  ;;  %3344 = vmatpush.bf16.msra.mxu2 %v6664_v53 }
 0x8a4   :  { %3268 = vmatpush.bf16.msra.mxu0 %v6792_v31 }
 0x8a5   :  { %3332 = vmatpush.bf16.msrb.mxu1 %v6506_v9  ;;  %3345 = vmatpush.bf16.msra.mxu2 %v6675_v22 }
 0x8a8   :  { %3269 = vmatpush.bf16.msra.mxu0 %v6806_v12 }
 0x8a9   :  { %3333 = vmatpush.bf16.msrb.mxu1 %v6533_v17  ;;  %3346 = vmatpush.bf16.msra.mxu2 %v6686_v14 }
 0x908   :  { %v3065_v21 = vpop.f32.mrf.mxu0  ;;  %v3078_v50 = vpop.f32.mrf.mxu1 }
 0x909   :  { %v3066_v8 = vadd.f32 %v3065_v21, %v6858_v5  ;;  %v3079_v43 = vadd.f32 %v3078_v50, %v6867_v0  ;;  %v2465_v50 = vadd.f32 %v6932_v30, %v6869_v15 }
 0x90b   :  { %v3095_v9 = vadd.f32 %v3066_v8, %v2434_v52  ;;  %v3115_v37 = vadd.f32 %v3079_v43, %v2463_v24 }
 0x90d   :  { %v4481_v6 = vmul.f32 -1.442695, %v3095_v9  ;;  %v4482_v44 = vmul.f32 -1.442695, %v3115_v37 }
 0x90f   :  { %4858 = vpow2.f32 %v4481_v6  ;;  %v3091_v17 = vpop.f32.mrf.mxu2 }
 0x910   :  { %4860 = vpow2.f32 %v4482_v44  ;;  %v3067_v56 = vpop.f32.mrf.mxu0  ;;  %v3080_v1 = vpop.f32.mrf.mxu1  ;;  %v3092_v28 = vadd.f32 %v3091_v17, %v6884_v42 }
 0x915   :  { %v4859_v53 = vpop.eup %4858 }
 0x916   :  { %v4861_v22 = vpop.eup %4860  ;;  %v3099_v14 = vadd.f32 1.0, %v4859_v53 }
 0x917   :  { %v3119_v16 = vadd.f32 1.0, %v4861_v22  ;;  %v3093_v18 = vpop.f32.mrf.mxu2 }
 0x918   :  { %4862 = vrcp.f32 %v3099_v14  ;;  %v3111_v49 = vand.u32 2147483648, %v3099_v14  ;;  %v3109_v3 = vand.u32 2147483647, %v3099_v14  ;;  %vm3105_vm2 = vweird.f32 %v3099_v14 }
 0x919   :  { %4864 = vrcp.f32 %v3119_v16  ;;  %v3131_v19 = vand.u32 2147483648, %v3119_v16  ;;  %vm3125_vm6 = vweird.f32 %v3119_v16  ;;  %v3129_v63 = vand.u32 2147483647, %v3119_v16 }
 0x91a   :  { %v3112_v11 = vor.u32 1.1754944e-38, %v3111_v49  ;;  %vm3110_vm4 = vcmp.eq.f32.partialorder %v3109_v3, 8.507059e+37  ;;  %v7187_v49 = vld [vmem:[#allocation6_spill] sm:$0xff] }
 0x91b   :  { %v3132_v33 = vor.u32 1.1754944e-38, %v3131_v19  ;;  %vm3130_vm8 = vcmp.eq.f32.partialorder %v3129_v63, 8.507059e+37 }
 0x91e   :  { %v4863_v29 = vpop.eup %4862 }
 0x91f   :  { %v4865_v34 = vpop.eup %4864  ;;  %v3101_v36 = vmul.f32 %v4863_v29, %v3099_v14  ;;  %vm3106_vm1 = vweird.f32 %v4863_v29 }
 0x920   :  { %v3121_v46 = vmul.f32 %v4865_v34, %v3119_v16  ;;  %vm3107_vm3 = vmor %vm3105_vm2, %vm3106_vm1  ;;  %vm3126_vm5 = vweird.f32 %v4865_v34 }
 0x921   :  { %v3102_v27 = vsub.f32 1.0, %v3101_v36  ;;  %vm3127_vm7 = vmor %vm3125_vm6, %vm3126_vm5 }
 0x922   :  { %v3122_v35 = vsub.f32 1.0, %v3121_v46 }
 0x923   :  { %v3103_v40 = vmul.f32 %v4863_v29, %v3102_v27 }
 0x924   :  { %v3123_v10 = vmul.f32 %v4865_v34, %v3122_v35 }
 0x925   :  { %v3104_v32 = vadd.f32 %v4863_v29, %v3103_v40  ;;  %v2494_v40 = vadd.f32 %v7187_v49, %v6886_v39 }
 0x926   :  { %v3124_v4 = vadd.f32 %v4865_v34, %v3123_v10 }
 0x927   :  { %v3108_v57 = vsel %vm3107_vm3, %v4863_v29, %v3104_v32 }
 0x928   :  { %v3113_v26 = vsel %vm3110_vm4, %v3112_v11, %v3108_v57  ;;  %v3128_v23 = vsel %vm3127_vm7, %v4865_v34, %v3124_v4 }
 0x929   :  { %v3135_v58 = vmul.f32 %v3113_v26, %v3092_v28  ;;  %v3133_v62 = vsel %vm3130_vm8, %v3132_v33, %v3128_v23 }
 0x92a   :  { %v3138_v51 = vsub.f32 1.0, %v3133_v62  ;;  %v3140_v54 = vmul.f32 %v3133_v62, %v7026_v47 }
 0x92b   :  { %v3136_v38 = vadd.f32 %v3135_v58, %v2492_v20 }
 0x92d   :  { %4866 = vtanh.f32 %v3136_v38 }
 0x933   :  { %v4867_v55 = vpop.eup %4866 }
 0x934   :  { %v3139_v45 = vmul.f32 %v4867_v55, %v3138_v51  ;;  %v7188_v51 = vld [vmem:[#allocation4_spill] sm:$0xff] }
 0x935   :  { %v2439_v55 = vadd.f32 %v7188_v51, %v6862_v7 }
 0x936   :  { %v7064_v21 = vadd.f32 %v3140_v54, %v3139_v45  ;;  %v7189_v45 = vld [vmem:[#allocation8_spill] sm:$0xff] }
 0x937   :  { %v2468_v54 = vadd.f32 %v7189_v45, %v6869_v15 }
 0x938   :  { %v3145_v41 = vpack.c.bf16 %v7064_v21, %v7064_v21 }
 0x93a   :  { %3154 = vmatmul.bf16.vlgmr.msrb.gmra.mxu3 %v3145_v41  ;;  %3167 = vmatmul.bf16.vlgmr.msrb.gmra.mxu0 %v3145_v41 }
 0x93b   :  { %3180 = vmatmul.bf16.vlgmr.msra.gmra.mxu1 %v3145_v41  ;;  %3352 = vmatpush.bf16.msrb.mxu3 %v6719_v2 }
 0x93f   :  { %3353 = vmatpush.bf16.msrb.mxu3 %v6725_v60 }
 0x943   :  { %3354 = vmatpush.bf16.msrb.mxu3 %v6739_v59 }
 0x947   :  { %3355 = vmatpush.bf16.msrb.mxu3 %v6757_v61  ;;  %v2436_v61 = vadd.f32 %v6878_v25, %v6862_v7 }
 0x94b   :  { %3356 = vmatpush.bf16.msrb.mxu3 %v6770_v48 }
 0x94f   :  { %3357 = vmatpush.bf16.msrb.mxu3 %v6786_v13 }
 0x953   :  { %3358 = vmatpush.bf16.msrb.mxu3 %v6792_v31 }
 0x957   :  { %3359 = vmatpush.bf16.msrb.mxu3 %v6806_v12 }
 0x9b7   :  { %v3168_v47 = vpop.f32.mrf.mxu0 }
 0x9b8   :  { %v3169_v2 = vadd.f32 %v3168_v47, %v6867_v0  ;;  %v3181_v52 = vpop.f32.mrf.mxu1 }
 0x9b9   :  { %v3182_v36 = vadd.f32 %v3181_v52, %v6884_v42 }
 0x9ba   :  { %v3205_v60 = vadd.f32 %v3169_v2, %v2465_v50 }
 0x9bc   :  { %v4484_v24 = vmul.f32 -1.442695, %v3205_v60 }
 0x9bd   :  { %v3155_v59 = vpop.f32.mrf.mxu3 }
 0x9be   :  { %4868 = vpow2.f32 %v4484_v24  ;;  %v3156_v48 = vadd.f32 %v3155_v59, %v6858_v5 }
 0x9bf   :  { %v3170_v13 = vpop.f32.mrf.mxu0 }
 0x9c0   :  { %v3185_v31 = vadd.f32 %v3156_v48, %v2436_v61  ;;  %v3183_v8 = vpop.f32.mrf.mxu1 }
 0x9c2   :  { %v4483_v12 = vmul.f32 -1.442695, %v3185_v31 }
 0x9c4   :  { %v4869_v43 = vpop.eup %4868  ;;  %4870 = vpow2.f32 %v4483_v12 }
 0x9c5   :  { %v3209_v9 = vadd.f32 1.0, %v4869_v43  ;;  %v3157_v30 = vpop.f32.mrf.mxu3 }
 0x9c7   :  { %4872 = vrcp.f32 %v3209_v9  ;;  %v3221_v3 = vand.u32 2147483648, %v3209_v9  ;;  %vm3215_vm14 = vweird.f32 %v3209_v9  ;;  %v3219_v32 = vand.u32 2147483647, %v3209_v9 }
 0x9c9   :  { %v3222_v57 = vor.u32 1.1754944e-38, %v3221_v3  ;;  %vm3220_vm0 = vcmp.eq.f32.partialorder %v3219_v32, 8.507059e+37 }
 0x9ca   :  { %v4871_v37 = vpop.eup %4870 }
 0x9cb   :  { %v3189_v6 = vadd.f32 1.0, %v4871_v37 }
 0x9cd   :  { %4874 = vrcp.f32 %v3189_v6  ;;  %v4873_v44 = vpop.eup %4872  ;;  %v3201_v22 = vand.u32 2147483648, %v3189_v6  ;;  %v3199_v16 = vand.u32 2147483647, %v3189_v6  ;;  %vm3195_vm10 = vweird.f32 %v3189_v6 }
 0x9ce   :  { %v3211_v17 = vmul.f32 %v4873_v44, %v3209_v9  ;;  %vm3216_vm13 = vweird.f32 %v4873_v44 }
 0x9cf   :  { %v3202_v34 = vor.u32 1.1754944e-38, %v3201_v22  ;;  %vm3200_vm12 = vcmp.eq.f32.partialorder %v3199_v16, 8.507059e+37  ;;  %vm3217_vm15 = vmor %vm3215_vm14, %vm3216_vm13 }
 0x9d0   :  { %v3212_v25 = vsub.f32 1.0, %v3211_v17 }
 0x9d2   :  { %v3213_v18 = vmul.f32 %v4873_v44, %v3212_v25 }
 0x9d3   :  { %v4875_v56 = vpop.eup %4874 }
 0x9d4   :  { %v3191_v1 = vmul.f32 %v4875_v56, %v3189_v6  ;;  %vm3196_vm9 = vweird.f32 %v4875_v56  ;;  %v3214_v27 = vadd.f32 %v4873_v44, %v3213_v18  ;;  %v7190_v18 = vld [vmem:[#allocation7_spill] sm:$0xff] }
 0x9d5   :  { %vm3197_vm11 = vmor %vm3195_vm10, %vm3196_vm9 }
 0x9d6   :  { %v3192_v53 = vsub.f32 1.0, %v3191_v1  ;;  %v3218_v28 = vsel %vm3217_vm15, %v4873_v44, %v3214_v27 }
 0x9d7   :  { %v3223_v26 = vsel %vm3220_vm0, %v3222_v57, %v3218_v28 }
 0x9d8   :  { %v3193_v14 = vmul.f32 %v4875_v56, %v3192_v53  ;;  %v3228_v4 = vsub.f32 1.0, %v3223_v26  ;;  %v3230_v58 = vmul.f32 %v3223_v26, %v7064_v21  ;;  %v3427_v26 = vld [vmem:[%s7178_s9 + $0x78] sm:$0xff] }
 0x9d9   :  { %3432 = vmatpush.msrb.mxu0 %v3427_v26 }
 0x9da   :  { %v3194_v29 = vadd.f32 %v4875_v56, %v3193_v14 }
 0x9dc   :  { %v3198_v46 = vsel %vm3197_vm11, %v4875_v56, %v3194_v29  ;;  %v2497_v29 = vadd.f32 %v7190_v18, %v6886_v39 }
 0x9dd   :  { %v3203_v35 = vsel %vm3200_vm12, %v3202_v34, %v3198_v46 }
 0x9de   :  { %v3225_v10 = vmul.f32 %v3203_v35, %v3182_v36 }
 0x9e0   :  { %v3226_v11 = vadd.f32 %v3225_v10, %v2494_v40 }
 0x9e2   :  { %4876 = vtanh.f32 %v3226_v11 }
 0x9e8   :  { %v4877_v20 = vpop.eup %4876 }
 0x9e9   :  { %v3229_v19 = vmul.f32 %v4877_v20, %v3228_v4  ;;  %v3426_v4 = vld [vmem:[%s7178_s9 + $0x70] sm:$0xff]  ;;  %v3425_v20 = vld [vmem:[%s7178_s9 + $0x68] sm:$0xff] }
 0x9ea   :  { %3433 = vmatpush.msrb.mxu0 %v3426_v4 }
 0x9eb   :  { %v7086_v63 = vadd.f32 %v3230_v58, %v3229_v19  ;;  %v3424_v19 = vld [vmem:[%s7178_s9 + $0x60] sm:$0xff]  ;;  %v3423_v58 = vld [vmem:[%s7178_s9 + $0x58] sm:$0xff] }
 0x9ec   :  { %3434 = vmatpush.msrb.mxu0 %v3425_v20 }
 0x9ed   :  { %v3235_v38 = vpack.c.bf16 %v7086_v63, %v7086_v63 }
 0x9ee   :  { %3435 = vmatpush.msrb.mxu0 %v3424_v19  ;;  %v4737_v19 = vld [vmem:[%s7177_s10] ss:$0 sm:$0xff] }
 0x9ef   :  { %3244 = vmatmul.bf16.vlgmr.msrb.gmra.mxu2 %v3235_v38  ;;  %3257 = vmatmul.bf16.vlgmr.msra.gmra.mxu3 %v3235_v38 }
 0x9f0   :  { %3270 = vmatmul.bf16.vlgmr.msra.gmra.mxu0 %v3235_v38  ;;  %v3421_v38 = vld [vmem:[%s7178_s9 + $0x48] sm:$0xff] }
 0x9f1   :  { %3436 = vmatpush.msrb.mxu0 %v3423_v58 }
 0xa6d   :  { %v3271_v23 = vpop.f32.mrf.mxu0 }
 0xa6e   :  { %v3272_v53 = vadd.f32 %v3271_v23, %v6884_v42 }
 0xa72   :  { %v3245_v33 = vpop.f32.mrf.mxu2  ;;  %v3258_v62 = vpop.f32.mrf.mxu3 }
 0xa73   :  { %v3246_v41 = vadd.f32 %v3245_v33, %v6858_v5  ;;  %v3259_v21 = vadd.f32 %v3258_v62, %v6867_v0  ;;  %v7191_v33 = vld [vmem:[#allocation5_spill] sm:$0xff] }
 0xa74   :  { %v2441_v62 = vadd.f32 %v7191_v33, %v6862_v7 }
 0xa75   :  { %v3275_v47 = vadd.f32 %v3246_v41, %v2439_v55  ;;  %v3295_v50 = vadd.f32 %v3259_v21, %v2468_v54  ;;  %v3273_v2 = vpop.f32.mrf.mxu0  ;;  %v3420_v55 = vld [vmem:[%s7178_s9 + $0x40] sm:$0xff]  ;;  %v3419_v54 = vld [vmem:[%s7178_s9 + $0x38] sm:$0xff]  ;;  %v3418_v21 = vld [vmem:[%s7178_s9 + $0x30] sm:$0xff] }
 0xa77   :  { %v4485_v52 = vmul.f32 -1.442695, %v3275_v47  ;;  %v4486_v60 = vmul.f32 -1.442695, %v3295_v50 }
 0xa79   :  { %4878 = vpow2.f32 %v4485_v52  ;;  %v3417_v52 = vld [vmem:[%s7178_s9 + $0x28] sm:$0xff] }
 0xa7a   :  { %4880 = vpow2.f32 %v4486_v60  ;;  %v3247_v24 = vpop.f32.mrf.mxu2  ;;  %v3260_v59 = vpop.f32.mrf.mxu3 }
 0xa7b   :  { %v3416_v59 = vld [vmem:[%s7178_s9 + $0x20] sm:$0xff] }
 0xa7f   :  { %v4879_v61 = vpop.eup %4878 }
 0xa80   :  { %v4881_v48 = vpop.eup %4880  ;;  %v3279_v13 = vadd.f32 1.0, %v4879_v61 }
 0xa81   :  { %v3299_v31 = vadd.f32 1.0, %v4881_v48 }
 0xa82   :  { %4882 = vrcp.f32 %v3279_v13  ;;  %v3291_v37 = vand.u32 2147483648, %v3279_v13  ;;  %v3289_v17 = vand.u32 2147483647, %v3279_v13  ;;  %vm3285_vm2 = vweird.f32 %v3279_v13 }
 0xa83   :  { %4884 = vrcp.f32 %v3299_v31  ;;  %v3311_v36 = vand.u32 2147483648, %v3299_v31  ;;  %vm3305_vm6 = vweird.f32 %v3299_v31  ;;  %v3309_v46 = vand.u32 2147483647, %v3299_v31 }
 0xa84   :  { %v3292_v25 = vor.u32 1.1754944e-38, %v3291_v37  ;;  %vm3290_vm4 = vcmp.eq.f32.partialorder %v3289_v17, 8.507059e+37 }
 0xa85   :  { %v3312_v49 = vor.u32 1.1754944e-38, %v3311_v36  ;;  %vm3310_vm8 = vcmp.eq.f32.partialorder %v3309_v46, 8.507059e+37 }
 0xa88   :  { %v4883_v8 = vpop.eup %4882 }
 0xa89   :  { %v4885_v12 = vpop.eup %4884  ;;  %v3281_v43 = vmul.f32 %v4883_v8, %v3279_v13  ;;  %vm3286_vm1 = vweird.f32 %v4883_v8  ;;  %v3413_v13 = vld [vmem:[%s7178_s9 + $0x8] sm:$0xff] }
 0xa8a   :  { %v3301_v9 = vmul.f32 %v4885_v12, %v3299_v31  ;;  %vm3287_vm3 = vmor %vm3285_vm2, %vm3286_vm1  ;;  %vm3306_vm5 = vweird.f32 %v4885_v12 }
 0xa8b   :  { %v3282_v30 = vsub.f32 1.0, %v3281_v43  ;;  %vm3307_vm7 = vmor %vm3305_vm6, %vm3306_vm5  ;;  %v3412_v43 = vld [vmem:[%s7178_s9] sm:$0xff] }
 0xa8c   :  { %v3302_v6 = vsub.f32 1.0, %v3301_v9 }
 0xa8d   :  { %v3283_v44 = vmul.f32 %v4883_v8, %v3282_v30 }
 0xa8e   :  { %v3303_v56 = vmul.f32 %v4885_v12, %v3302_v6 }
 0xa8f   :  { %v3284_v1 = vadd.f32 %v4883_v8, %v3283_v44 }
 0xa90   :  { %v3304_v16 = vadd.f32 %v4885_v12, %v3303_v56 }
 0xa91   :  { %v3288_v22 = vsel %vm3287_vm3, %v4883_v8, %v3284_v1 }
 0xa92   :  { %v3293_v14 = vsel %vm3290_vm4, %v3292_v25, %v3288_v22  ;;  %v3308_v35 = vsel %vm3307_vm7, %v4885_v12, %v3304_v16 }
 0xa93   :  { %v3315_v34 = vmul.f32 %v3293_v14, %v3272_v53  ;;  %v3313_v40 = vsel %vm3310_vm8, %v3312_v49, %v3308_v35 }
 0xa94   :  { %v3318_v3 = vsub.f32 1.0, %v3313_v40  ;;  %v3320_v11 = vmul.f32 %v3313_v40, %v7086_v63  ;;  %v3422_v63 = vld [vmem:[%s7178_s9 + $0x50] sm:$0xff] }
 0xa95   :  { %v3316_v27 = vadd.f32 %v3315_v34, %v2497_v29  ;;  %3437 = vmatpush.msrb.mxu0 %v3422_v63  ;;  %v7193_v34 = vld [vmem:[#allocation9_spill] sm:$0xff] }
 0xa96   :  { %v2499_v36 = vadd.f32 %v7193_v34, %v6886_v39 }
 0xa97   :  { %4886 = vtanh.f32 %v3316_v27  ;;  %3438 = vmatpush.msrb.mxu0 %v3421_v38 }
 0xa99   :  { %3439 = vmatpush.msrb.mxu0 %v3420_v55 }
 0xa9b   :  { %3440 = vmatpush.msrb.mxu0 %v3419_v54 }
 0xa9d   :  { %v4887_v10 = vpop.eup %4886  ;;  %3441 = vmatpush.msrb.mxu0 %v3418_v21 }
 0xa9e   :  { %v3319_v32 = vmul.f32 %v4887_v10, %v3318_v3 }
 0xa9f   :  { %3442 = vmatpush.msrb.mxu0 %v3417_v52 }
 0xaa0   :  { %v7100_v28 = vadd.f32 %v3320_v11, %v3319_v32 }
 0xaa1   :  { %3443 = vmatpush.msrb.mxu0 %v3416_v59 }
 0xaa2   :  { %v3325_v57 = vpack.c.bf16 %v7100_v28, %v7100_v28 }
 0xaa4   :  { %3334 = vmatmul.bf16.vlgmr.msrb.gmra.mxu1 %v3325_v57  ;;  %3347 = vmatmul.bf16.vlgmr.msra.gmra.mxu2 %v3325_v57 }
 0xaa5   :  { %3360 = vmatmul.bf16.vlgmr.msrb.gmra.mxu3 %v3325_v57 }
 0xb21   :  { %v3335_v23 = vpop.f32.mrf.mxu1 }
 0xb22   :  { %v3336_v51 = vadd.f32 %v3335_v23, %v6858_v5  ;;  %v7192_v5 = vld [vmem:[#allocation10_spill] sm:$0xff] }
 0xb23   :  { %v2470_v7 = vadd.f32 %v7192_v5, %v6869_v15  ;;  %v3415_v15 = vld [vmem:[%s7178_s9 + $0x18] sm:$0xff] }
 0xb24   :  { %v3365_v45 = vadd.f32 %v3336_v51, %v2441_v62  ;;  %3444 = vmatpush.msrb.mxu0 %v3415_v15 }
 0xb26   :  { %v4487_v41 = vmul.f32 -1.442695, %v3365_v45 }
 0xb27   :  { %v3348_v47 = vpop.f32.mrf.mxu2 }
 0xb28   :  { %4888 = vpow2.f32 %v4487_v41  ;;  %v3349_v50 = vadd.f32 %v3348_v47, %v6867_v0  ;;  %v3361_v2 = vpop.f32.mrf.mxu3  ;;  %v3414_v0 = vld [vmem:[%s7178_s9 + $0x10] sm:$0xff] }
 0xb29   :  { %v3337_v60 = vpop.f32.mrf.mxu1  ;;  %3445 = vmatpush.msrb.mxu0 %v3414_v0  ;;  %v3362_v18 = vadd.f32 %v3361_v2, %v6884_v42 }
 0xb2a   :  { %v3385_v24 = vadd.f32 %v3349_v50, %v2470_v7 }
 0xb2b   :  { %3446 = vmatpush.msrb.mxu0 %v3413_v13 }
 0xb2c   :  { %v4488_v61 = vmul.f32 -1.442695, %v3385_v24 }
 0xb2d   :  { %3447 = vmatpush.msrb.mxu0 %v3412_v43 }
 0xb2e   :  { %v4889_v48 = vpop.eup %4888  ;;  %4890 = vpow2.f32 %v4488_v61 }
 0xb2f   :  { %v3369_v31 = vadd.f32 1.0, %v4889_v48  ;;  %v3350_v8 = vpop.f32.mrf.mxu2 }
 0xb30   :  { %v3363_v12 = vpop.f32.mrf.mxu3 }
 0xb31   :  { %4892 = vrcp.f32 %v3369_v31  ;;  %v3381_v17 = vand.u32 2147483648, %v3369_v31  ;;  %v3379_v1 = vand.u32 2147483647, %v3369_v31  ;;  %vm3375_vm10 = vweird.f32 %v3369_v31 }
 0xb33   :  { %v3382_v14 = vor.u32 1.1754944e-38, %v3381_v17  ;;  %vm3380_vm12 = vcmp.eq.f32.partialorder %v3379_v1, 8.507059e+37 }
 0xb34   :  { %v4891_v9 = vpop.eup %4890 }
 0xb35   :  { %v3389_v30 = vadd.f32 1.0, %v4891_v9 }
 0xb37   :  { %v4893_v37 = vpop.eup %4892  ;;  %4894 = vrcp.f32 %v3389_v30  ;;  %v3401_v35 = vand.u32 2147483648, %v3389_v30  ;;  %v3399_v40 = vand.u32 2147483647, %v3389_v30  ;;  %vm3395_vm14 = vweird.f32 %v3389_v30 }
 0xb38   :  { %v3371_v6 = vmul.f32 %v4893_v37, %v3369_v31  ;;  %vm3376_vm9 = vweird.f32 %v4893_v37 }
 0xb39   :  { %vm3377_vm11 = vmor %vm3375_vm10, %vm3376_vm9  ;;  %v3402_v32 = vor.u32 1.1754944e-38, %v3401_v35  ;;  %vm3400_vm0 = vcmp.eq.f32.partialorder %v3399_v40, 8.507059e+37 }
 0xb3a   :  { %v3372_v44 = vsub.f32 1.0, %v3371_v6 }
 0xb3c   :  { %v3373_v56 = vmul.f32 %v4893_v37, %v3372_v44 }
 0xb3d   :  { %v4895_v25 = vpop.eup %4894 }
 0xb3e   :  { %v3391_v53 = vmul.f32 %v4895_v25, %v3389_v30  ;;  %v3374_v22 = vadd.f32 %v4893_v37, %v3373_v56  ;;  %vm3396_vm13 = vweird.f32 %v4895_v25 }
 0xb3f   :  { %vm3397_vm15 = vmor %vm3395_vm14, %vm3396_vm13 }
 0xb40   :  { %v3392_v16 = vsub.f32 1.0, %v3391_v53  ;;  %v3378_v29 = vsel %vm3377_vm11, %v4893_v37, %v3374_v22 }
 0xb41   :  { %v3383_v46 = vsel %vm3380_vm12, %v3382_v14, %v3378_v29 }
 0xb42   :  { %v3393_v27 = vmul.f32 %v4895_v25, %v3392_v16  ;;  %v3405_v49 = vmul.f32 %v3383_v46, %v3362_v18 }
 0xb44   :  { %v3394_v3 = vadd.f32 %v4895_v25, %v3393_v27  ;;  %v3406_v10 = vadd.f32 %v3405_v49, %v2499_v36 }
 0xb46   :  { %v3398_v11 = vsel %vm3397_vm15, %v4895_v25, %v3394_v3  ;;  %4896 = vtanh.f32 %v3406_v10 }
 0xb47   :  { %v3403_v42 = vsel %vm3400_vm0, %v3402_v32, %v3398_v11 }
 0xb48   :  { %v3408_v57 = vsub.f32 1.0, %v3403_v42  ;;  %v3410_v39 = vmul.f32 %v3403_v42, %v7100_v28 }
 0xb4c   :  { %v4897_v26 = vpop.eup %4896 }
 0xb4d   :  { %v3409_v4 = vmul.f32 %v4897_v26, %v3408_v57 }
 0xb4f   :  { %v3411_v20 = vadd.f32 %v3410_v39, %v3409_v4 }
 0xb51   :  { %3448 = vmatmul.f32.vlgmr.msrb.gmra.mxu0 %v3411_v20 }
 0xbce   :  { %v3449_v58 = vpop.f32.mrf.mxu0 }
 0xbcf   :  { %v3450_v63 = vadd.f32 %v4737_v19, %v3449_v58 }
 0xbd1   :  { %3452 = vst [vmem:[%s7179_s11] sm:$0xff] %v3450_v63 }

</bundles_post_ra>
